<compile_context>
chip_gen: v7x
topology: tpu7x:2x2x1
jax: 0.10.0
libtpu: 0.0.40
codegen_flags: <defaults>
</compile_context>

<pallas_src>
import jax
import jax.numpy as jnp
from jax.experimental import pallas as pl
from jax.experimental.pallas import tpu as pltpu


def _leaky_relu(x, slope=0.2):
    return jnp.where(x > 0, x, slope * x)


def discriminator_kernel(x_ref, w1_ref, b1_ref, w2_ref, b2_ref, w3_ref, b3_ref,
                         out_ref):
    """Fused MLP forward for one batch tile: (TB, D) -> (TB, 1)."""
    x = x_ref[...]                                           # (TB, D) bf16

    # layer1: Linear(D, 512) + LeakyReLU(0.2)   (bf16 MXU, f32 accumulate)
    h1 = jnp.dot(x, w1_ref[...], preferred_element_type=jnp.float32)
    h1 = _leaky_relu(h1 + b1_ref[...])                       # (TB, 512) f32

    # layer2: Linear(512, 256) + LeakyReLU(0.2)
    h2 = jnp.dot(h1.astype(jnp.bfloat16), w2_ref[...],
                 preferred_element_type=jnp.float32)
    h2 = _leaky_relu(h2 + b2_ref[...])                       # (TB, 256) f32

    # classifier: Linear(256, 1) as VPU multiply + lane reduction
    # (avoids a 1-lane MXU matmul; uses otherwise-idle VPU/XLU slots).
    w3_row = w3_ref[...].astype(jnp.float32)                 # (1, 256)
    v = jnp.sum(h2 * w3_row, axis=-1, keepdims=True) + b3_ref[...]

    out_ref[...] = v.astype(out_ref.dtype)


def discriminator_forward(img, params, tb=256):
    """img: (B, C, H, W) -> validity: (B, 1) float32."""
    w1, b1, w2, b2, w3, b3 = params
    B = img.shape[0]
    D = w1.shape[0]
    H1 = w1.shape[1]
    H2 = w2.shape[1]

    # Flatten (== torch view(B, -1)) and cast activations to bf16.
    x = img.reshape(B, -1).astype(jnp.bfloat16)

    # Pad batch to a multiple of the tile so the last grid step is dense.
    n_tiles = -(-B // tb)
    b_pad = n_tiles * tb
    if b_pad != B:
        x = jnp.pad(x, ((0, b_pad - B), (0, 0)))

    w1 = w1.astype(jnp.bfloat16)
    w2 = w2.astype(jnp.bfloat16)
    w3_row = w3.reshape(1, H2).astype(jnp.bfloat16)          # (1, 256)
    b1 = b1.reshape(1, H1).astype(jnp.float32)
    b2 = b2.reshape(1, H2).astype(jnp.float32)
    b3 = b3.reshape(1, 1).astype(jnp.float32)

    flops = 2 * B * (D * H1 + H1 * H2 + H2)
    bytes_accessed = (
        (D * H1 + H1 * H2 + H2) * 2        # bf16 weights
        + (H1 + H2 + 1) * 4                # f32 biases
        + B * D * 2                        # bf16 activations in
        + B * 4                            # f32 validity out
    )

    const = lambda i: (0, 0)
    out = pl.pallas_call(
        discriminator_kernel,
        out_shape=jax.ShapeDtypeStruct((b_pad, 1), jnp.float32),
        grid=(n_tiles,),
        in_specs=[
            pl.BlockSpec((tb, D), lambda i: (i, 0)),         # x tile (pipelined)
            pl.BlockSpec((D, H1), const),                    # w1 resident
            pl.BlockSpec((1, H1), const),                    # b1
            pl.BlockSpec((H1, H2), const),                   # w2
            pl.BlockSpec((1, H2), const),                    # b2
            pl.BlockSpec((1, H2), const),                    # w3 row
            pl.BlockSpec((1, 1), const),                     # b3
        ],
        out_specs=pl.BlockSpec((tb, 1), lambda i: (i, 0)),
        compiler_params=pltpu.CompilerParams(
            dimension_semantics=("parallel",)),
        cost_estimate=pl.CostEstimate(flops=flops, transcendentals=0,
                                      bytes_accessed=bytes_accessed),
    )(x, w1, b1, w2, b2, w3_row, b3)

    return out[:B]


def init_params(key, in_features, h1=512, h2=256, out_features=1):
    """Deterministic init mimicking nn.Linear default (uniform +-1/sqrt(fan_in))."""
    ks = jax.random.split(key, 6)

    def lin(kw, kb, fan_in, fan_out):
        bound = 1.0 / jnp.sqrt(jnp.float32(fan_in))
        w = jax.random.uniform(kw, (fan_in, fan_out), jnp.float32, -bound, bound)
        b = jax.random.uniform(kb, (1, fan_out), jnp.float32, -bound, bound)
        return w, b

    w1, b1 = lin(ks[0], ks[1], in_features, h1)
    w2, b2 = lin(ks[2], ks[3], h1, h2)
    w3, b3 = lin(ks[4], ks[5], h2, out_features)
    return (w1, b1, w2, b2, w3, b3)


if __name__ == "__main__":
    key = jax.random.PRNGKey(0)
    k_img, k_par = jax.random.split(key)

    # Small shapes consistent with the module: B=2, channels=4, img_size=16.
    B, C, H, W = 2, 4, 16, 16
    in_features = C * H * W                                  # 1024

    img = jax.random.normal(k_img, (B, C, H, W), dtype=jnp.float32)
    params = init_params(k_par, in_features)

    validity = discriminator_forward(img, params)
    validity = jax.block_until_ready(validity)

    # Reference in plain JAX with the same bf16-matmul / f32-accumulate math.
    w1, b1, w2, b2, w3, b3 = params
    xb = img.reshape(B, -1).astype(jnp.bfloat16)
    r1 = jnp.dot(xb, w1.astype(jnp.bfloat16),
                 preferred_element_type=jnp.float32) + b1
    r1 = jnp.where(r1 > 0, r1, 0.2 * r1)
    r2 = jnp.dot(r1.astype(jnp.bfloat16), w2.astype(jnp.bfloat16),
                 preferred_element_type=jnp.float32) + b2
    r2 = jnp.where(r2 > 0, r2, 0.2 * r2)
    w3_row = w3.reshape(1, -1).astype(jnp.bfloat16).astype(jnp.float32)
    ref = jnp.sum(r2 * w3_row, axis=-1, keepdims=True) + b3.reshape(1, 1)

    assert validity.shape == (B, 1)
    assert jnp.allclose(validity, ref, atol=5e-3, rtol=5e-3), (
        (validity - ref))

    print("KERNEL_OK")
</pallas_src>

<mosaic_0001>
module attributes {stable_mosaic.version = 11 : i64} {
  func.func @discriminator_kernel(%arg0: i32, %arg1: memref<256x1024xbf16, #tpu.memory_space<vmem>>, %arg2: memref<1024x512xbf16, #tpu.memory_space<vmem>>, %arg3: memref<1x512xf32, #tpu.memory_space<vmem>>, %arg4: memref<512x256xbf16, #tpu.memory_space<vmem>>, %arg5: memref<1x256xf32, #tpu.memory_space<vmem>>, %arg6: memref<1x256xbf16, #tpu.memory_space<vmem>>, %arg7: memref<1x1xf32, #tpu.memory_space<vmem>>, %arg8: memref<256x1xf32, #tpu.memory_space<vmem>>) attributes {dimension_semantics = [#tpu.dimension_semantics<parallel>], iteration_bounds = array<i64: 1>, scalar_prefetch = 0 : i64, scratch_operands = 0 : i64, tpu.core_type = #tpu.core_type<tc>, window_params = [{transform_indices = @transform_0, window_bounds = array<i64: 256, 1024>}, {pipeline_mode = #tpu.pipeline_mode<synchronous>, transform_indices = @transform_1, window_bounds = array<i64: 1024, 512>}, {pipeline_mode = #tpu.pipeline_mode<synchronous>, transform_indices = @transform_2, window_bounds = array<i64: 1, 512>}, {pipeline_mode = #tpu.pipeline_mode<synchronous>, transform_indices = @transform_3, window_bounds = array<i64: 512, 256>}, {pipeline_mode = #tpu.pipeline_mode<synchronous>, transform_indices = @transform_4, window_bounds = array<i64: 1, 256>}, {pipeline_mode = #tpu.pipeline_mode<synchronous>, transform_indices = @transform_5, window_bounds = array<i64: 1, 256>}, {pipeline_mode = #tpu.pipeline_mode<synchronous>, transform_indices = @transform_6, window_bounds = array<i64: 1, 1>}, {transform_indices = @transform_7, window_bounds = array<i64: 256, 1>}]} {
    %c0 = arith.constant 0 : index
    %c0_0 = arith.constant 0 : index
    %0 = vector.load %arg1[%c0, %c0_0] : memref<256x1024xbf16, #tpu.memory_space<vmem>>, vector<256x1024xbf16>
    %c0_1 = arith.constant 0 : index
    %c0_2 = arith.constant 0 : index
    %1 = vector.load %arg2[%c0_1, %c0_2] : memref<1024x512xbf16, #tpu.memory_space<vmem>>, vector<1024x512xbf16>
    %cst = arith.constant dense<0.000000e+00> : vector<256x512xf32>
    %2 = tpu.matmul %0, %1, %cst {dimension_numbers = #tpu.dot_dimension_numbers<[1], [0], [0], [1], [0, 0, 1, 1], [], []>} : vector<256x1024xbf16>, vector<1024x512xbf16>, vector<256x512xf32> -> vector<256x512xf32>
    %c0_3 = arith.constant 0 : index
    %c0_4 = arith.constant 0 : index
    %3 = vector.load %arg3[%c0_3, %c0_4] : memref<1x512xf32, #tpu.memory_space<vmem>>, vector<1x512xf32>
    %4 = vector.broadcast %3 : vector<1x512xf32> to vector<256x512xf32>
    %5 = arith.addf %2, %4 : vector<256x512xf32>
    %cst_5 = arith.constant 0.000000e+00 : f32
    %6 = vector.broadcast %cst_5 : f32 to vector<256x512xf32>
    %7 = arith.cmpf ogt, %5, %6 : vector<256x512xf32>
    %cst_6 = arith.constant 2.000000e-01 : f32
    %8 = vector.broadcast %cst_6 : f32 to vector<256x512xf32>
    %9 = arith.mulf %8, %5 : vector<256x512xf32>
    %10 = arith.select %7, %5, %9 : vector<256x512xi1>, vector<256x512xf32>
    %11 = arith.truncf %10 : vector<256x512xf32> to vector<256x512xbf16>
    %c0_7 = arith.constant 0 : index
    %c0_8 = arith.constant 0 : index
    %12 = vector.load %arg4[%c0_7, %c0_8] : memref<512x256xbf16, #tpu.memory_space<vmem>>, vector<512x256xbf16>
    %cst_9 = arith.constant dense<0.000000e+00> : vector<256x256xf32>
    %13 = tpu.matmul %11, %12, %cst_9 {dimension_numbers = #tpu.dot_dimension_numbers<[1], [0], [0], [1], [0, 0, 1, 1], [], []>} : vector<256x512xbf16>, vector<512x256xbf16>, vector<256x256xf32> -> vector<256x256xf32>
    %c0_10 = arith.constant 0 : index
    %c0_11 = arith.constant 0 : index
    %14 = vector.load %arg5[%c0_10, %c0_11] : memref<1x256xf32, #tpu.memory_space<vmem>>, vector<1x256xf32>
    %15 = vector.broadcast %14 : vector<1x256xf32> to vector<256x256xf32>
    %16 = arith.addf %13, %15 : vector<256x256xf32>
    %cst_12 = arith.constant 0.000000e+00 : f32
    %17 = vector.broadcast %cst_12 : f32 to vector<256x256xf32>
    %18 = arith.cmpf ogt, %16, %17 : vector<256x256xf32>
    %cst_13 = arith.constant 2.000000e-01 : f32
    %19 = vector.broadcast %cst_13 : f32 to vector<256x256xf32>
    %20 = arith.mulf %19, %16 : vector<256x256xf32>
    %21 = arith.select %18, %16, %20 : vector<256x256xi1>, vector<256x256xf32>
    %c0_14 = arith.constant 0 : index
    %c0_15 = arith.constant 0 : index
    %22 = vector.load %arg6[%c0_14, %c0_15] : memref<1x256xbf16, #tpu.memory_space<vmem>>, vector<1x256xbf16>
    %23 = arith.extf %22 : vector<1x256xbf16> to vector<1x256xf32>
    %24 = vector.broadcast %23 : vector<1x256xf32> to vector<256x256xf32>
    %25 = arith.mulf %21, %24 : vector<256x256xf32>
    %cst_16 = arith.constant dense<0.000000e+00> : vector<256xf32>
    %26 = vector.multi_reduction <add>, %25, %cst_16 [1] : vector<256x256xf32> to vector<256xf32>
    %27 = vector.shape_cast %26 : vector<256xf32> to vector<256x1xf32>
    %c0_17 = arith.constant 0 : index
    %c0_18 = arith.constant 0 : index
    %28 = vector.load %arg7[%c0_17, %c0_18] : memref<1x1xf32, #tpu.memory_space<vmem>>, vector<1x1xf32>
    %29 = vector.broadcast %28 : vector<1x1xf32> to vector<256x1xf32>
    %30 = arith.addf %27, %29 : vector<256x1xf32>
    %c0_19 = arith.constant 0 : index
    %c0_20 = arith.constant 0 : index
    %31 = vector.load %arg8[%c0_19, %c0_20] : memref<256x1xf32, #tpu.memory_space<vmem>>, vector<256x1xf32>
    tpu.vector_store %arg8[%c0_19, %c0_20], %30 {strides = array<i32>} : memref<256x1xf32, #tpu.memory_space<vmem>>, vector<256x1xf32>,
    return
  }
  func.func @transform_0(%arg0: i32) -> (i32, i32) {
    %c0_i32 = arith.constant 0 : i32
    %c0_i32_0 = arith.constant 0 : i32
    return %arg0, %c0_i32 : i32, i32
  }
  func.func @transform_1(%arg0: i32) -> (i32, i32) {
    %c0_i32 = arith.constant 0 : i32
    %c0_i32_0 = arith.constant 0 : i32
    %c0_i32_1 = arith.constant 0 : i32
    return %c0_i32, %c0_i32_0 : i32, i32
  }
  func.func @transform_2(%arg0: i32) -> (i32, i32) {
    %c0_i32 = arith.constant 0 : i32
    %c0_i32_0 = arith.constant 0 : i32
    %c0_i32_1 = arith.constant 0 : i32
    return %c0_i32, %c0_i32_0 : i32, i32
  }
  func.func @transform_3(%arg0: i32) -> (i32, i32) {
    %c0_i32 = arith.constant 0 : i32
    %c0_i32_0 = arith.constant 0 : i32
    %c0_i32_1 = arith.constant 0 : i32
    return %c0_i32, %c0_i32_0 : i32, i32
  }
  func.func @transform_4(%arg0: i32) -> (i32, i32) {
    %c0_i32 = arith.constant 0 : i32
    %c0_i32_0 = arith.constant 0 : i32
    %c0_i32_1 = arith.constant 0 : i32
    return %c0_i32, %c0_i32_0 : i32, i32
  }
  func.func @transform_5(%arg0: i32) -> (i32, i32) {
    %c0_i32 = arith.constant 0 : i32
    %c0_i32_0 = arith.constant 0 : i32
    %c0_i32_1 = arith.constant 0 : i32
    return %c0_i32, %c0_i32_0 : i32, i32
  }
  func.func @transform_6(%arg0: i32) -> (i32, i32) {
    %c0_i32 = arith.constant 0 : i32
    %c0_i32_0 = arith.constant 0 : i32
    %c0_i32_1 = arith.constant 0 : i32
    return %c0_i32, %c0_i32_0 : i32, i32
  }
  func.func @transform_7(%arg0: i32) -> (i32, i32) {
    %c0_i32 = arith.constant 0 : i32
    %c0_i32_0 = arith.constant 0 : i32
    return %arg0, %c0_i32 : i32, i32
  }
}

</mosaic_0001>

<bundles_post_ra>
// kernel: tpu_custom_call.1
= control target key start
LH: loop header
LB: loop body
LE: loop exit
PB: predicated region body
PF: predicated region fallthrough
CT: control target
= control target key end

     0   :  { %s8536_s0 = inlined_call_operand.hbm [shape: bf16[256,1024], index: 0, kind: input, shape index: {}]   ;;  %s8537_s1 = inlined_call_operand.hbm [shape: bf16[1024,512], index: 1, kind: input, shape index: {}]   ;;  %s8538_s2 = inlined_call_operand.vmem [shape: f32[1,512], index: 2, kind: input, shape index: {}]   ;;  %s8539_s3 = inlined_call_operand.hbm [shape: bf16[512,256], index: 3, kind: input, shape index: {}]   ;;  %s8540_s4 = inlined_call_operand.vmem [shape: f32[1,256], index: 4, kind: input, shape index: {}]   ;;  %s8541_s5 = inlined_call_operand.vmem [shape: bf16[1,256], index: 5, kind: input, shape index: {}]   ;;  %s8542_s6 = inlined_call_operand.<no memory space> [shape: f32[1,1], index: 6, kind: input, shape index: {}]   ;;  %s8543_s7 = inlined_call_operand.vmem [shape: f32[256,1], index: 7, kind: output, shape index: {}]  }
   0x1   :  { %v12_v0 = vstv %s8542_s6 }
   0x2   :  { %13 = vst [vmem:[#allocation2] sm:$0x1] %v12_v0 }
   0x3   :  { %14 = vsyncpa [#allocation4], 0 }
   0x4   :  { %15 = vsyncpa [#allocation6], 0  ;;  %s7269_s26 = smov [#allocation5]   ;;  %s7199_s30 = scalar_lea.hbm %s8537_s1, 32768 }
   0x5   :  { %s33_s27 = sshll.u32 %s7269_s26, 4  ;;  %p7200_p0 = scmp.ne.s32.totalorder %s8537_s1, %s7199_s30  ;;  %s34_s27 = int_to_ptr.vmem [resolvable:$true] %s33_s27 }
   0x6   :  { %p7203_p1 = scmp.lt.u32.totalorder %s7199_s30, %s8537_s1 }
   0x8   :  { %p7205_p2 = pnand %p7203_p1, %p7200_p0 }
   0xa   :  { %7208 = shalt.err (!%p7205_p2)
}
   0xb   :  { %s7209_s6 = scalar_lea.vmem %s34_s27, 32768  ;;  %p7214_p4 = scmp.lt.s32.totalorder %s34_s27, %s34_s27 }
   0xc   :  { %p7210_p3 = scmp.ne.s32.totalorder %s34_s27, %s7209_s6  ;;  %p7215_p5 = scmp.lt.s32.totalorder %s7209_s6, %s7209_s6 }
   0xe   :  { %p7216_p6 = por %p7215_p5, %p7214_p4 }
  0x10   :  { %p7217_p7 = pnand %p7216_p6, %p7210_p3 }
  0x12   :  { %7220 = shalt.err (!%p7217_p7)
}
  0x13   :  { %s7270_s12 = smov 256   ;;  %s7271_s13 = smov 16  }
  0x14   :  { %39 = dma.hbm_to_vmem [thread:$0]  %s8537_s1, 32768, %s34_s27, [#allocation6], %s7270_s12, %s7270_s12, %s7271_s13  }
  0x15   :  { %s7272_s16 = smov [#allocation3]   ;;  %s7221_s20 = scalar_lea.hbm %s8536_s0, 16384 }
  0x16   :  { %s21_s17 = sshll.u32 %s7272_s16, 4  ;;  %p7222_p8 = scmp.ne.s32.totalorder %s8536_s0, %s7221_s20  ;;  %s22_s17 = int_to_ptr.vmem [resolvable:$true] %s21_s17 }
  0x17   :  { %p7225_p9 = scmp.lt.u32.totalorder %s7221_s20, %s8536_s0 }
  0x19   :  { %p7227_p10 = pnand %p7225_p9, %p7222_p8 }
  0x1b   :  { %7230 = shalt.err (!%p7227_p10)
}
  0x1c   :  { %s7231_s25 = scalar_lea.vmem %s22_s17, 16384  ;;  %p7236_p12 = scmp.lt.s32.totalorder %s22_s17, %s22_s17 }
  0x1d   :  { %p7232_p11 = scmp.ne.s32.totalorder %s22_s17, %s7231_s25  ;;  %p7237_p13 = scmp.lt.s32.totalorder %s7231_s25, %s7231_s25 }
  0x1f   :  { %p7238_p0 = por %p7237_p13, %p7236_p12 }
  0x21   :  { %p7239_p1 = pnand %p7238_p0, %p7232_p11 }
  0x23   :  { %7242 = shalt.err (!%p7239_p1)
}
  0x24   :  { %s7273_s1 = smov 512   ;;  %s7274_s26 = smov 32  }
  0x25   :  { %27 = dma.hbm_to_vmem [thread:$0]  %s8536_s0, 16384, %s22_s17, [#allocation4], %s7273_s1, %s7273_s1, %s7274_s26  }
  0x26   :  { %s7275_s29 = smov [#allocation7]   ;;  %s7243_s10 = scalar_lea.hbm %s8539_s3, 8192 }
  0x27   :  { %s47_s30 = sshll.u32 %s7275_s29, 4  ;;  %p7244_p2 = scmp.ne.s32.totalorder %s8539_s3, %s7243_s10  ;;  %s48_s30 = int_to_ptr.vmem [resolvable:$true] %s47_s30 }
  0x28   :  { %p7247_p3 = scmp.lt.u32.totalorder %s7243_s10, %s8539_s3 }
  0x2a   :  { %p7249_p4 = pnand %p7247_p3, %p7244_p2 }
  0x2c   :  { %7252 = shalt.err (!%p7249_p4)
}
  0x2d   :  { %s7253_s14 = scalar_lea.vmem %s48_s30, 8192  ;;  %p7258_p6 = scmp.lt.s32.totalorder %s48_s30, %s48_s30 }
  0x2e   :  { %p7254_p5 = scmp.ne.s32.totalorder %s48_s30, %s7253_s14  ;;  %p7259_p7 = scmp.lt.s32.totalorder %s7253_s14, %s7253_s14 }
  0x30   :  { %p7260_p8 = por %p7259_p7, %p7258_p6 }
  0x32   :  { %p7261_p9 = pnand %p7260_p8, %p7254_p5 }
  0x34   :  { %7264 = shalt.err (!%p7261_p9)
}
  0x35   :  { %s7276_s0 = smov 128   ;;  %s7277_s15 = smov 8  }
  0x36   :  { %53 = dma.hbm_to_vmem [thread:$0]  %s8539_s3, 8192, %s48_s30, [#allocation6], %s7276_s0, %s7276_s0, %s7277_s15  }
  0x37   :  { %7265 = dma.done.wait [#allocation4], 16384  }
  0x38   :  { %7266 = vsyncadd [#allocation4], 4294950912 }
  0x39   :  { %7267 = dma.done.wait [#allocation6], 40960  }
  0x3a   :  { %7268 = vsyncadd [#allocation6], 4294926336  ;;  %v6718_v1 = vld [vmem:[#allocation5 + $0x4] ss:$16 sps:$4 sm:$0xff]   ;;  %v6722_v3 = vld [vmem:[#allocation5] ss:$16 sps:$4 sm:$0xff]  }
  0x3b   :  { %v6720_v2 = vld [vmem:[#allocation5 + $0x204] ss:$16 sps:$4 sm:$0xff]   ;;  %2395 = vmatprep.subr.bf16.mxu1 %v6718_v1  ;;  %v6723_v4 = vld [vmem:[#allocation5 + $0x200] ss:$16 sps:$4 sm:$0xff]   ;;  %v70_v50 = vld [vmem:[#allocation3 + $0x8] sm:$0xff] }
  0x3c   :  { %2588 = vmatprep.subr.bf16.mxu0 %v6720_v2  ;;  %v6724_v5 = vld [vmem:[#allocation5 + $0x24] ss:$16 sps:$4 sm:$0xff]   ;;  %2396 = vmatpush1.bf16.msra.mxu1 %v6722_v3  ;;  %v6728_v7 = vld [vmem:[#allocation5 + $0x20] ss:$16 sps:$4 sm:$0xff]   ;;  %v74_v51 = vld [vmem:[#allocation3 + $0x28] sm:$0xff] }
  0x3d   :  { %2589 = vmatpush1.bf16.msra.mxu0 %v6723_v4  ;;  %v6726_v6 = vld [vmem:[#allocation5 + $0x224] ss:$16 sps:$4 sm:$0xff]   ;;  %2397 = vmatprep.subr.bf16.mxu1 %v6724_v5  ;;  %v6729_v8 = vld [vmem:[#allocation5 + $0x220] ss:$16 sps:$4 sm:$0xff]   ;;  %v7359_v56 = vcombine.high %v70_v50, %v74_v51 }
  0x3e   :  { %2590 = vmatprep.subr.bf16.mxu0 %v6726_v6  ;;  %v6730_v9 = vld [vmem:[#allocation5 + $0x44] ss:$16 sps:$4 sm:$0xff]   ;;  %v6734_v11 = vld [vmem:[#allocation5 + $0x40] ss:$16 sps:$4 sm:$0xff]  }
  0x3f   :  { %v6732_v10 = vld [vmem:[#allocation5 + $0x244] ss:$16 sps:$4 sm:$0xff]   ;;  %v6735_v12 = vld [vmem:[#allocation5 + $0x240] ss:$16 sps:$4 sm:$0xff]   ;;  %2620 = vmatprep.mubr.bf16.mxu0 %v7359_v56 }
  0x40   :  { %2398 = vmatpush1.bf16.msra.mxu1 %v6728_v7  ;;  %v6736_v13 = vld [vmem:[#allocation5 + $0x64] ss:$16 sps:$4 sm:$0xff]   ;;  %v6740_v15 = vld [vmem:[#allocation5 + $0x60] ss:$16 sps:$4 sm:$0xff]   ;;  %v6816_v7 = vld [vmem:[#allocation5 + $0xc] ss:$16 sps:$4 sm:$0xff]  }
  0x41   :  { %2591 = vmatpush1.bf16.msra.mxu0 %v6729_v8  ;;  %2399 = vmatprep.subr.bf16.mxu1 %v6730_v9  ;;  %v6738_v14 = vld [vmem:[#allocation5 + $0x264] ss:$16 sps:$4 sm:$0xff]   ;;  %v6741_v16 = vld [vmem:[#allocation5 + $0x260] ss:$16 sps:$4 sm:$0xff]  }
  0x42   :  { %2592 = vmatprep.subr.bf16.mxu0 %v6732_v10  ;;  %v6742_v17 = vld [vmem:[#allocation5 + $0x84] ss:$16 sps:$4 sm:$0xff]   ;;  %v6746_v19 = vld [vmem:[#allocation5 + $0x80] ss:$16 sps:$4 sm:$0xff]   ;;  %v78_v10 = vld [vmem:[#allocation3 + $0x48] sm:$0xff] }
  0x43   :  { %v6744_v18 = vld [vmem:[#allocation5 + $0x284] ss:$16 sps:$4 sm:$0xff]   ;;  %v6747_v20 = vld [vmem:[#allocation5 + $0x280] ss:$16 sps:$4 sm:$0xff]  }
  0x44   :  { %2400 = vmatpush1.bf16.msra.mxu1 %v6734_v11  ;;  %v6748_v21 = vld [vmem:[#allocation5 + $0xa4] ss:$16 sps:$4 sm:$0xff]   ;;  %v6752_v23 = vld [vmem:[#allocation5 + $0xa0] ss:$16 sps:$4 sm:$0xff]   ;;  %v82_v11 = vld [vmem:[#allocation3 + $0x68] sm:$0xff] }
  0x45   :  { %2593 = vmatpush1.bf16.msra.mxu0 %v6735_v12  ;;  %2401 = vmatprep.subr.bf16.mxu1 %v6736_v13  ;;  %v6750_v22 = vld [vmem:[#allocation5 + $0x2a4] ss:$16 sps:$4 sm:$0xff]   ;;  %v6753_v24 = vld [vmem:[#allocation5 + $0x2a0] ss:$16 sps:$4 sm:$0xff]   ;;  %v7365_v13 = vcombine.low %v70_v50, %v74_v51 }
  0x46   :  { %2594 = vmatprep.subr.bf16.mxu0 %v6738_v14  ;;  %v6754_v25 = vld [vmem:[#allocation5 + $0xc4] ss:$16 sps:$4 sm:$0xff]   ;;  %v6758_v27 = vld [vmem:[#allocation5 + $0xc0] ss:$16 sps:$4 sm:$0xff]   ;;  %v6814_v14 = vld [vmem:[#allocation5 + $0x8] ss:$16 sps:$4 sm:$0xff]  }
  0x47   :  { %v6756_v26 = vld [vmem:[#allocation5 + $0x2c4] ss:$16 sps:$4 sm:$0xff]   ;;  %v6759_v28 = vld [vmem:[#allocation5 + $0x2c0] ss:$16 sps:$4 sm:$0xff]  }
  0x48   :  { %2402 = vmatpush1.bf16.msra.mxu1 %v6740_v15  ;;  %v6760_v29 = vld [vmem:[#allocation5 + $0xe4] ss:$16 sps:$4 sm:$0xff]   ;;  %v6764_v31 = vld [vmem:[#allocation5 + $0xe0] ss:$16 sps:$4 sm:$0xff]  }
  0x49   :  { %2595 = vmatpush1.bf16.msra.mxu0 %v6741_v16  ;;  %2403 = vmatprep.subr.bf16.mxu1 %v6742_v17  ;;  %v6762_v30 = vld [vmem:[#allocation5 + $0x2e4] ss:$16 sps:$4 sm:$0xff]   ;;  %v6765_v32 = vld [vmem:[#allocation5 + $0x2e0] ss:$16 sps:$4 sm:$0xff]   ;;  %v7369_v16 = vcombine.high %v78_v10, %v82_v11  ;;  %v6819_v17 = vld [vmem:[#allocation5 + $0x2c] ss:$16 sps:$4 sm:$0xff]  }
  0x4a   :  { %2596 = vmatprep.subr.bf16.mxu0 %v6744_v18  ;;  %v6766_v33 = vld [vmem:[#allocation5 + $0x104] ss:$16 sps:$4 sm:$0xff]   ;;  %v6770_v35 = vld [vmem:[#allocation5 + $0x100] ss:$16 sps:$4 sm:$0xff]   ;;  %v6817_v18 = vld [vmem:[#allocation5 + $0x28] ss:$16 sps:$4 sm:$0xff]  }
  0x4b   :  { %v6768_v34 = vld [vmem:[#allocation5 + $0x304] ss:$16 sps:$4 sm:$0xff]   ;;  %v6771_v36 = vld [vmem:[#allocation5 + $0x300] ss:$16 sps:$4 sm:$0xff]  }
  0x4c   :  { %2404 = vmatpush1.bf16.msra.mxu1 %v6746_v19  ;;  %v6772_v37 = vld [vmem:[#allocation5 + $0x124] ss:$16 sps:$4 sm:$0xff]   ;;  %v6776_v39 = vld [vmem:[#allocation5 + $0x120] ss:$16 sps:$4 sm:$0xff]  }
  0x4d   :  { %2597 = vmatpush1.bf16.msra.mxu0 %v6747_v20  ;;  %2405 = vmatprep.subr.bf16.mxu1 %v6748_v21  ;;  %v6774_v38 = vld [vmem:[#allocation5 + $0x324] ss:$16 sps:$4 sm:$0xff]   ;;  %v6777_v40 = vld [vmem:[#allocation5 + $0x320] ss:$16 sps:$4 sm:$0xff]  }
  0x4e   :  { %2598 = vmatprep.subr.bf16.mxu0 %v6750_v22  ;;  %v6778_v41 = vld [vmem:[#allocation5 + $0x144] ss:$16 sps:$4 sm:$0xff]   ;;  %v6782_v43 = vld [vmem:[#allocation5 + $0x140] ss:$16 sps:$4 sm:$0xff]  }
  0x4f   :  { %v6780_v42 = vld [vmem:[#allocation5 + $0x344] ss:$16 sps:$4 sm:$0xff]   ;;  %v6783_v44 = vld [vmem:[#allocation5 + $0x340] ss:$16 sps:$4 sm:$0xff]  }
  0x50   :  { %2406 = vmatpush1.bf16.msra.mxu1 %v6752_v23  ;;  %v6784_v45 = vld [vmem:[#allocation5 + $0x164] ss:$16 sps:$4 sm:$0xff]   ;;  %v6788_v47 = vld [vmem:[#allocation5 + $0x160] ss:$16 sps:$4 sm:$0xff]   ;;  %v86_v23 = vld [vmem:[#allocation3 + $0x88] sm:$0xff] }
  0x51   :  { %2599 = vmatpush1.bf16.msra.mxu0 %v6753_v24  ;;  %2407 = vmatprep.subr.bf16.mxu1 %v6754_v25  ;;  %v6786_v46 = vld [vmem:[#allocation5 + $0x364] ss:$16 sps:$4 sm:$0xff]   ;;  %v6789_v52 = vld [vmem:[#allocation5 + $0x360] ss:$16 sps:$4 sm:$0xff]   ;;  %v90_v24 = vld [vmem:[#allocation3 + $0xa8] sm:$0xff] }
  0x52   :  { %2600 = vmatprep.subr.bf16.mxu0 %v6756_v26  ;;  %v69_v48 = vld [vmem:[#allocation3] sm:$0xff]  ;;  %v6822_v25 = vld [vmem:[#allocation5 + $0x4c] ss:$16 sps:$4 sm:$0xff]  }
  0x53   :  { %v73_v49 = vld [vmem:[#allocation3 + $0x20] sm:$0xff] }
  0x54   :  { %2408 = vmatpush1.bf16.msra.mxu1 %v6758_v27  ;;  %v7357_v53 = vcombine.high %v69_v48, %v73_v49  ;;  %v6790_v54 = vld [vmem:[#allocation5 + $0x184] ss:$16 sps:$4 sm:$0xff]   ;;  %v6794_v57 = vld [vmem:[#allocation5 + $0x180] ss:$16 sps:$4 sm:$0xff]   ;;  %v7363_v12 = vcombine.low %v69_v48, %v73_v49  ;;  %v6831_v49 = vld [vmem:[#allocation5 + $0xac] ss:$16 sps:$4 sm:$0xff]  }
  0x55   :  { %2601 = vmatpush1.bf16.msra.mxu0 %v6759_v28  ;;  %2409 = vmatprep.subr.bf16.mxu1 %v6760_v29  ;;  %v6792_v55 = vld [vmem:[#allocation5 + $0x384] ss:$16 sps:$4 sm:$0xff]   ;;  %v6795_v58 = vld [vmem:[#allocation5 + $0x380] ss:$16 sps:$4 sm:$0xff]   ;;  %v7377_v28 = vcombine.low %v78_v10, %v82_v11  ;;  %v6843_v11 = vld [vmem:[#allocation5 + $0x10c] ss:$16 sps:$4 sm:$0xff]  }
  0x56   :  { %2602 = vmatprep.subr.bf16.mxu0 %v6762_v30  ;;  %2427 = vmatprep.mubr.bf16.mxu1 %v7357_v53  ;;  %v6796_v59 = vld [vmem:[#allocation5 + $0x1a4] ss:$16 sps:$4 sm:$0xff]   ;;  %v6800_v61 = vld [vmem:[#allocation5 + $0x1a0] ss:$16 sps:$4 sm:$0xff]   ;;  %v7381_v30 = vcombine.high %v86_v23, %v90_v24 }
  0x57   :  { %v6798_v60 = vld [vmem:[#allocation5 + $0x3a4] ss:$16 sps:$4 sm:$0xff]   ;;  %v6801_v62 = vld [vmem:[#allocation5 + $0x3a0] ss:$16 sps:$4 sm:$0xff]  }
  0x58   :  { %2410 = vmatpush1.bf16.msra.mxu1 %v6764_v31  ;;  %v6802_v63 = vld [vmem:[#allocation5 + $0x1c4] ss:$16 sps:$4 sm:$0xff]   ;;  %v6806_v1 = vld [vmem:[#allocation5 + $0x1c0] ss:$16 sps:$4 sm:$0xff]   ;;  %v6820_v31 = vld [vmem:[#allocation5 + $0x48] ss:$16 sps:$4 sm:$0xff]  }
  0x59   :  { %2603 = vmatpush1.bf16.msra.mxu0 %v6765_v32  ;;  %2411 = vmatprep.subr.bf16.mxu1 %v6766_v33  ;;  %v6804_v0 = vld [vmem:[#allocation5 + $0x3c4] ss:$16 sps:$4 sm:$0xff]   ;;  %v6807_v2 = vld [vmem:[#allocation5 + $0x3c0] ss:$16 sps:$4 sm:$0xff]   ;;  %v6825_v33 = vld [vmem:[#allocation5 + $0x6c] ss:$16 sps:$4 sm:$0xff]  }
  0x5a   :  { %2604 = vmatprep.subr.bf16.mxu0 %v6768_v34  ;;  %v6808_v3 = vld [vmem:[#allocation5 + $0x1e4] ss:$16 sps:$4 sm:$0xff]   ;;  %v6812_v5 = vld [vmem:[#allocation5 + $0x1e0] ss:$16 sps:$4 sm:$0xff]  }
  0x5b   :  { %v6810_v4 = vld [vmem:[#allocation5 + $0x3e4] ss:$16 sps:$4 sm:$0xff]   ;;  %v6813_v6 = vld [vmem:[#allocation5 + $0x3e0] ss:$16 sps:$4 sm:$0xff]  }
  0x5c   :  { %2412 = vmatpush1.bf16.msra.mxu1 %v6770_v35  ;;  %v77_v8 = vld [vmem:[#allocation3 + $0x40] sm:$0xff] }
  0x5d   :  { %2605 = vmatpush1.bf16.msra.mxu0 %v6771_v36  ;;  %2413 = vmatprep.subr.bf16.mxu1 %v6772_v37  ;;  %v81_v9 = vld [vmem:[#allocation3 + $0x60] sm:$0xff]  ;;  %v94_v37 = vld [vmem:[#allocation3 + $0xc8] sm:$0xff] }
  0x5e   :  { %2606 = vmatprep.subr.bf16.mxu0 %v6774_v38  ;;  %v7367_v15 = vcombine.high %v77_v8, %v81_v9  ;;  %v6840_v19 = vld [vmem:[#allocation5 + $0x404] ss:$16 sps:$4 sm:$0xff]   ;;  %v6838_v22 = vld [vmem:[#allocation5 + $0x400] ss:$16 sps:$4 sm:$0xff]   ;;  %v7375_v27 = vcombine.low %v77_v8, %v81_v9  ;;  %v98_v38 = vld [vmem:[#allocation3 + $0xe8] sm:$0xff] }
  0x5f   :  { %v85_v20 = vld [vmem:[#allocation3 + $0x80] sm:$0xff]  ;;  %v114_v8 = vld [vmem:[#allocation3 + $0x168] sm:$0xff] }
  0x60   :  { %2414 = vmatpush1.bf16.msra.mxu1 %v6776_v39  ;;  %v89_v21 = vld [vmem:[#allocation3 + $0xa0] sm:$0xff]  ;;  %v6823_v39 = vld [vmem:[#allocation5 + $0x68] ss:$16 sps:$4 sm:$0xff]  }
  0x61   :  { %2607 = vmatpush1.bf16.msra.mxu0 %v6777_v40  ;;  %2415 = vmatprep.subr.bf16.mxu1 %v6778_v41  ;;  %v6846_v26 = vld [vmem:[#allocation5 + $0x424] ss:$16 sps:$4 sm:$0xff]   ;;  %v7379_v29 = vcombine.high %v85_v20, %v89_v21  ;;  %v6844_v32 = vld [vmem:[#allocation5 + $0x420] ss:$16 sps:$4 sm:$0xff]   ;;  %v6828_v41 = vld [vmem:[#allocation5 + $0x8c] ss:$16 sps:$4 sm:$0xff]  }
  0x62   :  { %2608 = vmatprep.subr.bf16.mxu0 %v6780_v42  ;;  %v6849_v34 = vld [vmem:[#allocation5 + $0x444] ss:$16 sps:$4 sm:$0xff]   ;;  %v6847_v40 = vld [vmem:[#allocation5 + $0x440] ss:$16 sps:$4 sm:$0xff]   ;;  %v6835_v9 = vld [vmem:[#allocation5 + $0xe8] ss:$16 sps:$4 sm:$0xff]  }
  0x63   :  { %v93_v35 = vld [vmem:[#allocation3 + $0xc0] sm:$0xff] }
  0x64   :  { %2416 = vmatpush1.bf16.msra.mxu1 %v6782_v43  ;;  %v97_v36 = vld [vmem:[#allocation3 + $0xe0] sm:$0xff]  ;;  %v7387_v43 = vcombine.low %v85_v20, %v89_v21  ;;  %v6841_v21 = vld [vmem:[#allocation5 + $0x108] ss:$16 sps:$4 sm:$0xff]  }
  0x65   :  { %2609 = vmatpush1.bf16.msra.mxu0 %v6783_v44  ;;  %2417 = vmatprep.subr.bf16.mxu1 %v6784_v45  ;;  %v6855_v42 = vld [vmem:[#allocation5 + $0x464] ss:$16 sps:$4 sm:$0xff]   ;;  %v7389_v44 = vcombine.low %v86_v23, %v90_v24  ;;  %v7391_v45 = vcombine.high %v93_v35, %v97_v36  ;;  %v6853_v48 = vld [vmem:[#allocation5 + $0x460] ss:$16 sps:$4 sm:$0xff]   ;;  %v6852_v23 = vld [vmem:[#allocation5 + $0x12c] ss:$16 sps:$4 sm:$0xff]  }
  0x66   :  { %2610 = vmatprep.subr.bf16.mxu0 %v6786_v46  ;;  %v7393_v46 = vcombine.high %v94_v37, %v98_v38  ;;  %v6858_v50 = vld [vmem:[#allocation5 + $0x484] ss:$16 sps:$4 sm:$0xff]   ;;  %v6865_v10 = vld [vmem:[#allocation5 + $0x4c0] ss:$16 sps:$4 sm:$0xff]  }
  0x67   :  { %v101_v51 = vld [vmem:[#allocation3 + $0x100] sm:$0xff] }
  0x68   :  { %2418 = vmatpush1.bf16.msra.mxu1 %v6788_v47  ;;  %v6826_v47 = vld [vmem:[#allocation5 + $0x88] ss:$16 sps:$4 sm:$0xff]   ;;  %v6876_v24 = vld [vmem:[#allocation5 + $0x504] ss:$16 sps:$4 sm:$0xff]  }
  0x69   :  { %2611 = vmatpush1.bf16.msra.mxu0 %v6789_v52  ;;  %2419 = vmatprep.subr.bf16.mxu1 %v6790_v54  ;;  %v105_v52 = vld [vmem:[#allocation3 + $0x120] sm:$0xff]  ;;  %v102_v54 = vld [vmem:[#allocation3 + $0x108] sm:$0xff] }
  0x6a   :  { %2612 = vmatprep.subr.bf16.mxu0 %v6792_v55  ;;  %v106_v55 = vld [vmem:[#allocation3 + $0x128] sm:$0xff] }
  0x6c   :  { %2420 = vmatpush1.bf16.msra.mxu1 %v6794_v57  ;;  %v6829_v57 = vld [vmem:[#allocation5 + $0xa8] ss:$16 sps:$4 sm:$0xff]  }
  0x6d   :  { %2613 = vmatpush1.bf16.msra.mxu0 %v6795_v58  ;;  %2421 = vmatprep.subr.bf16.mxu1 %v6796_v59  ;;  %v6856_v58 = vld [vmem:[#allocation5 + $0x480] ss:$16 sps:$4 sm:$0xff]   ;;  %v6834_v59 = vld [vmem:[#allocation5 + $0xcc] ss:$16 sps:$4 sm:$0xff]  }
  0x6e   :  { %2614 = vmatprep.subr.bf16.mxu0 %v6798_v60  ;;  %v6864_v60 = vld [vmem:[#allocation5 + $0x4a4] ss:$16 sps:$4 sm:$0xff]  }
  0x70   :  { %2422 = vmatpush1.bf16.msra.mxu1 %v6800_v61  ;;  %v7399_v61 = vcombine.low %v93_v35, %v97_v36  ;;  %v6861_v35 = vld [vmem:[#allocation5 + $0x14c] ss:$16 sps:$4 sm:$0xff]   ;;  %v6882_v36 = vld [vmem:[#allocation5 + $0x524] ss:$16 sps:$4 sm:$0xff]  }
  0x71   :  { %2615 = vmatpush1.bf16.msra.mxu0 %v6801_v62  ;;  %2423 = vmatprep.subr.bf16.mxu1 %v6802_v63  ;;  %v7401_v62 = vcombine.low %v94_v37, %v98_v38  ;;  %v7403_v63 = vcombine.high %v101_v51, %v105_v52 }
  0x72   :  { %2616 = vmatprep.subr.bf16.mxu0 %v6804_v0  ;;  %v7405_v0 = vcombine.high %v102_v54, %v106_v55 }
  0x74   :  { %2424 = vmatpush1.bf16.msra.mxu1 %v6806_v1  ;;  %v6832_v1 = vld [vmem:[#allocation5 + $0xc8] ss:$16 sps:$4 sm:$0xff]  }
  0x75   :  { %2617 = vmatpush1.bf16.msra.mxu0 %v6807_v2  ;;  %2425 = vmatprep.subr.bf16.mxu1 %v6808_v3  ;;  %v6862_v2 = vld [vmem:[#allocation5 + $0x4a0] ss:$16 sps:$4 sm:$0xff]   ;;  %v6837_v3 = vld [vmem:[#allocation5 + $0xec] ss:$16 sps:$4 sm:$0xff]  }
  0x76   :  { %2618 = vmatprep.subr.bf16.mxu0 %v6810_v4  ;;  %v6867_v4 = vld [vmem:[#allocation5 + $0x4c4] ss:$16 sps:$4 sm:$0xff]  }
  0x78   :  { %2426 = vmatpush1.bf16.msra.mxu1 %v6812_v5  ;;  %v109_v5 = vld [vmem:[#allocation3 + $0x140] sm:$0xff] }
  0x79   :  { %2619 = vmatpush1.bf16.msra.mxu0 %v6813_v6  ;;  %3167 = vmatprep.subr.bf16.mxu1 %v6816_v7  ;;  %v113_v6 = vld [vmem:[#allocation3 + $0x160] sm:$0xff]  ;;  %v110_v7 = vld [vmem:[#allocation3 + $0x148] sm:$0xff] }
  0x7a   :  { %2781 = vmatprep.subr.bf16.mxu0 %v6840_v19  ;;  %v7415_v19 = vcombine.high %v109_v5, %v113_v6  ;;  %v7417_v20 = vcombine.high %v110_v7, %v114_v8  ;;  %v7423_v37 = vcombine.low %v109_v5, %v113_v6  ;;  %v7425_v38 = vcombine.low %v110_v7, %v114_v8  ;;  %v6888_v5 = vld [vmem:[#allocation5 + $0x1ac] ss:$16 sps:$4 sm:$0xff]   ;;  %v6894_v6 = vld [vmem:[#allocation5 + $0x584] ss:$16 sps:$4 sm:$0xff]  }
  0x7b   :  { %2428 = vmatmul.mubr.bf16.vlgmr.msra.gmra.mrb[0].mxu1 %v7363_v12  ;;  %v133_v7 = vld [vmem:[#allocation3 + $0x200] sm:$0xff] }
  0x7c   :  { %2621 = vmatmul.mubr.bf16.vlgmr.msra.gmra.mrb[0].mxu0 %v7365_v13  ;;  %3168 = vmatpush1.bf16.msra.mxu1 %v6814_v14  ;;  %v6873_v14 = vld [vmem:[#allocation5 + $0x4e4] ss:$16 sps:$4 sm:$0xff]  }
  0x7d   :  { %2437 = vmatprep.mubr.bf16.mxu1 %v7367_v15  ;;  %2630 = vmatprep.mubr.bf16.mxu0 %v7369_v16  ;;  %v137_v8 = vld [vmem:[#allocation3 + $0x220] sm:$0xff] }
  0x7e   :  { %3169 = vmatprep.subr.bf16.mxu1 %v6819_v17  ;;  %2782 = vmatpush1.bf16.msra.mxu0 %v6838_v22  ;;  %v7411_v17 = vcombine.low %v101_v51, %v105_v52  ;;  %v6871_v22 = vld [vmem:[#allocation5 + $0x4e0] ss:$16 sps:$4 sm:$0xff]   ;;  %v126_v51 = vld [vmem:[#allocation3 + $0x1c8] sm:$0xff] }
  0x7f   :  { %2783 = vmatprep.subr.bf16.mxu0 %v6846_v26  ;;  %v121_v26 = vld [vmem:[#allocation3 + $0x1a0] sm:$0xff]  ;;  %v130_v52 = vld [vmem:[#allocation3 + $0x1e8] sm:$0xff] }
  0x80   :  { %3170 = vmatpush1.bf16.msra.mxu1 %v6817_v18  ;;  %v7413_v18 = vcombine.low %v102_v54, %v106_v55  ;;  %v6868_v54 = vld [vmem:[#allocation5 + $0x168] ss:$16 sps:$4 sm:$0xff]   ;;  %v6883_v55 = vld [vmem:[#allocation5 + $0x540] ss:$16 sps:$4 sm:$0xff]  }
  0x81   :  { %3171 = vmatprep.subr.bf16.mxu1 %v6822_v25  ;;  %v117_v25 = vld [vmem:[#allocation3 + $0x180] sm:$0xff] }
  0x82   :  { %2784 = vmatpush1.bf16.msra.mxu0 %v6844_v32  ;;  %v122_v32 = vld [vmem:[#allocation3 + $0x1a8] sm:$0xff] }
  0x83   :  { %2438 = vmatmul.mubr.bf16.gmra.mrb[4].mxu1 %v7375_v27  ;;  %2785 = vmatprep.subr.bf16.mxu0 %v6849_v34  ;;  %v6874_v34 = vld [vmem:[#allocation5 + $0x500] ss:$16 sps:$4 sm:$0xff]  }
  0x84   :  { %2631 = vmatmul.mubr.bf16.gmra.mrb[4].mxu0 %v7377_v28  ;;  %2447 = vmatprep.mubr.bf16.mxu1 %v7379_v29 }
  0x85   :  { %2640 = vmatprep.mubr.bf16.mxu0 %v7381_v30  ;;  %3172 = vmatpush1.bf16.msra.mxu1 %v6820_v31  ;;  %v118_v31 = vld [vmem:[#allocation3 + $0x188] sm:$0xff] }
  0x86   :  { %3173 = vmatprep.subr.bf16.mxu1 %v6825_v33  ;;  %2786 = vmatpush1.bf16.msra.mxu0 %v6847_v40  ;;  %v6850_v33 = vld [vmem:[#allocation5 + $0x128] ss:$16 sps:$4 sm:$0xff]   ;;  %v7429_v40 = vcombine.high %v118_v31, %v122_v32 }
  0x87   :  { %2787 = vmatprep.subr.bf16.mxu0 %v6855_v42  ;;  %v6880_v42 = vld [vmem:[#allocation5 + $0x520] ss:$16 sps:$4 sm:$0xff]  }
  0x89   :  { %3174 = vmatpush1.bf16.msra.mxu1 %v6823_v39  ;;  %v7427_v39 = vcombine.high %v117_v25, %v121_v26 }
  0x8a   :  { %3175 = vmatprep.subr.bf16.mxu1 %v6828_v41  ;;  %2788 = vmatpush1.bf16.msra.mxu0 %v6853_v48  ;;  %v6859_v41 = vld [vmem:[#allocation5 + $0x148] ss:$16 sps:$4 sm:$0xff]   ;;  %v6885_v48 = vld [vmem:[#allocation5 + $0x544] ss:$16 sps:$4 sm:$0xff]  }
  0x8b   :  { %2448 = vmatmul.mubr.bf16.gmra.mrb[8].mxu1 %v7387_v43  ;;  %2789 = vmatprep.subr.bf16.mxu0 %v6858_v50  ;;  %v129_v50 = vld [vmem:[#allocation3 + $0x1e0] sm:$0xff] }
  0x8c   :  { %2641 = vmatmul.mubr.bf16.gmra.mrb[8].mxu0 %v7389_v44  ;;  %2457 = vmatprep.mubr.bf16.mxu1 %v7391_v45 }
  0x8d   :  { %2650 = vmatprep.mubr.bf16.mxu0 %v7393_v46  ;;  %3176 = vmatpush1.bf16.msra.mxu1 %v6826_v47  ;;  %v6870_v47 = vld [vmem:[#allocation5 + $0x16c] ss:$16 sps:$4 sm:$0xff]  }
  0x8e   :  { %3177 = vmatprep.subr.bf16.mxu1 %v6831_v49  ;;  %2790 = vmatpush1.bf16.msra.mxu0 %v6856_v58  ;;  %v125_v49 = vld [vmem:[#allocation3 + $0x1c0] sm:$0xff] }
  0x8f   :  { %2791 = vmatprep.subr.bf16.mxu0 %v6864_v60  ;;  %v6891_v58 = vld [vmem:[#allocation5 + $0x564] ss:$16 sps:$4 sm:$0xff]   ;;  %v7437_v60 = vcombine.low %v118_v31, %v122_v32  ;;  %v6895_v31 = vld [vmem:[#allocation5 + $0x1c8] ss:$16 sps:$4 sm:$0xff]   ;;  %v6898_v32 = vld [vmem:[#allocation5 + $0x5a0] ss:$16 sps:$4 sm:$0xff]  }
  0x91   :  { %3178 = vmatpush1.bf16.msra.mxu1 %v6829_v57  ;;  %v6879_v57 = vld [vmem:[#allocation5 + $0x18c] ss:$16 sps:$4 sm:$0xff]  }
  0x92   :  { %3179 = vmatprep.subr.bf16.mxu1 %v6834_v59  ;;  %2792 = vmatpush1.bf16.msra.mxu0 %v6862_v2  ;;  %v7435_v59 = vcombine.low %v117_v25, %v121_v26  ;;  %v7441_v2 = vcombine.high %v126_v51, %v130_v52  ;;  %v7451_v25 = vcombine.high %v133_v7, %v137_v8 }
  0x93   :  { %2458 = vmatmul.mubr.bf16.gmra.mrb[12].mxu1 %v7399_v61  ;;  %2793 = vmatprep.subr.bf16.mxu0 %v6867_v4  ;;  %v6889_v4 = vld [vmem:[#allocation5 + $0x560] ss:$16 sps:$4 sm:$0xff]  }
  0x94   :  { %2651 = vmatmul.mubr.bf16.gmra.mrb[12].mxu0 %v7401_v62  ;;  %2467 = vmatprep.mubr.bf16.mxu1 %v7403_v63 }
  0x95   :  { %2660 = vmatprep.mubr.bf16.mxu0 %v7405_v0  ;;  %3180 = vmatpush1.bf16.msra.mxu1 %v6832_v1  ;;  %v7439_v1 = vcombine.high %v125_v49, %v129_v50 }
  0x96   :  { %3181 = vmatprep.subr.bf16.mxu1 %v6837_v3  ;;  %2794 = vmatpush1.bf16.msra.mxu0 %v6865_v10  ;;  %v6877_v3 = vld [vmem:[#allocation5 + $0x188] ss:$16 sps:$4 sm:$0xff]  }
  0x97   :  { %2795 = vmatprep.subr.bf16.mxu0 %v6873_v14  ;;  %v138_v10 = vld [vmem:[#allocation3 + $0x228] sm:$0xff]  ;;  %v6892_v14 = vld [vmem:[#allocation5 + $0x580] ss:$16 sps:$4 sm:$0xff]  }
  0x99   :  { %3182 = vmatpush1.bf16.msra.mxu1 %v6835_v9  ;;  %v134_v9 = vld [vmem:[#allocation3 + $0x208] sm:$0xff] }
  0x9a   :  { %3183 = vmatprep.subr.bf16.mxu1 %v6843_v11  ;;  %2796 = vmatpush1.bf16.msra.mxu0 %v6871_v22  ;;  %v6886_v11 = vld [vmem:[#allocation5 + $0x1a8] ss:$16 sps:$4 sm:$0xff]   ;;  %v6900_v22 = vld [vmem:[#allocation5 + $0x5a4] ss:$16 sps:$4 sm:$0xff]   ;;  %v7453_v26 = vcombine.high %v134_v9, %v138_v10 }
  0x9b   :  { %2468 = vmatmul.mubr.bf16.gmra.mrb[16].mxu1 %v7411_v17  ;;  %2797 = vmatprep.subr.bf16.mxu0 %v6876_v24  ;;  %v7449_v24 = vcombine.low %v126_v51, %v130_v52  ;;  %v7459_v51 = vcombine.low %v133_v7, %v137_v8  ;;  %v7461_v52 = vcombine.low %v134_v9, %v138_v10 }
  0x9c   :  { %2661 = vmatmul.mubr.bf16.gmra.mrb[16].mxu0 %v7413_v18  ;;  %2477 = vmatprep.mubr.bf16.mxu1 %v7415_v19  ;;  %8588 = vst [vmem:[#allocation10_spill] sm:$0xff] %v7453_v26 }
  0x9d   :  { %2670 = vmatprep.mubr.bf16.mxu0 %v7417_v20  ;;  %3184 = vmatpush1.bf16.msra.mxu1 %v6841_v21  ;;  %v6897_v21 = vld [vmem:[#allocation5 + $0x1cc] ss:$16 sps:$4 sm:$0xff]   ;;  %8589 = vst [vmem:[#allocation11_spill] sm:$0xff] %v7461_v52 }
  0x9e   :  { %3185 = vmatprep.subr.bf16.mxu1 %v6852_v23  ;;  %2798 = vmatpush1.bf16.msra.mxu0 %v6874_v34  ;;  %v7447_v23 = vcombine.low %v125_v49, %v129_v50  ;;  %v6906_v34 = vld [vmem:[#allocation5 + $0x1ec] ss:$16 sps:$4 sm:$0xff]   ;;  %v6909_v49 = vld [vmem:[#allocation5 + $0x5e4] ss:$16 sps:$4 sm:$0xff]  }
  0x9f   :  { %2799 = vmatprep.subr.bf16.mxu0 %v6882_v36  ;;  %v145_v36 = vld [vmem:[#allocation3 + $0x260] sm:$0xff]  ;;  %v6912_v50 = vld [vmem:[#allocation5 + $0x20c] ss:$16 sps:$4 sm:$0xff]  }
  0xa1   :  { %3186 = vmatpush1.bf16.msra.mxu1 %v6850_v33  ;;  %v6903_v33 = vld [vmem:[#allocation5 + $0x5c4] ss:$16 sps:$4 sm:$0xff]  }
  0xa2   :  { %3187 = vmatprep.subr.bf16.mxu1 %v6861_v35  ;;  %2800 = vmatpush1.bf16.msra.mxu0 %v6880_v42  ;;  %v141_v35 = vld [vmem:[#allocation3 + $0x240] sm:$0xff]  ;;  %v146_v42 = vld [vmem:[#allocation3 + $0x268] sm:$0xff] }
  0xa3   :  { %2478 = vmatmul.mubr.bf16.gmra.mrb[20].mxu1 %v7423_v37  ;;  %2801 = vmatprep.subr.bf16.mxu0 %v6885_v48  ;;  %v6904_v48 = vld [vmem:[#allocation5 + $0x1e8] ss:$16 sps:$4 sm:$0xff]   ;;  %v7471_v7 = vcombine.low %v141_v35, %v145_v36 }
  0xa4   :  { %2671 = vmatmul.mubr.bf16.gmra.mrb[20].mxu0 %v7425_v38  ;;  %2487 = vmatprep.mubr.bf16.mxu1 %v7427_v39 }
  0xa5   :  { %2680 = vmatprep.mubr.bf16.mxu0 %v7429_v40  ;;  %3188 = vmatpush1.bf16.msra.mxu1 %v6859_v41  ;;  %v142_v41 = vld [vmem:[#allocation3 + $0x248] sm:$0xff] }
  0xa6   :  { %3189 = vmatprep.subr.bf16.mxu1 %v6870_v47  ;;  %2802 = vmatpush1.bf16.msra.mxu0 %v6883_v55  ;;  %v6901_v47 = vld [vmem:[#allocation5 + $0x5c0] ss:$16 sps:$4 sm:$0xff]   ;;  %v7465_v55 = vcombine.high %v142_v41, %v146_v42  ;;  %v7473_v8 = vcombine.low %v142_v41, %v146_v42  ;;  %v166_v41 = vld [vmem:[#allocation3 + $0x308] sm:$0xff] }
  0xa7   :  { %2803 = vmatprep.subr.bf16.mxu0 %v6891_v58  ;;  %v6936_v58 = vld [vmem:[#allocation5 + $0x604] ss:$16 sps:$4 sm:$0xff]   ;;  %v170_v42 = vld [vmem:[#allocation3 + $0x328] sm:$0xff] }
  0xa8   :  { %8590 = vst [vmem:[#allocation12_spill] sm:$0xff] %v7465_v55  ;;  %8591 = vst [vmem:[#allocation13_spill] sm:$0xff] %v7473_v8 }
  0xa9   :  { %3190 = vmatpush1.bf16.msra.mxu1 %v6868_v54  ;;  %v7463_v54 = vcombine.high %v141_v35, %v145_v36  ;;  %v165_v35 = vld [vmem:[#allocation3 + $0x300] sm:$0xff] }
  0xaa   :  { %3191 = vmatprep.subr.bf16.mxu1 %v6879_v57  ;;  %2804 = vmatpush1.bf16.msra.mxu0 %v6889_v4  ;;  %v6907_v57 = vld [vmem:[#allocation5 + $0x5e0] ss:$16 sps:$4 sm:$0xff]  }
  0xab   :  { %2488 = vmatmul.mubr.bf16.gmra.mrb[24].mxu1 %v7435_v59  ;;  %2805 = vmatprep.subr.bf16.mxu0 %v6894_v6  ;;  %v153_v4 = vld [vmem:[#allocation3 + $0x2a0] sm:$0xff]  ;;  %v154_v6 = vld [vmem:[#allocation3 + $0x2a8] sm:$0xff] }
  0xac   :  { %2681 = vmatmul.mubr.bf16.gmra.mrb[24].mxu0 %v7437_v60  ;;  %2497 = vmatprep.mubr.bf16.mxu1 %v7439_v1  ;;  %v169_v36 = vld [vmem:[#allocation3 + $0x320] sm:$0xff] }
  0xad   :  { %2690 = vmatprep.mubr.bf16.mxu0 %v7441_v2  ;;  %3192 = vmatpush1.bf16.msra.mxu1 %v6877_v3  ;;  %v149_v3 = vld [vmem:[#allocation3 + $0x280] sm:$0xff] }
  0xae   :  { %3193 = vmatprep.subr.bf16.mxu1 %v6888_v5  ;;  %2806 = vmatpush1.bf16.msra.mxu0 %v6892_v14  ;;  %v150_v5 = vld [vmem:[#allocation3 + $0x288] sm:$0xff]  ;;  %v7475_v9 = vcombine.high %v149_v3, %v153_v4  ;;  %v161_v14 = vld [vmem:[#allocation3 + $0x2e0] sm:$0xff] }
  0xaf   :  { %2807 = vmatprep.subr.bf16.mxu0 %v6900_v22  ;;  %v7477_v10 = vcombine.high %v150_v5, %v154_v6  ;;  %v162_v22 = vld [vmem:[#allocation3 + $0x2e8] sm:$0xff] }
  0xb1   :  { %3194 = vmatpush1.bf16.msra.mxu1 %v6886_v11  ;;  %8592 = vst [vmem:[#allocation14_spill] sm:$0xff] %v7477_v10  ;;  %v157_v11 = vld [vmem:[#allocation3 + $0x2c0] sm:$0xff] }
  0xb2   :  { %3195 = vmatprep.subr.bf16.mxu1 %v6897_v21  ;;  %2808 = vmatpush1.bf16.msra.mxu0 %v6898_v32  ;;  %v158_v21 = vld [vmem:[#allocation3 + $0x2c8] sm:$0xff]  ;;  %v7485_v32 = vcombine.low %v150_v5, %v154_v6  ;;  %v7507_v5 = vcombine.low %v165_v35, %v169_v36  ;;  %v7509_v6 = vcombine.low %v166_v41, %v170_v42 }
  0xb3   :  { %2498 = vmatmul.mubr.bf16.gmra.mrb[28].mxu1 %v7447_v23  ;;  %2809 = vmatprep.subr.bf16.mxu0 %v6903_v33  ;;  %v7487_v33 = vcombine.high %v157_v11, %v161_v14 }
  0xb4   :  { %2691 = vmatmul.mubr.bf16.gmra.mrb[28].mxu0 %v7449_v24  ;;  %2507 = vmatprep.mubr.bf16.mxu1 %v7451_v25  ;;  %8593 = vst [vmem:[#allocation15_spill] sm:$0xff] %v7485_v32  ;;  %8597 = vst [vmem:[#allocation19_spill] sm:$0xff] %v7509_v6 }
  0xb5   :  { %2700 = vmatprep.mubr.bf16.mxu0 %v7453_v26  ;;  %3196 = vmatpush1.bf16.msra.mxu1 %v6895_v31  ;;  %v7483_v31 = vcombine.low %v149_v3, %v153_v4  ;;  %v174_v3 = vld [vmem:[#allocation3 + $0x348] sm:$0xff]  ;;  %v6943_v26 = vld [vmem:[#allocation5 + $0x640] ss:$16 sps:$4 sm:$0xff]  }
  0xb6   :  { %3197 = vmatprep.subr.bf16.mxu1 %v6906_v34  ;;  %2810 = vmatpush1.bf16.msra.mxu0 %v6901_v47  ;;  %v7489_v34 = vcombine.high %v158_v21, %v162_v22  ;;  %v7495_v47 = vcombine.low %v157_v11, %v161_v14  ;;  %v178_v4 = vld [vmem:[#allocation3 + $0x368] sm:$0xff] }
  0xb7   :  { %2811 = vmatprep.subr.bf16.mxu0 %v6909_v49  ;;  %v7499_v49 = vcombine.high %v165_v35, %v169_v36  ;;  %v7513_v14 = vcombine.high %v174_v3, %v178_v4  ;;  %v7521_v36 = vcombine.low %v174_v3, %v178_v4 }
  0xb8   :  { %8594 = vst [vmem:[#allocation16_spill] sm:$0xff] %v7489_v34 }
  0xb9   :  { %3198 = vmatpush1.bf16.msra.mxu1 %v6904_v48  ;;  %v7497_v48 = vcombine.low %v158_v21, %v162_v22  ;;  %8598 = vst [vmem:[#allocation20_spill] sm:$0xff] %v7513_v14  ;;  %v181_v21 = vld [vmem:[#allocation3 + $0x380] sm:$0xff]  ;;  %8599 = vst [vmem:[#allocation21_spill] sm:$0xff] %v7521_v36 }
  0xba   :  { %3360 = vmatprep.subr.bf16.mxu1 %v6912_v50  ;;  %2812 = vmatpush1.bf16.msra.mxu0 %v6907_v57  ;;  %v7501_v50 = vcombine.high %v166_v41, %v170_v42  ;;  %v173_v57 = vld [vmem:[#allocation3 + $0x340] sm:$0xff] }
  0xbb   :  { %2508 = vmatmul.mubr.bf16.gmra.mrb[32].mxu1 %v7459_v51  ;;  %2974 = vmatprep.subr.bf16.mxu0 %v6936_v58  ;;  %8595 = vst [vmem:[#allocation17_spill] sm:$0xff] %v7497_v48  ;;  %v177_v58 = vld [vmem:[#allocation3 + $0x360] sm:$0xff] }
  0xbc   :  { %2701 = vmatmul.mubr.bf16.gmra.mrb[32].mxu0 %v7461_v52  ;;  %2517 = vmatprep.mubr.bf16.mxu1 %v7463_v54  ;;  %8596 = vst [vmem:[#allocation18_spill] sm:$0xff] %v7501_v50  ;;  %v7511_v11 = vcombine.high %v173_v57, %v177_v58  ;;  %v185_v22 = vld [vmem:[#allocation3 + $0x3a0] sm:$0xff]  ;;  %v7519_v35 = vcombine.low %v173_v57, %v177_v58 }
  0xbd   :  { %2710 = vmatprep.mubr.bf16.mxu0 %v7465_v55  ;;  %v7523_v41 = vcombine.high %v181_v21, %v185_v22  ;;  %v7531_v57 = vcombine.low %v181_v21, %v185_v22  ;;  %v83_v22 = vld [vmem:[#allocation3 + $0x70] sm:$0xff]  ;;  %v6918_v55 = vld [vmem:[#allocation5 + $0x24c] ss:$16 sps:$4 sm:$0xff]  }
  0xbe   :  { %v6942_v52 = vld [vmem:[#allocation5 + $0x624] ss:$16 sps:$4 sm:$0xff]  }
  0xc3   :  { %2518 = vmatmul.mubr.bf16.gmra.mrb[36].mxu1 %v7471_v7 }
  0xc4   :  { %2711 = vmatmul.mubr.bf16.gmra.mrb[36].mxu0 %v7473_v8  ;;  %2527 = vmatprep.mubr.bf16.mxu1 %v7475_v9  ;;  %v6915_v8 = vld [vmem:[#allocation5 + $0x22c] ss:$16 sps:$4 sm:$0xff]  }
  0xc5   :  { %2720 = vmatprep.mubr.bf16.mxu0 %v7477_v10  ;;  %v75_v10 = vld [vmem:[#allocation3 + $0x30] sm:$0xff] }
  0xcb   :  { %2528 = vmatmul.mubr.bf16.gmra.mrb[40].mxu1 %v7483_v31 }
  0xcc   :  { %2721 = vmatmul.mubr.bf16.gmra.mrb[40].mxu0 %v7485_v32  ;;  %2537 = vmatprep.mubr.bf16.mxu1 %v7487_v33  ;;  %v190_v32 = vld [vmem:[#allocation3 + $0x3c8] sm:$0xff] }
  0xcd   :  { %2730 = vmatprep.mubr.bf16.mxu0 %v7489_v34  ;;  %v193_v34 = vld [vmem:[#allocation3 + $0x3e0] sm:$0xff] }
  0xd3   :  { %2538 = vmatmul.mubr.bf16.gmra.mrb[44].mxu1 %v7495_v47 }
  0xd4   :  { %2731 = vmatmul.mubr.bf16.gmra.mrb[44].mxu0 %v7497_v48  ;;  %2547 = vmatprep.mubr.bf16.mxu1 %v7499_v49  ;;  %v182_v48 = vld [vmem:[#allocation3 + $0x388] sm:$0xff] }
  0xd5   :  { %2740 = vmatprep.mubr.bf16.mxu0 %v7501_v50  ;;  %v186_v50 = vld [vmem:[#allocation3 + $0x3a8] sm:$0xff] }
  0xd6   :  { %v7525_v42 = vcombine.high %v182_v48, %v186_v50  ;;  %v7533_v58 = vcombine.low %v182_v48, %v186_v50  ;;  %v79_v50 = vld [vmem:[#allocation3 + $0x50] sm:$0xff] }
  0xd8   :  { %8600 = vst [vmem:[#allocation22_spill] sm:$0xff] %v7525_v42  ;;  %8601 = vst [vmem:[#allocation23_spill] sm:$0xff] %v7533_v58 }
  0xdb   :  { %2548 = vmatmul.mubr.bf16.gmra.mrb[48].mxu1 %v7507_v5 }
  0xdc   :  { %2741 = vmatmul.mubr.bf16.gmra.mrb[48].mxu0 %v7509_v6  ;;  %2557 = vmatprep.mubr.bf16.mxu1 %v7511_v11  ;;  %v189_v6 = vld [vmem:[#allocation3 + $0x3c0] sm:$0xff] }
  0xdd   :  { %2750 = vmatprep.mubr.bf16.mxu0 %v7513_v14  ;;  %v194_v14 = vld [vmem:[#allocation3 + $0x3e8] sm:$0xff]  ;;  %v7535_v3 = vcombine.high %v189_v6, %v193_v34 }
  0xde   :  { %v7537_v4 = vcombine.high %v190_v32, %v194_v14  ;;  %v7545_v21 = vcombine.low %v190_v32, %v194_v14  ;;  %v6934_v32 = vld [vmem:[#allocation5 + $0x600] ss:$16 sps:$4 sm:$0xff]  }
  0xdf   :  { %v87_v14 = vld [vmem:[#allocation3 + $0x90] sm:$0xff] }
  0xe0   :  { %8602 = vst [vmem:[#allocation24_spill] sm:$0xff] %v7537_v4  ;;  %8603 = vst [vmem:[#allocation25_spill] sm:$0xff] %v7545_v21 }
  0xe3   :  { %2558 = vmatmul.mubr.bf16.gmra.mrb[52].mxu1 %v7519_v35 }
  0xe4   :  { %2751 = vmatmul.mubr.bf16.gmra.mrb[52].mxu0 %v7521_v36  ;;  %2567 = vmatprep.mubr.bf16.mxu1 %v7523_v41  ;;  %v71_v36 = vld [vmem:[#allocation3 + $0x10] sm:$0xff] }
  0xe5   :  { %2760 = vmatprep.mubr.bf16.mxu0 %v7525_v42  ;;  %v7543_v42 = vcombine.low %v189_v6, %v193_v34  ;;  %v7547_v48 = vcombine.high %v71_v36, %v75_v10  ;;  %v7555_v34 = vcombine.high %v79_v50, %v83_v22  ;;  %v6913_v6 = vld [vmem:[#allocation5 + $0x228] ss:$16 sps:$4 sm:$0xff]  }
  0xe7   :  { %8604 = vst [vmem:[#allocation26_spill] sm:$0xff] %v7547_v48 }
  0xeb   :  { %2568 = vmatmul.mubr.bf16.gmra.mrb[56].mxu1 %v7531_v57 }
  0xec   :  { %2761 = vmatmul.mubr.bf16.gmra.mrb[56].mxu0 %v7533_v58  ;;  %2577 = vmatprep.mubr.bf16.mxu1 %v7535_v3  ;;  %v7553_v58 = vcombine.low %v71_v36, %v75_v10  ;;  %v7561_v10 = vcombine.low %v79_v50, %v83_v22  ;;  %v6916_v36 = vld [vmem:[#allocation5 + $0x248] ss:$16 sps:$4 sm:$0xff]   ;;  %v6924_v50 = vld [vmem:[#allocation5 + $0x28c] ss:$16 sps:$4 sm:$0xff]   ;;  %v6949_v22 = vld [vmem:[#allocation5 + $0x660] ss:$16 sps:$4 sm:$0xff]  }
  0xed   :  { %2770 = vmatprep.mubr.bf16.mxu0 %v7537_v4  ;;  %v6910_v4 = vld [vmem:[#allocation5 + $0x208] ss:$16 sps:$4 sm:$0xff]  }
  0xee   :  { %8605 = vst [vmem:[#allocation27_spill] sm:$0xff] %v7553_v58 }
  0xf3   :  { %2578 = vmatmul.mubr.bf16.gmra.mrb[60].mxu1 %v7543_v42 }
  0xf4   :  { %2771 = vmatmul.mubr.bf16.gmra.mrb[60].mxu0 %v7545_v21  ;;  %3199 = vmatprep.mubr.bf16.mxu1 %v7357_v53  ;;  %v91_v21 = vld [vmem:[#allocation3 + $0xb0] sm:$0xff] }
  0xf5   :  { %2813 = vmatprep.mubr.bf16.mxu0 %v7547_v48  ;;  %v6940_v53 = vld [vmem:[#allocation5 + $0x620] ss:$16 sps:$4 sm:$0xff]   ;;  %v6945_v48 = vld [vmem:[#allocation5 + $0x644] ss:$16 sps:$4 sm:$0xff]  }
  0xfb   :  { %3200 = vmatmul.mubr.bf16.vlgmr.msra.gmra.mrb[64].mxu1 %v7363_v12  ;;  %v6921_v12 = vld [vmem:[#allocation5 + $0x26c] ss:$16 sps:$4 sm:$0xff]  }
  0xfc   :  { %2814 = vmatmul.mubr.bf16.vlgmr.msra.gmra.mrb[0].mxu0 %v7553_v58  ;;  %3361 = vmatpush1.bf16.msra.mxu1 %v6910_v4  ;;  %v7563_v58 = vcombine.high %v87_v14, %v91_v21  ;;  %v95_v4 = vld [vmem:[#allocation3 + $0xd0] sm:$0xff] }
  0xfd   :  { %2823 = vmatprep.mubr.bf16.mxu0 %v7555_v34  ;;  %3209 = vmatprep.mubr.bf16.mxu1 %v7367_v15  ;;  %v99_v15 = vld [vmem:[#allocation3 + $0xf0] sm:$0xff] }
  0xfe   :  { %3362 = vmatprep.subr.bf16.mxu1 %v6915_v8  ;;  %2975 = vmatpush1.bf16.msra.mxu0 %v6934_v32  ;;  %8606 = vst [vmem:[#allocation28_spill] sm:$0xff] %v7563_v58  ;;  %v6951_v8 = vld [vmem:[#allocation5 + $0x664] ss:$16 sps:$4 sm:$0xff]   ;;  %v7571_v32 = vcombine.high %v95_v4, %v99_v15 }
  0xff   :  { %2976 = vmatprep.subr.bf16.mxu0 %v6942_v52  ;;  %v6919_v52 = vld [vmem:[#allocation5 + $0x268] ss:$16 sps:$4 sm:$0xff]  }
 0x100   :  { %3363 = vmatpush1.bf16.msra.mxu1 %v6913_v6  ;;  %v6954_v6 = vld [vmem:[#allocation5 + $0x684] ss:$16 sps:$4 sm:$0xff]  }
 0x101   :  { %3364 = vmatprep.subr.bf16.mxu1 %v6918_v55  ;;  %v7569_v55 = vcombine.low %v87_v14, %v91_v21  ;;  %v107_v21 = vld [vmem:[#allocation3 + $0x130] sm:$0xff]  ;;  %v6930_v14 = vld [vmem:[#allocation5 + $0x2cc] ss:$16 sps:$4 sm:$0xff]  }
 0x102   :  { %2977 = vmatpush1.bf16.msra.mxu0 %v6940_v53  ;;  %v6927_v53 = vld [vmem:[#allocation5 + $0x2ac] ss:$16 sps:$4 sm:$0xff]  }
 0x103   :  { %3210 = vmatmul.mubr.bf16.gmra.mrb[68].mxu1 %v7375_v27  ;;  %2978 = vmatprep.subr.bf16.mxu0 %v6945_v48  ;;  %v6922_v27 = vld [vmem:[#allocation5 + $0x288] ss:$16 sps:$4 sm:$0xff]  }
 0x104   :  { %2824 = vmatmul.mubr.bf16.gmra.mrb[4].mxu0 %v7561_v10  ;;  %3219 = vmatprep.mubr.bf16.mxu1 %v7379_v29  ;;  %v6960_v29 = vld [vmem:[#allocation5 + $0x6a4] ss:$16 sps:$4 sm:$0xff]   ;;  %v6925_v48 = vld [vmem:[#allocation5 + $0x2a8] ss:$16 sps:$4 sm:$0xff]  }
 0x105   :  { %2833 = vmatprep.mubr.bf16.mxu0 %v7563_v58  ;;  %3365 = vmatpush1.bf16.msra.mxu1 %v6916_v36  ;;  %v6952_v58 = vld [vmem:[#allocation5 + $0x680] ss:$16 sps:$4 sm:$0xff]  }
 0x106   :  { %3366 = vmatprep.subr.bf16.mxu1 %v6921_v12  ;;  %2979 = vmatpush1.bf16.msra.mxu0 %v6943_v26  ;;  %v103_v26 = vld [vmem:[#allocation3 + $0x110] sm:$0xff]  ;;  %v7577_v12 = vcombine.low %v95_v4, %v99_v15  ;;  %v6931_v15 = vld [vmem:[#allocation5 + $0x2e8] ss:$16 sps:$4 sm:$0xff]  }
 0x107   :  { %2980 = vmatprep.subr.bf16.mxu0 %v6951_v8  ;;  %v6958_v36 = vld [vmem:[#allocation5 + $0x6a0] ss:$16 sps:$4 sm:$0xff]   ;;  %v7579_v8 = vcombine.high %v103_v26, %v107_v21 }
 0x108   :  { %v115_v4 = vld [vmem:[#allocation3 + $0x170] sm:$0xff] }
 0x109   :  { %3367 = vmatpush1.bf16.msra.mxu1 %v6919_v52  ;;  %v6963_v52 = vld [vmem:[#allocation5 + $0x6c4] ss:$16 sps:$4 sm:$0xff]  }
 0x10a   :  { %3368 = vmatprep.subr.bf16.mxu1 %v6924_v50  ;;  %2981 = vmatpush1.bf16.msra.mxu0 %v6949_v22  ;;  %v6933_v50 = vld [vmem:[#allocation5 + $0x2ec] ss:$16 sps:$4 sm:$0xff]   ;;  %v6969_v22 = vld [vmem:[#allocation5 + $0x6e4] ss:$16 sps:$4 sm:$0xff]  }
 0x10b   :  { %3220 = vmatmul.mubr.bf16.gmra.mrb[72].mxu1 %v7387_v43  ;;  %2982 = vmatprep.subr.bf16.mxu0 %v6954_v6  ;;  %v6928_v43 = vld [vmem:[#allocation5 + $0x2c8] ss:$16 sps:$4 sm:$0xff]   ;;  %v6967_v6 = vld [vmem:[#allocation5 + $0x6e0] ss:$16 sps:$4 sm:$0xff]  }
 0x10c   :  { %2834 = vmatmul.mubr.bf16.gmra.mrb[8].mxu0 %v7569_v55  ;;  %3229 = vmatprep.mubr.bf16.mxu1 %v7391_v45  ;;  %v6961_v45 = vld [vmem:[#allocation5 + $0x6c0] ss:$16 sps:$4 sm:$0xff]  }
 0x10d   :  { %2843 = vmatprep.mubr.bf16.mxu0 %v7571_v32  ;;  %3369 = vmatpush1.bf16.msra.mxu1 %v6922_v27  ;;  %v6939_v27 = vld [vmem:[#allocation5 + $0x30c] ss:$16 sps:$4 sm:$0xff]  }
 0x10e   :  { %3370 = vmatprep.subr.bf16.mxu1 %v6927_v53  ;;  %2983 = vmatpush1.bf16.msra.mxu0 %v6952_v58  ;;  %v111_v58 = vld [vmem:[#allocation3 + $0x150] sm:$0xff]  ;;  %v7585_v53 = vcombine.low %v103_v26, %v107_v21 }
 0x10f   :  { %2984 = vmatprep.subr.bf16.mxu0 %v6960_v29  ;;  %v7587_v29 = vcombine.high %v111_v58, %v115_v4  ;;  %v119_v26 = vld [vmem:[#allocation3 + $0x190] sm:$0xff] }
 0x110   :  { %v123_v21 = vld [vmem:[#allocation3 + $0x1b0] sm:$0xff] }
 0x111   :  { %3371 = vmatpush1.bf16.msra.mxu1 %v6925_v48  ;;  %v6972_v48 = vld [vmem:[#allocation5 + $0x704] ss:$16 sps:$4 sm:$0xff]  }
 0x112   :  { %3372 = vmatprep.subr.bf16.mxu1 %v6930_v14  ;;  %2985 = vmatpush1.bf16.msra.mxu0 %v6958_v36  ;;  %v6948_v14 = vld [vmem:[#allocation5 + $0x32c] ss:$16 sps:$4 sm:$0xff]   ;;  %v6978_v36 = vld [vmem:[#allocation5 + $0x724] ss:$16 sps:$4 sm:$0xff]  }
 0x113   :  { %3230 = vmatmul.mubr.bf16.gmra.mrb[76].mxu1 %v7399_v61  ;;  %2986 = vmatprep.subr.bf16.mxu0 %v6963_v52  ;;  %v6937_v61 = vld [vmem:[#allocation5 + $0x308] ss:$16 sps:$4 sm:$0xff]   ;;  %v6957_v52 = vld [vmem:[#allocation5 + $0x34c] ss:$16 sps:$4 sm:$0xff]  }
 0x114   :  { %2844 = vmatmul.mubr.bf16.gmra.mrb[12].mxu0 %v7577_v12  ;;  %3239 = vmatprep.mubr.bf16.mxu1 %v7403_v63  ;;  %v6970_v63 = vld [vmem:[#allocation5 + $0x700] ss:$16 sps:$4 sm:$0xff]  }
 0x115   :  { %2853 = vmatprep.mubr.bf16.mxu0 %v7579_v8  ;;  %3373 = vmatpush1.bf16.msra.mxu1 %v6928_v43  ;;  %v6946_v43 = vld [vmem:[#allocation5 + $0x328] ss:$16 sps:$4 sm:$0xff]  }
 0x116   :  { %3374 = vmatprep.subr.bf16.mxu1 %v6933_v50  ;;  %2987 = vmatpush1.bf16.msra.mxu0 %v6961_v45  ;;  %v6976_v50 = vld [vmem:[#allocation5 + $0x720] ss:$16 sps:$4 sm:$0xff]   ;;  %v7593_v45 = vcombine.low %v111_v58, %v115_v4 }
 0x117   :  { %2988 = vmatprep.subr.bf16.mxu0 %v6969_v22  ;;  %v7595_v22 = vcombine.high %v119_v26, %v123_v21  ;;  %v127_v58 = vld [vmem:[#allocation3 + $0x1d0] sm:$0xff] }
 0x118   :  { %v131_v4 = vld [vmem:[#allocation3 + $0x1f0] sm:$0xff] }
 0x119   :  { %3375 = vmatpush1.bf16.msra.mxu1 %v6931_v15  ;;  %v6981_v15 = vld [vmem:[#allocation5 + $0x744] ss:$16 sps:$4 sm:$0xff]  }
 0x11a   :  { %3376 = vmatprep.subr.bf16.mxu1 %v6939_v27  ;;  %2989 = vmatpush1.bf16.msra.mxu0 %v6967_v6  ;;  %v6966_v27 = vld [vmem:[#allocation5 + $0x36c] ss:$16 sps:$4 sm:$0xff]   ;;  %v6987_v6 = vld [vmem:[#allocation5 + $0x764] ss:$16 sps:$4 sm:$0xff]  }
 0x11b   :  { %3240 = vmatmul.mubr.bf16.gmra.mrb[80].mxu1 %v7411_v17  ;;  %2990 = vmatprep.subr.bf16.mxu0 %v6972_v48  ;;  %v6955_v17 = vld [vmem:[#allocation5 + $0x348] ss:$16 sps:$4 sm:$0xff]   ;;  %v6975_v48 = vld [vmem:[#allocation5 + $0x38c] ss:$16 sps:$4 sm:$0xff]  }
 0x11c   :  { %2854 = vmatmul.mubr.bf16.gmra.mrb[16].mxu0 %v7585_v53  ;;  %3249 = vmatprep.mubr.bf16.mxu1 %v7415_v19  ;;  %v6979_v19 = vld [vmem:[#allocation5 + $0x740] ss:$16 sps:$4 sm:$0xff]  }
 0x11d   :  { %2863 = vmatprep.mubr.bf16.mxu0 %v7587_v29  ;;  %3377 = vmatpush1.bf16.msra.mxu1 %v6937_v61  ;;  %v6964_v61 = vld [vmem:[#allocation5 + $0x368] ss:$16 sps:$4 sm:$0xff]  }
 0x11e   :  { %3378 = vmatprep.subr.bf16.mxu1 %v6948_v14  ;;  %2991 = vmatpush1.bf16.msra.mxu0 %v6970_v63  ;;  %v6985_v14 = vld [vmem:[#allocation5 + $0x760] ss:$16 sps:$4 sm:$0xff]   ;;  %v7601_v63 = vcombine.low %v119_v26, %v123_v21 }
 0x11f   :  { %2992 = vmatprep.subr.bf16.mxu0 %v6978_v36  ;;  %v7603_v36 = vcombine.high %v127_v58, %v131_v4  ;;  %v135_v26 = vld [vmem:[#allocation3 + $0x210] sm:$0xff] }
 0x120   :  { %v139_v21 = vld [vmem:[#allocation3 + $0x230] sm:$0xff] }
 0x121   :  { %3379 = vmatpush1.bf16.msra.mxu1 %v6946_v43  ;;  %v6990_v43 = vld [vmem:[#allocation5 + $0x784] ss:$16 sps:$4 sm:$0xff]  }
 0x122   :  { %3380 = vmatprep.subr.bf16.mxu1 %v6957_v52  ;;  %2993 = vmatpush1.bf16.msra.mxu0 %v6976_v50  ;;  %v6984_v52 = vld [vmem:[#allocation5 + $0x3ac] ss:$16 sps:$4 sm:$0xff]   ;;  %v6996_v50 = vld [vmem:[#allocation5 + $0x7a4] ss:$16 sps:$4 sm:$0xff]  }
 0x123   :  { %3250 = vmatmul.mubr.bf16.gmra.mrb[84].mxu1 %v7423_v37  ;;  %2994 = vmatprep.subr.bf16.mxu0 %v6981_v15  ;;  %v6973_v37 = vld [vmem:[#allocation5 + $0x388] ss:$16 sps:$4 sm:$0xff]   ;;  %v6993_v15 = vld [vmem:[#allocation5 + $0x3cc] ss:$16 sps:$4 sm:$0xff]  }
 0x124   :  { %2864 = vmatmul.mubr.bf16.gmra.mrb[20].mxu0 %v7593_v45  ;;  %3259 = vmatprep.mubr.bf16.mxu1 %v7427_v39  ;;  %v6988_v39 = vld [vmem:[#allocation5 + $0x780] ss:$16 sps:$4 sm:$0xff]  }
 0x125   :  { %2873 = vmatprep.mubr.bf16.mxu0 %v7595_v22  ;;  %3381 = vmatpush1.bf16.msra.mxu1 %v6955_v17  ;;  %v6982_v17 = vld [vmem:[#allocation5 + $0x3a8] ss:$16 sps:$4 sm:$0xff]  }
 0x126   :  { %3382 = vmatprep.subr.bf16.mxu1 %v6966_v27  ;;  %2995 = vmatpush1.bf16.msra.mxu0 %v6979_v19  ;;  %v6994_v27 = vld [vmem:[#allocation5 + $0x7a0] ss:$16 sps:$4 sm:$0xff]   ;;  %v7609_v19 = vcombine.low %v127_v58, %v131_v4 }
 0x127   :  { %2996 = vmatprep.subr.bf16.mxu0 %v6987_v6  ;;  %v7611_v6 = vcombine.high %v135_v26, %v139_v21  ;;  %v143_v58 = vld [vmem:[#allocation3 + $0x250] sm:$0xff] }
 0x128   :  { %v147_v4 = vld [vmem:[#allocation3 + $0x270] sm:$0xff] }
 0x129   :  { %3383 = vmatpush1.bf16.msra.mxu1 %v6964_v61  ;;  %v6999_v61 = vld [vmem:[#allocation5 + $0x7c4] ss:$16 sps:$4 sm:$0xff]  }
 0x12a   :  { %3384 = vmatprep.subr.bf16.mxu1 %v6975_v48  ;;  %2997 = vmatpush1.bf16.msra.mxu0 %v6985_v14  ;;  %v7002_v48 = vld [vmem:[#allocation5 + $0x3ec] ss:$16 sps:$4 sm:$0xff]   ;;  %v7005_v14 = vld [vmem:[#allocation5 + $0x7e4] ss:$16 sps:$4 sm:$0xff]  }
 0x12b   :  { %3260 = vmatmul.mubr.bf16.gmra.mrb[88].mxu1 %v7435_v59  ;;  %2998 = vmatprep.subr.bf16.mxu0 %v6990_v43  ;;  %v6991_v59 = vld [vmem:[#allocation5 + $0x3c8] ss:$16 sps:$4 sm:$0xff]   ;;  %v7003_v43 = vld [vmem:[#allocation5 + $0x7e0] ss:$16 sps:$4 sm:$0xff]  }
 0x12c   :  { %2874 = vmatmul.mubr.bf16.gmra.mrb[24].mxu0 %v7601_v63  ;;  %3269 = vmatprep.mubr.bf16.mxu1 %v7439_v1  ;;  %v6997_v1 = vld [vmem:[#allocation5 + $0x7c0] ss:$16 sps:$4 sm:$0xff]  }
 0x12d   :  { %2883 = vmatprep.mubr.bf16.mxu0 %v7603_v36  ;;  %3385 = vmatpush1.bf16.msra.mxu1 %v6973_v37  ;;  %v7000_v37 = vld [vmem:[#allocation5 + $0x3e8] ss:$16 sps:$4 sm:$0xff]  }
 0x12e   :  { %3386 = vmatprep.subr.bf16.mxu1 %v6984_v52  ;;  %2999 = vmatpush1.bf16.msra.mxu0 %v6988_v39  ;;  %v7008_v52 = vld [vmem:[#allocation5 + $0x40c] ss:$16 sps:$4 sm:$0xff]   ;;  %v7617_v39 = vcombine.low %v135_v26, %v139_v21  ;;  %v159_v21 = vld [vmem:[#allocation3 + $0x2d0] sm:$0xff] }
 0x12f   :  { %3000 = vmatprep.subr.bf16.mxu0 %v6996_v50  ;;  %v7619_v50 = vcombine.high %v143_v58, %v147_v4 }
 0x131   :  { %3387 = vmatpush1.bf16.msra.mxu1 %v6982_v17  ;;  %v7625_v17 = vcombine.low %v143_v58, %v147_v4 }
 0x132   :  { %3388 = vmatprep.subr.bf16.mxu1 %v6993_v15  ;;  %3001 = vmatpush1.bf16.msra.mxu0 %v6994_v27 }
 0x133   :  { %3270 = vmatmul.mubr.bf16.gmra.mrb[92].mxu1 %v7447_v23  ;;  %3002 = vmatprep.subr.bf16.mxu0 %v6999_v61  ;;  %v151_v23 = vld [vmem:[#allocation3 + $0x290] sm:$0xff] }
 0x134   :  { %2884 = vmatmul.mubr.bf16.gmra.mrb[28].mxu0 %v7609_v19  ;;  %3279 = vmatprep.mubr.bf16.mxu1 %v7451_v25  ;;  %v155_v25 = vld [vmem:[#allocation3 + $0x2b0] sm:$0xff] }
 0x135   :  { %2893 = vmatprep.mubr.bf16.mxu0 %v7611_v6  ;;  %3389 = vmatpush1.bf16.msra.mxu1 %v6991_v59  ;;  %v7627_v26 = vcombine.high %v151_v23, %v155_v25  ;;  %v7633_v15 = vcombine.low %v151_v23, %v155_v25 }
 0x136   :  { %3390 = vmatprep.subr.bf16.mxu1 %v7002_v48  ;;  %3003 = vmatpush1.bf16.msra.mxu0 %v6997_v1 }
 0x137   :  { %3004 = vmatprep.subr.bf16.mxu0 %v7005_v14 }
 0x139   :  { %3391 = vmatpush1.bf16.msra.mxu1 %v7000_v37 }
 0x13a   :  { %3005 = vmatpush1.bf16.msra.mxu0 %v7003_v43  ;;  %3553 = vmatprep.subr.bf16.mxu1 %v7008_v52 }
 0x13b   :  { %3280 = vmatmul.mubr.bf16.gmra.mrb[96].mxu1 %v7459_v51  ;;  %v163_v51 = vld [vmem:[#allocation3 + $0x2f0] sm:$0xff] }
 0x13c   :  { %2894 = vmatmul.mubr.bf16.gmra.mrb[32].mxu0 %v7617_v39  ;;  %3289 = vmatprep.mubr.bf16.mxu1 %v7463_v54  ;;  %v7635_v27 = vcombine.high %v159_v21, %v163_v51  ;;  %v167_v54 = vld [vmem:[#allocation3 + $0x310] sm:$0xff] }
 0x13d   :  { %2903 = vmatprep.mubr.bf16.mxu0 %v7619_v50 }
 0x143   :  { %3290 = vmatmul.mubr.bf16.gmra.mrb[100].mxu1 %v7471_v7  ;;  %v171_v7 = vld [vmem:[#allocation3 + $0x330] sm:$0xff] }
 0x144   :  { %2904 = vmatmul.mubr.bf16.gmra.mrb[36].mxu0 %v7625_v17  ;;  %3299 = vmatprep.mubr.bf16.mxu1 %v7475_v9  ;;  %v7645_v9 = vcombine.low %v159_v21, %v163_v51  ;;  %v7649_v48 = vcombine.high %v167_v54, %v171_v7  ;;  %v7661_v37 = vcombine.low %v167_v54, %v171_v7 }
 0x145   :  { %2913 = vmatprep.mubr.bf16.mxu0 %v7627_v26 }
 0x14b   :  { %3300 = vmatmul.mubr.bf16.gmra.mrb[104].mxu1 %v7483_v31  ;;  %v175_v31 = vld [vmem:[#allocation3 + $0x350] sm:$0xff] }
 0x14c   :  { %2914 = vmatmul.mubr.bf16.gmra.mrb[40].mxu0 %v7633_v15  ;;  %3309 = vmatprep.mubr.bf16.mxu1 %v7487_v33  ;;  %v179_v33 = vld [vmem:[#allocation3 + $0x370] sm:$0xff] }
 0x14d   :  { %2923 = vmatprep.mubr.bf16.mxu0 %v7635_v27  ;;  %v7665_v52 = vcombine.high %v175_v31, %v179_v33  ;;  %v7677_v51 = vcombine.low %v175_v31, %v179_v33 }
 0x14e   :  { %v7641_v59 = vpop.f32.mrb[0].mxu1 }
 0x14f   :  { %v7643_v61 = vpop.f32.mrb[1].mxu1 }
 0x150   :  { %v7647_v1 = vpop.f32.mrb[2].mxu1 }
 0x151   :  { %v7651_v14 = vpop.f32.mrb[3].mxu1 }
 0x153   :  { %3310 = vmatmul.mubr.bf16.gmra.mrb[108].mxu1 %v7495_v47  ;;  %v183_v47 = vld [vmem:[#allocation3 + $0x390] sm:$0xff] }
 0x154   :  { %2924 = vmatmul.mubr.bf16.gmra.mrb[44].mxu0 %v7645_v9  ;;  %3319 = vmatprep.mubr.bf16.mxu1 %v7499_v49  ;;  %v187_v49 = vld [vmem:[#allocation3 + $0x3b0] sm:$0xff] }
 0x155   :  { %2933 = vmatprep.mubr.bf16.mxu0 %v7649_v48  ;;  %v7681_v7 = vcombine.high %v183_v47, %v187_v49  ;;  %v7693_v33 = vcombine.low %v183_v47, %v187_v49 }
 0x156   :  { %v7657_v58 = vpop.f32.mrb[4].mxu1 }
 0x157   :  { %v7659_v4 = vpop.f32.mrb[5].mxu1 }
 0x158   :  { %v7663_v43 = vpop.f32.mrb[6].mxu1 }
 0x159   :  { %v7667_v23 = vpop.f32.mrb[7].mxu1 }
 0x15a   :  { %8607 = vst [vmem:[#allocation29_spill] sm:$0xff] %v7667_v23 }
 0x15b   :  { %3320 = vmatmul.mubr.bf16.gmra.mrb[112].mxu1 %v7507_v5  ;;  %v191_v5 = vld [vmem:[#allocation3 + $0x3d0] sm:$0xff] }
 0x15c   :  { %2934 = vmatmul.mubr.bf16.gmra.mrb[48].mxu0 %v7661_v37  ;;  %3329 = vmatprep.mubr.bf16.mxu1 %v7511_v11  ;;  %v195_v11 = vld [vmem:[#allocation3 + $0x3f0] sm:$0xff] }
 0x15d   :  { %2943 = vmatprep.mubr.bf16.mxu0 %v7665_v52  ;;  %v7709_v49 = vcombine.low %v191_v5, %v195_v11 }
 0x15e   :  { %v7673_v25 = vpop.f32.mrb[8].mxu1 }
 0x15f   :  { %8608 = vst [vmem:[#allocation30_spill] sm:$0xff] %v7673_v25  ;;  %v7675_v21 = vpop.f32.mrb[9].mxu1  ;;  %8618 = vst [vmem:[#allocation40_spill] sm:$0xff] %v7709_v49 }
 0x160   :  { %8609 = vst [vmem:[#allocation31_spill] sm:$0xff] %v7675_v21  ;;  %v7679_v54 = vpop.f32.mrb[10].mxu1  ;;  %v7697_v21 = vcombine.high %v191_v5, %v195_v11 }
 0x161   :  { %8610 = vst [vmem:[#allocation32_spill] sm:$0xff] %v7679_v54  ;;  %v7683_v23 = vpop.f32.mrb[11].mxu1 }
 0x162   :  { %8611 = vst [vmem:[#allocation33_spill] sm:$0xff] %v7683_v23 }
 0x163   :  { %3330 = vmatmul.mubr.bf16.gmra.mrb[116].mxu1 %v7519_v35  ;;  %v72_v35 = vld [vmem:[#allocation3 + $0x18] sm:$0xff] }
 0x164   :  { %2944 = vmatmul.mubr.bf16.gmra.mrb[52].mxu0 %v7677_v51  ;;  %3339 = vmatprep.mubr.bf16.mxu1 %v7523_v41  ;;  %v76_v41 = vld [vmem:[#allocation3 + $0x38] sm:$0xff] }
 0x165   :  { %2953 = vmatprep.mubr.bf16.mxu0 %v7681_v7  ;;  %v7725_v11 = vcombine.low %v72_v35, %v76_v41 }
 0x166   :  { %v7689_v25 = vpop.f32.mrb[12].mxu1 }
 0x167   :  { %8612 = vst [vmem:[#allocation34_spill] sm:$0xff] %v7689_v25  ;;  %v7691_v31 = vpop.f32.mrb[13].mxu1 }
 0x168   :  { %8613 = vst [vmem:[#allocation35_spill] sm:$0xff] %v7691_v31  ;;  %v7695_v54 = vpop.f32.mrb[14].mxu1  ;;  %v7713_v31 = vcombine.high %v72_v35, %v76_v41  ;;  %v88_v35 = vld [vmem:[#allocation3 + $0x98] sm:$0xff] }
 0x169   :  { %8614 = vst [vmem:[#allocation36_spill] sm:$0xff] %v7695_v54  ;;  %v7699_v23 = vpop.f32.mrb[15].mxu1  ;;  %v92_v41 = vld [vmem:[#allocation3 + $0xb8] sm:$0xff] }
 0x16a   :  { %8615 = vst [vmem:[#allocation37_spill] sm:$0xff] %v7699_v23  ;;  %8620 = vst [vmem:[#allocation42_spill] sm:$0xff] %v7713_v31 }
 0x16b   :  { %3340 = vmatmul.mubr.bf16.gmra.mrb[120].mxu1 %v7531_v57  ;;  %v80_v57 = vld [vmem:[#allocation3 + $0x58] sm:$0xff] }
 0x16c   :  { %2954 = vmatmul.mubr.bf16.gmra.mrb[56].mxu0 %v7693_v33  ;;  %3349 = vmatprep.mubr.bf16.mxu1 %v7535_v3  ;;  %v84_v3 = vld [vmem:[#allocation3 + $0x78] sm:$0xff] }
 0x16d   :  { %2963 = vmatprep.mubr.bf16.mxu0 %v7697_v21 }
 0x16e   :  { %v7705_v25 = vpop.f32.mrb[16].mxu1 }
 0x16f   :  { %8616 = vst [vmem:[#allocation38_spill] sm:$0xff] %v7705_v25  ;;  %v7707_v47 = vpop.f32.mrb[17].mxu1 }
 0x170   :  { %8617 = vst [vmem:[#allocation39_spill] sm:$0xff] %v7707_v47  ;;  %v7711_v54 = vpop.f32.mrb[18].mxu1  ;;  %v7006_v47 = vld [vmem:[#allocation5 + $0x408] ss:$16 sps:$4 sm:$0xff]  }
 0x171   :  { %8619 = vst [vmem:[#allocation41_spill] sm:$0xff] %v7711_v54  ;;  %v7715_v23 = vpop.f32.mrb[19].mxu1 }
 0x172   :  { %8621 = vst [vmem:[#allocation43_spill] sm:$0xff] %v7715_v23  ;;  %v7729_v23 = vcombine.high %v80_v57, %v84_v3 }
 0x173   :  { %3350 = vmatmul.mubr.bf16.gmra.mrb[124].mxu1 %v7543_v42  ;;  %v7011_v42 = vld [vmem:[#allocation5 + $0x42c] ss:$16 sps:$4 sm:$0xff]  }
 0x174   :  { %2964 = vmatmul.mubr.bf16.gmra.mrb[60].mxu0 %v7709_v49  ;;  %3392 = vmatprep.mubr.bf16.mxu1 %v7359_v56  ;;  %8625 = vst [vmem:[#allocation47_spill] sm:$0xff] %v7729_v23  ;;  %v7009_v56 = vld [vmem:[#allocation5 + $0x428] ss:$16 sps:$4 sm:$0xff]  }
 0x175   :  { %3006 = vmatprep.mubr.bf16.mxu0 %v7713_v31 }
 0x176   :  { %v7721_v25 = vpop.f32.mrb[20].mxu1 }
 0x177   :  { %8622 = vst [vmem:[#allocation44_spill] sm:$0xff] %v7721_v25  ;;  %v7723_v5 = vpop.f32.mrb[21].mxu1 }
 0x178   :  { %8623 = vst [vmem:[#allocation45_spill] sm:$0xff] %v7723_v5  ;;  %v7727_v54 = vpop.f32.mrb[22].mxu1 }
 0x179   :  { %8624 = vst [vmem:[#allocation46_spill] sm:$0xff] %v7727_v54  ;;  %v7731_v49 = vpop.f32.mrb[23].mxu1  ;;  %v7014_v54 = vld [vmem:[#allocation5 + $0x44c] ss:$16 sps:$4 sm:$0xff]  }
 0x17a   :  { %8626 = vst [vmem:[#allocation48_spill] sm:$0xff] %v7731_v49  ;;  %v7741_v49 = vcombine.low %v80_v57, %v84_v3  ;;  %v96_v57 = vld [vmem:[#allocation3 + $0xd8] sm:$0xff] }
 0x17b   :  { %3393 = vmatmul.mubr.bf16.vlgmr.msra.gmra.mrb[64].mxu1 %v7365_v13  ;;  %v7745_v13 = vcombine.high %v88_v35, %v92_v41  ;;  %v100_v3 = vld [vmem:[#allocation3 + $0xf8] sm:$0xff] }
 0x17c   :  { %3007 = vmatmul.mubr.bf16.vlgmr.msra.gmra.mrb[0].mxu0 %v7725_v11  ;;  %3554 = vmatpush1.bf16.msra.mxu1 %v7006_v47  ;;  %8628 = vst [vmem:[#allocation50_spill] sm:$0xff] %v7741_v49 }
 0x17d   :  { %3016 = vmatprep.mubr.bf16.mxu0 %v7729_v23  ;;  %3402 = vmatprep.mubr.bf16.mxu1 %v7369_v16  ;;  %v7012_v23 = vld [vmem:[#allocation5 + $0x448] ss:$16 sps:$4 sm:$0xff]   ;;  %v7017_v16 = vld [vmem:[#allocation5 + $0x46c] ss:$16 sps:$4 sm:$0xff]  }
 0x17e   :  { %3555 = vmatprep.subr.bf16.mxu1 %v7011_v42  ;;  %v7737_v5 = vpop.f32.mrb[24].mxu1  ;;  %v7015_v42 = vld [vmem:[#allocation5 + $0x468] ss:$16 sps:$4 sm:$0xff]  }
 0x17f   :  { %v7739_v25 = vpop.f32.mrb[25].mxu1 }
 0x180   :  { %8627 = vst [vmem:[#allocation49_spill] sm:$0xff] %v7739_v25  ;;  %v7743_v31 = vpop.f32.mrb[26].mxu1  ;;  %3556 = vmatpush1.bf16.msra.mxu1 %v7009_v56 }
 0x181   :  { %8629 = vst [vmem:[#allocation51_spill] sm:$0xff] %v7743_v31  ;;  %v7747_v47 = vpop.f32.mrb[27].mxu1  ;;  %3557 = vmatprep.subr.bf16.mxu1 %v7014_v54  ;;  %v7020_v31 = vld [vmem:[#allocation5 + $0x48c] ss:$16 sps:$4 sm:$0xff]   ;;  %v7757_v54 = vcombine.low %v88_v35, %v92_v41 }
 0x182   :  { %8630 = vst [vmem:[#allocation52_spill] sm:$0xff] %v7747_v47  ;;  %v104_v35 = vld [vmem:[#allocation3 + $0x118] sm:$0xff] }
 0x183   :  { %3403 = vmatmul.mubr.bf16.gmra.mrb[68].mxu1 %v7377_v28  ;;  %8632 = vst [vmem:[#allocation54_spill] sm:$0xff] %v7757_v54  ;;  %v108_v41 = vld [vmem:[#allocation3 + $0x138] sm:$0xff] }
 0x184   :  { %3017 = vmatmul.mubr.bf16.gmra.mrb[4].mxu0 %v7741_v49  ;;  %3412 = vmatprep.mubr.bf16.mxu1 %v7381_v30  ;;  %v7761_v49 = vcombine.high %v96_v57, %v100_v3  ;;  %v7018_v30 = vld [vmem:[#allocation5 + $0x488] ss:$16 sps:$4 sm:$0xff]  }
 0x185   :  { %3026 = vmatprep.mubr.bf16.mxu0 %v7745_v13  ;;  %3558 = vmatpush1.bf16.msra.mxu1 %v7012_v23  ;;  %v7023_v23 = vld [vmem:[#allocation5 + $0x4ac] ss:$16 sps:$4 sm:$0xff]  }
 0x186   :  { %v7753_v56 = vpop.f32.mrb[28].mxu1  ;;  %3559 = vmatprep.subr.bf16.mxu1 %v7017_v16  ;;  %8634 = vst [vmem:[#allocation56_spill] sm:$0xff] %v7761_v49  ;;  %v7021_v16 = vld [vmem:[#allocation5 + $0x4a8] ss:$16 sps:$4 sm:$0xff]  }
 0x187   :  { %v7755_v47 = vpop.f32.mrb[29].mxu1 }
 0x188   :  { %8631 = vst [vmem:[#allocation53_spill] sm:$0xff] %v7755_v47  ;;  %v7759_v25 = vpop.f32.mrb[30].mxu1 }
 0x189   :  { %8633 = vst [vmem:[#allocation55_spill] sm:$0xff] %v7759_v25  ;;  %v7763_v28 = vpop.f32.mrb[31].mxu1  ;;  %3560 = vmatpush1.bf16.msra.mxu1 %v7015_v42 }
 0x18a   :  { %8635 = vst [vmem:[#allocation57_spill] sm:$0xff] %v7763_v28  ;;  %3561 = vmatprep.subr.bf16.mxu1 %v7020_v31  ;;  %v7026_v28 = vld [vmem:[#allocation5 + $0x4cc] ss:$16 sps:$4 sm:$0xff]   ;;  %v7773_v31 = vcombine.low %v96_v57, %v100_v3  ;;  %v7066_v57 = vld [vmem:[#allocation7] ss:$8 sps:$4 sm:$0xff]  }
 0x18b   :  { %3413 = vmatmul.mubr.bf16.gmra.mrb[72].mxu1 %v7389_v44  ;;  %v7068_v3 = vld [vmem:[#allocation7 + $0x4] ss:$8 sps:$4 sm:$0xff]  }
 0x18c   :  { %3027 = vmatmul.mubr.bf16.gmra.mrb[8].mxu0 %v7757_v54  ;;  %3422 = vmatprep.mubr.bf16.mxu1 %v7393_v46  ;;  %8637 = vst [vmem:[#allocation59_spill] sm:$0xff] %v7773_v31  ;;  %v7777_v54 = vcombine.high %v104_v35, %v108_v41  ;;  %v7024_v46 = vld [vmem:[#allocation5 + $0x4c8] ss:$16 sps:$4 sm:$0xff]  }
 0x18d   :  { %3036 = vmatprep.mubr.bf16.mxu0 %v7761_v49  ;;  %3562 = vmatpush1.bf16.msra.mxu1 %v7018_v30  ;;  %v7029_v49 = vld [vmem:[#allocation5 + $0x4ec] ss:$16 sps:$4 sm:$0xff]  }
 0x18e   :  { %v7769_v25 = vpop.f32.mrb[32].mxu1  ;;  %3563 = vmatprep.subr.bf16.mxu1 %v7023_v23  ;;  %8639 = vst [vmem:[#allocation61_spill] sm:$0xff] %v7777_v54  ;;  %v112_v30 = vld [vmem:[#allocation3 + $0x158] sm:$0xff]  ;;  %4783 = vmatprep.subr.bf16.mxu0 %v7068_v3 }
 0x18f   :  { %v7771_v42 = vpop.f32.mrb[33].mxu1  ;;  %v116_v23 = vld [vmem:[#allocation3 + $0x178] sm:$0xff]  ;;  %4784 = vmatpush1.bf16.msra.mxu0 %v7066_v57 }
 0x190   :  { %8636 = vst [vmem:[#allocation58_spill] sm:$0xff] %v7771_v42  ;;  %v7775_v47 = vpop.f32.mrb[34].mxu1  ;;  %v120_v57 = vld [vmem:[#allocation3 + $0x198] sm:$0xff] }
 0x191   :  { %8638 = vst [vmem:[#allocation60_spill] sm:$0xff] %v7775_v47  ;;  %v7779_v44 = vpop.f32.mrb[35].mxu1  ;;  %3564 = vmatpush1.bf16.msra.mxu1 %v7021_v16  ;;  %v7027_v47 = vld [vmem:[#allocation5 + $0x4e8] ss:$16 sps:$4 sm:$0xff]   ;;  %v7032_v16 = vld [vmem:[#allocation5 + $0x50c] ss:$16 sps:$4 sm:$0xff]  }
 0x192   :  { %8640 = vst [vmem:[#allocation62_spill] sm:$0xff] %v7779_v44  ;;  %3565 = vmatprep.subr.bf16.mxu1 %v7026_v28  ;;  %v7030_v44 = vld [vmem:[#allocation5 + $0x508] ss:$16 sps:$4 sm:$0xff]  }
 0x193   :  { %3423 = vmatmul.mubr.bf16.gmra.mrb[76].mxu1 %v7401_v62  ;;  %v124_v3 = vld [vmem:[#allocation3 + $0x1b8] sm:$0xff] }
 0x194   :  { %3037 = vmatmul.mubr.bf16.gmra.mrb[12].mxu0 %v7773_v31  ;;  %3432 = vmatprep.mubr.bf16.mxu1 %v7405_v0  ;;  %v7789_v31 = vcombine.low %v104_v35, %v108_v41  ;;  %v7074_v35 = vld [vmem:[#allocation7 + $0x14] ss:$8 sps:$4 sm:$0xff]   ;;  %v7077_v41 = vld [vmem:[#allocation7 + $0x24] ss:$8 sps:$4 sm:$0xff]  }
 0x195   :  { %3046 = vmatprep.mubr.bf16.mxu0 %v7777_v54  ;;  %3566 = vmatpush1.bf16.msra.mxu1 %v7024_v46  ;;  %v7793_v54 = vcombine.high %v112_v30, %v116_v23  ;;  %v7035_v46 = vld [vmem:[#allocation5 + $0x52c] ss:$16 sps:$4 sm:$0xff]  }
 0x196   :  { %v7785_v42 = vpop.f32.mrb[36].mxu1  ;;  %3567 = vmatprep.subr.bf16.mxu1 %v7029_v49  ;;  %8642 = vst [vmem:[#allocation64_spill] sm:$0xff] %v7789_v31  ;;  %v7072_v49 = vld [vmem:[#allocation7 + $0x10] ss:$8 sps:$4 sm:$0xff]   ;;  %4785 = vmatprep.subr.bf16.mxu0 %v7074_v35 }
 0x197   :  { %v7787_v28 = vpop.f32.mrb[37].mxu1  ;;  %8644 = vst [vmem:[#allocation66_spill] sm:$0xff] %v7793_v54  ;;  %4786 = vmatpush1.bf16.msra.mxu0 %v7072_v49  ;;  %v7039_v49 = vld [vmem:[#allocation5 + $0x568] ss:$16 sps:$4 sm:$0xff]  }
 0x198   :  { %8641 = vst [vmem:[#allocation63_spill] sm:$0xff] %v7787_v28  ;;  %v7791_v62 = vpop.f32.mrb[38].mxu1  ;;  %4787 = vmatprep.subr.bf16.mxu0 %v7077_v41  ;;  %v7075_v28 = vld [vmem:[#allocation7 + $0x20] ss:$8 sps:$4 sm:$0xff]   ;;  %v7081_v35 = vld [vmem:[#allocation7 + $0x30] ss:$8 sps:$4 sm:$0xff]  }
 0x199   :  { %8643 = vst [vmem:[#allocation65_spill] sm:$0xff] %v7791_v62  ;;  %v7795_v0 = vpop.f32.mrb[39].mxu1  ;;  %3568 = vmatpush1.bf16.msra.mxu1 %v7027_v47  ;;  %v7033_v62 = vld [vmem:[#allocation5 + $0x528] ss:$16 sps:$4 sm:$0xff]   ;;  %v7038_v47 = vld [vmem:[#allocation5 + $0x54c] ss:$16 sps:$4 sm:$0xff]  }
 0x19a   :  { %8645 = vst [vmem:[#allocation67_spill] sm:$0xff] %v7795_v0  ;;  %3569 = vmatprep.subr.bf16.mxu1 %v7032_v16  ;;  %v7044_v41 = vld [vmem:[#allocation5 + $0x58c] ss:$16 sps:$4 sm:$0xff]  }
 0x19b   :  { %3433 = vmatmul.mubr.bf16.gmra.mrb[80].mxu1 %v7413_v18  ;;  %4788 = vmatpush1.bf16.msra.mxu0 %v7075_v28  ;;  %v7084_v28 = vld [vmem:[#allocation7 + $0x40] ss:$8 sps:$4 sm:$0xff]  }
 0x19c   :  { %3047 = vmatmul.mubr.bf16.gmra.mrb[16].mxu0 %v7789_v31  ;;  %3442 = vmatprep.mubr.bf16.mxu1 %v7417_v20  ;;  %v7805_v31 = vcombine.low %v112_v30, %v116_v23  ;;  %v128_v30 = vld [vmem:[#allocation3 + $0x1d8] sm:$0xff] }
 0x19d   :  { %3056 = vmatprep.mubr.bf16.mxu0 %v7793_v54  ;;  %3570 = vmatpush1.bf16.msra.mxu1 %v7030_v44  ;;  %v7809_v54 = vcombine.high %v120_v57, %v124_v3  ;;  %v7036_v44 = vld [vmem:[#allocation5 + $0x548] ss:$16 sps:$4 sm:$0xff]   ;;  %v7083_v23 = vld [vmem:[#allocation7 + $0x34] ss:$8 sps:$4 sm:$0xff]  }
 0x19e   :  { %v7801_v0 = vpop.f32.mrb[40].mxu1  ;;  %3571 = vmatprep.subr.bf16.mxu1 %v7035_v46  ;;  %8647 = vst [vmem:[#allocation69_spill] sm:$0xff] %v7805_v31  ;;  %v132_v46 = vld [vmem:[#allocation3 + $0x1f8] sm:$0xff]  ;;  %4789 = vmatprep.subr.bf16.mxu0 %v7083_v23 }
 0x19f   :  { %8646 = vst [vmem:[#allocation68_spill] sm:$0xff] %v7801_v0  ;;  %v7803_v16 = vpop.f32.mrb[41].mxu1  ;;  %8648 = vst [vmem:[#allocation70_spill] sm:$0xff] %v7809_v54  ;;  %v7041_v0 = vld [vmem:[#allocation5 + $0x56c] ss:$16 sps:$4 sm:$0xff]   ;;  %4790 = vmatpush1.bf16.msra.mxu0 %v7081_v35 }
 0x1a0   :  { %v7807_v18 = vpop.f32.mrb[42].mxu1  ;;  %v7045_v23 = vld [vmem:[#allocation5 + $0x5a8] ss:$16 sps:$4 sm:$0xff]  }
 0x1a1   :  { %v7811_v20 = vpop.f32.mrb[43].mxu1  ;;  %3572 = vmatpush1.bf16.msra.mxu1 %v7033_v62 }
 0x1a2   :  { %8649 = vst [vmem:[#allocation71_spill] sm:$0xff] %v7811_v20  ;;  %3573 = vmatprep.subr.bf16.mxu1 %v7038_v47  ;;  %v7086_v47 = vld [vmem:[#allocation7 + $0x44] ss:$8 sps:$4 sm:$0xff]  }
 0x1a3   :  { %3443 = vmatmul.mubr.bf16.gmra.mrb[84].mxu1 %v7425_v38  ;;  %v7821_v38 = vcombine.low %v120_v57, %v124_v3  ;;  %4791 = vmatprep.subr.bf16.mxu0 %v7086_v47  ;;  %v7092_v57 = vld [vmem:[#allocation7 + $0x54] ss:$8 sps:$4 sm:$0xff]   ;;  %v7095_v47 = vld [vmem:[#allocation7 + $0x64] ss:$8 sps:$4 sm:$0xff]  }
 0x1a4   :  { %3057 = vmatmul.mubr.bf16.gmra.mrb[20].mxu0 %v7805_v31  ;;  %3452 = vmatprep.mubr.bf16.mxu1 %v7429_v40  ;;  %v7825_v40 = vcombine.high %v128_v30, %v132_v46  ;;  %v140_v3 = vld [vmem:[#allocation3 + $0x238] sm:$0xff] }
 0x1a5   :  { %3066 = vmatprep.mubr.bf16.mxu0 %v7809_v54  ;;  %3574 = vmatpush1.bf16.msra.mxu1 %v7036_v44  ;;  %8651 = vst [vmem:[#allocation73_spill] sm:$0xff] %v7821_v38  ;;  %v7042_v44 = vld [vmem:[#allocation5 + $0x588] ss:$16 sps:$4 sm:$0xff]  }
 0x1a6   :  { %v7817_v62 = vpop.f32.mrb[44].mxu1  ;;  %3575 = vmatprep.subr.bf16.mxu1 %v7041_v0  ;;  %8652 = vst [vmem:[#allocation74_spill] sm:$0xff] %v7825_v40  ;;  %v136_v0 = vld [vmem:[#allocation3 + $0x218] sm:$0xff]  ;;  %4792 = vmatpush1.bf16.msra.mxu0 %v7084_v28  ;;  %v7093_v28 = vld [vmem:[#allocation7 + $0x60] ss:$8 sps:$4 sm:$0xff]  }
 0x1a7   :  { %8650 = vst [vmem:[#allocation72_spill] sm:$0xff] %v7817_v62  ;;  %v7819_v31 = vpop.f32.mrb[45].mxu1  ;;  %v7047_v62 = vld [vmem:[#allocation5 + $0x5ac] ss:$16 sps:$4 sm:$0xff]   ;;  %4793 = vmatprep.subr.bf16.mxu0 %v7092_v57 }
 0x1a8   :  { %v7823_v54 = vpop.f32.mrb[46].mxu1  ;;  %v148_v57 = vld [vmem:[#allocation3 + $0x278] sm:$0xff] }
 0x1a9   :  { %v7827_v20 = vpop.f32.mrb[47].mxu1  ;;  %3576 = vmatpush1.bf16.msra.mxu1 %v7039_v49  ;;  %v7090_v49 = vld [vmem:[#allocation7 + $0x50] ss:$8 sps:$4 sm:$0xff]  }
 0x1aa   :  { %8653 = vst [vmem:[#allocation75_spill] sm:$0xff] %v7827_v20  ;;  %3577 = vmatprep.subr.bf16.mxu1 %v7044_v41  ;;  %v7050_v41 = vld [vmem:[#allocation5 + $0x5cc] ss:$16 sps:$4 sm:$0xff]   ;;  %4794 = vmatpush1.bf16.msra.mxu0 %v7090_v49 }
 0x1ab   :  { %3453 = vmatmul.mubr.bf16.gmra.mrb[88].mxu1 %v7437_v60  ;;  %v7837_v60 = vcombine.low %v128_v30, %v132_v46  ;;  %4795 = vmatprep.subr.bf16.mxu0 %v7095_v47  ;;  %v8659_v30 = vld [vmem:[#allocation10_spill] sm:$0xff]  ;;  %v144_v46 = vld [vmem:[#allocation3 + $0x258] sm:$0xff] }
 0x1ac   :  { %3067 = vmatmul.mubr.bf16.gmra.mrb[24].mxu0 %v7821_v38  ;;  %3462 = vmatprep.mubr.bf16.mxu1 %v7441_v2  ;;  %v7841_v2 = vcombine.high %v136_v0, %v140_v3  ;;  %v7104_v47 = vld [vmem:[#allocation7 + $0x84] ss:$8 sps:$4 sm:$0xff]  }
 0x1ad   :  { %3076 = vmatprep.mubr.bf16.mxu0 %v7825_v40  ;;  %3578 = vmatpush1.bf16.msra.mxu1 %v7042_v44  ;;  %8655 = vst [vmem:[#allocation77_spill] sm:$0xff] %v7837_v60  ;;  %v7048_v44 = vld [vmem:[#allocation5 + $0x5c8] ss:$16 sps:$4 sm:$0xff]  }
 0x1ae   :  { %v7833_v35 = vpop.f32.mrb[48].mxu1  ;;  %3579 = vmatprep.subr.bf16.mxu1 %v7047_v62  ;;  %8657 = vst [vmem:[#allocation79_spill] sm:$0xff] %v7841_v2  ;;  %v7101_v62 = vld [vmem:[#allocation7 + $0x74] ss:$8 sps:$4 sm:$0xff]   ;;  %4796 = vmatpush1.bf16.msra.mxu0 %v7093_v28 }
 0x1af   :  { %8654 = vst [vmem:[#allocation76_spill] sm:$0xff] %v7833_v35  ;;  %v7835_v38 = vpop.f32.mrb[49].mxu1  ;;  %v7053_v35 = vld [vmem:[#allocation5 + $0x5ec] ss:$16 sps:$4 sm:$0xff]   ;;  %4797 = vmatprep.subr.bf16.mxu0 %v7101_v62  ;;  %v8664_v28 = vld [vmem:[#allocation12_spill] sm:$0xff] }
 0x1b0   :  { %v7839_v40 = vpop.f32.mrb[50].mxu1  ;;  %v156_v62 = vld [vmem:[#allocation3 + $0x2b8] sm:$0xff] }
 0x1b1   :  { %8656 = vst [vmem:[#allocation78_spill] sm:$0xff] %v7839_v40  ;;  %v7843_v20 = vpop.f32.mrb[51].mxu1  ;;  %3580 = vmatpush1.bf16.msra.mxu1 %v7045_v23  ;;  %v7099_v23 = vld [vmem:[#allocation7 + $0x70] ss:$8 sps:$4 sm:$0xff]  }
 0x1b2   :  { %8658 = vst [vmem:[#allocation80_spill] sm:$0xff] %v7843_v20  ;;  %3581 = vmatprep.subr.bf16.mxu1 %v7050_v41  ;;  %v7051_v20 = vld [vmem:[#allocation5 + $0x5e8] ss:$16 sps:$4 sm:$0xff]   ;;  %v7056_v41 = vld [vmem:[#allocation5 + $0x60c] ss:$16 sps:$4 sm:$0xff]   ;;  %4798 = vmatpush1.bf16.msra.mxu0 %v7099_v23 }
 0x1b3   :  { %3463 = vmatmul.mubr.bf16.gmra.mrb[92].mxu1 %v7449_v24  ;;  %v7853_v24 = vcombine.low %v136_v0, %v140_v3  ;;  %4799 = vmatprep.subr.bf16.mxu0 %v7104_v47  ;;  %v7110_v0 = vld [vmem:[#allocation7 + $0x94] ss:$8 sps:$4 sm:$0xff]  }
 0x1b4   :  { %3077 = vmatmul.mubr.bf16.gmra.mrb[28].mxu0 %v7837_v60  ;;  %3472 = vmatprep.mubr.bf16.mxu1 %v8659_v30  ;;  %v7857_v30 = vcombine.high %v144_v46, %v148_v57  ;;  %v152_v3 = vld [vmem:[#allocation3 + $0x298] sm:$0xff] }
 0x1b5   :  { %3086 = vmatprep.mubr.bf16.mxu0 %v7841_v2  ;;  %3582 = vmatpush1.bf16.msra.mxu1 %v7048_v44  ;;  %v7102_v44 = vld [vmem:[#allocation7 + $0x80] ss:$8 sps:$4 sm:$0xff]  }
 0x1b6   :  { %v7849_v49 = vpop.f32.mrb[52].mxu1  ;;  %3583 = vmatprep.subr.bf16.mxu1 %v7053_v35  ;;  %8662 = vst [vmem:[#allocation82_spill] sm:$0xff] %v7857_v30  ;;  %v8663_v35 = vld [vmem:[#allocation11_spill] sm:$0xff]  ;;  %4800 = vmatpush1.bf16.msra.mxu0 %v7102_v44  ;;  %v8671_v44 = vld [vmem:[#allocation13_spill] sm:$0xff] }
 0x1b7   :  { %v7851_v60 = vpop.f32.mrb[53].mxu1  ;;  %4801 = vmatprep.subr.bf16.mxu0 %v7110_v0  ;;  %v8672_v0 = vld [vmem:[#allocation14_spill] sm:$0xff] }
 0x1b8   :  { %8660 = vst [vmem:[#allocation10_spill] sm:$0xff] %v7851_v60  ;;  %v7855_v2 = vpop.f32.mrb[54].mxu1 }
 0x1b9   :  { %8661 = vst [vmem:[#allocation81_spill] sm:$0xff] %v7855_v2  ;;  %v7859_v40 = vpop.f32.mrb[55].mxu1  ;;  %3584 = vmatpush1.bf16.msra.mxu1 %v7051_v20  ;;  %v7108_v2 = vld [vmem:[#allocation7 + $0x90] ss:$8 sps:$4 sm:$0xff]   ;;  %v7113_v20 = vld [vmem:[#allocation7 + $0xa4] ss:$8 sps:$4 sm:$0xff]  }
 0x1ba   :  { %3746 = vmatprep.subr.bf16.mxu1 %v7056_v41  ;;  %v7869_v41 = vcombine.low %v144_v46, %v148_v57  ;;  %4802 = vmatpush1.bf16.msra.mxu0 %v7108_v2  ;;  %v160_v46 = vld [vmem:[#allocation3 + $0x2d8] sm:$0xff] }
 0x1bb   :  { %3473 = vmatmul.mubr.bf16.gmra.mrb[96].mxu1 %v8663_v35  ;;  %v7873_v35 = vcombine.high %v152_v3, %v156_v62  ;;  %4803 = vmatprep.subr.bf16.mxu0 %v7113_v20  ;;  %v164_v57 = vld [vmem:[#allocation3 + $0x2f8] sm:$0xff]  ;;  %v7885_v20 = vcombine.low %v152_v3, %v156_v62 }
 0x1bc   :  { %3087 = vmatmul.mubr.bf16.gmra.mrb[32].mxu0 %v7853_v24  ;;  %3482 = vmatprep.mubr.bf16.mxu1 %v8664_v28  ;;  %8667 = vst [vmem:[#allocation83_spill] sm:$0xff] %v7869_v41  ;;  %v7111_v28 = vld [vmem:[#allocation7 + $0xa0] ss:$8 sps:$4 sm:$0xff]   ;;  %v168_v3 = vld [vmem:[#allocation3 + $0x318] sm:$0xff] }
 0x1bd   :  { %3096 = vmatprep.mubr.bf16.mxu0 %v7857_v30  ;;  %8669 = vst [vmem:[#allocation85_spill] sm:$0xff] %v7873_v35  ;;  %8675 = vst [vmem:[#allocation87_spill] sm:$0xff] %v7885_v20  ;;  %v172_v62 = vld [vmem:[#allocation3 + $0x338] sm:$0xff] }
 0x1be   :  { %v7865_v60 = vpop.f32.mrb[56].mxu1  ;;  %4804 = vmatpush1.bf16.msra.mxu0 %v7111_v28  ;;  %v8679_v28 = vld [vmem:[#allocation15_spill] sm:$0xff] }
 0x1bf   :  { %8665 = vst [vmem:[#allocation11_spill] sm:$0xff] %v7865_v60  ;;  %v7867_v23 = vpop.f32.mrb[57].mxu1 }
 0x1c0   :  { %8666 = vst [vmem:[#allocation12_spill] sm:$0xff] %v7867_v23  ;;  %v7871_v47 = vpop.f32.mrb[58].mxu1  ;;  %v7119_v23 = vld [vmem:[#allocation7 + $0xb4] ss:$8 sps:$4 sm:$0xff]  }
 0x1c1   :  { %8668 = vst [vmem:[#allocation84_spill] sm:$0xff] %v7871_v47  ;;  %v7875_v30 = vpop.f32.mrb[59].mxu1  ;;  %v7117_v47 = vld [vmem:[#allocation7 + $0xb0] ss:$8 sps:$4 sm:$0xff]   ;;  %4805 = vmatprep.subr.bf16.mxu0 %v7119_v23 }
 0x1c2   :  { %8670 = vst [vmem:[#allocation86_spill] sm:$0xff] %v7875_v30  ;;  %v7122_v30 = vld [vmem:[#allocation7 + $0xc4] ss:$8 sps:$4 sm:$0xff]   ;;  %4806 = vmatpush1.bf16.msra.mxu0 %v7117_v47  ;;  %v8680_v23 = vld [vmem:[#allocation16_spill] sm:$0xff] }
 0x1c3   :  { %3483 = vmatmul.mubr.bf16.gmra.mrb[100].mxu1 %v8671_v44  ;;  %v7889_v44 = vcombine.high %v160_v46, %v164_v57  ;;  %4807 = vmatprep.subr.bf16.mxu0 %v7122_v30  ;;  %v7131_v47 = vld [vmem:[#allocation7 + $0xe4] ss:$8 sps:$4 sm:$0xff]   ;;  %v7129_v30 = vld [vmem:[#allocation7 + $0xe0] ss:$8 sps:$4 sm:$0xff]  }
 0x1c4   :  { %3097 = vmatmul.mubr.bf16.gmra.mrb[36].mxu0 %v7869_v41  ;;  %3492 = vmatprep.mubr.bf16.mxu1 %v8672_v0  ;;  %v7120_v0 = vld [vmem:[#allocation7 + $0xc0] ss:$8 sps:$4 sm:$0xff]  }
 0x1c5   :  { %3106 = vmatprep.mubr.bf16.mxu0 %v7873_v35  ;;  %8677 = vst [vmem:[#allocation89_spill] sm:$0xff] %v7889_v44 }
 0x1c6   :  { %v7881_v60 = vpop.f32.mrb[60].mxu1  ;;  %4808 = vmatpush1.bf16.msra.mxu0 %v7120_v0  ;;  %v176_v0 = vld [vmem:[#allocation3 + $0x358] sm:$0xff] }
 0x1c7   :  { %8673 = vst [vmem:[#allocation13_spill] sm:$0xff] %v7881_v60  ;;  %v7883_v2 = vpop.f32.mrb[61].mxu1  ;;  %v7897_v60 = vcombine.low %v160_v46, %v164_v57  ;;  %v7135_v46 = vld [vmem:[#allocation7 + $0xf0] ss:$8 sps:$4 sm:$0xff]   ;;  %v7905_v57 = vcombine.low %v168_v3, %v172_v62 }
 0x1c8   :  { %8674 = vst [vmem:[#allocation14_spill] sm:$0xff] %v7883_v2  ;;  %v7887_v41 = vpop.f32.mrb[62].mxu1  ;;  %v7128_v2 = vld [vmem:[#allocation7 + $0xd4] ss:$8 sps:$4 sm:$0xff]  }
 0x1c9   :  { %8676 = vst [vmem:[#allocation88_spill] sm:$0xff] %v7887_v41  ;;  %v7891_v35 = vpop.f32.mrb[63].mxu1  ;;  %v7126_v41 = vld [vmem:[#allocation7 + $0xd0] ss:$8 sps:$4 sm:$0xff]   ;;  %4809 = vmatprep.subr.bf16.mxu0 %v7128_v2 }
 0x1ca   :  { %8678 = vst [vmem:[#allocation90_spill] sm:$0xff] %v7891_v35  ;;  %v7899_v35 = vcombine.high %v168_v3, %v172_v62  ;;  %4810 = vmatpush1.bf16.msra.mxu0 %v7126_v41  ;;  %v8685_v41 = vld [vmem:[#allocation19_spill] sm:$0xff]  ;;  %v8689_v3 = vld [vmem:[#allocation22_spill] sm:$0xff]  ;;  %v192_v62 = vld [vmem:[#allocation3 + $0x3d8] sm:$0xff] }
 0x1cb   :  { %3493 = vmatmul.mubr.bf16.gmra.mrb[104].mxu1 %v8679_v28  ;;  %4811 = vmatprep.subr.bf16.mxu0 %v7131_v47  ;;  %v8682_v28 = vld [vmem:[#allocation17_spill] sm:$0xff]  ;;  %v8686_v47 = vld [vmem:[#allocation20_spill] sm:$0xff] }
 0x1cc   :  { %3107 = vmatmul.mubr.bf16.gmra.mrb[40].mxu0 %v7885_v20  ;;  %3502 = vmatprep.mubr.bf16.mxu1 %v8680_v23  ;;  %8681 = vst [vmem:[#allocation15_spill] sm:$0xff] %v7899_v35  ;;  %v8683_v23 = vld [vmem:[#allocation18_spill] sm:$0xff]  ;;  %v180_v20 = vld [vmem:[#allocation3 + $0x378] sm:$0xff] }
 0x1cd   :  { %3116 = vmatprep.mubr.bf16.mxu0 %v7889_v44  ;;  %v7137_v44 = vld [vmem:[#allocation7 + $0xf4] ss:$8 sps:$4 sm:$0xff]   ;;  %v7907_v2 = vcombine.high %v176_v0, %v180_v20 }
 0x1ce   :  { %4812 = vmatpush1.bf16.msra.mxu0 %v7129_v30 }
 0x1cf   :  { %4813 = vmatprep.subr.bf16.mxu0 %v7137_v44  ;;  %8684 = vst [vmem:[#allocation16_spill] sm:$0xff] %v7907_v2  ;;  %v8688_v44 = vld [vmem:[#allocation21_spill] sm:$0xff] }
 0x1d2   :  { %4814 = vmatpush1.bf16.msra.mxu0 %v7135_v46  ;;  %v196_v46 = vld [vmem:[#allocation3 + $0x3f8] sm:$0xff] }
 0x1d3   :  { %3503 = vmatmul.mubr.bf16.gmra.mrb[108].mxu1 %v8682_v28  ;;  %v184_v28 = vld [vmem:[#allocation3 + $0x398] sm:$0xff] }
 0x1d4   :  { %3117 = vmatmul.mubr.bf16.gmra.mrb[44].mxu0 %v7897_v60  ;;  %3512 = vmatprep.mubr.bf16.mxu1 %v8683_v23  ;;  %v188_v23 = vld [vmem:[#allocation3 + $0x3b8] sm:$0xff] }
 0x1d5   :  { %3126 = vmatprep.mubr.bf16.mxu0 %v7899_v35  ;;  %v7913_v35 = vcombine.low %v176_v0, %v180_v20  ;;  %v7915_v30 = vcombine.high %v184_v28, %v188_v23  ;;  %v8691_v20 = vld [vmem:[#allocation23_spill] sm:$0xff]  ;;  %v8692_v0 = vld [vmem:[#allocation24_spill] sm:$0xff] }
 0x1d7   :  { %8687 = vst [vmem:[#allocation17_spill] sm:$0xff] %v7915_v30 }
 0x1db   :  { %3513 = vmatmul.mubr.bf16.gmra.mrb[112].mxu1 %v8685_v41  ;;  %v7921_v41 = vcombine.low %v184_v28, %v188_v23  ;;  %v7054_v28 = vld [vmem:[#allocation5 + $0x608] ss:$16 sps:$4 sm:$0xff]   ;;  %v7059_v23 = vld [vmem:[#allocation5 + $0x62c] ss:$16 sps:$4 sm:$0xff]  }
 0x1dc   :  { %3127 = vmatmul.mubr.bf16.gmra.mrb[48].mxu0 %v7905_v57  ;;  %3522 = vmatprep.mubr.bf16.mxu1 %v8686_v47  ;;  %v7929_v47 = vcombine.low %v192_v62, %v196_v46 }
 0x1dd   :  { %3136 = vmatprep.mubr.bf16.mxu0 %v7907_v2  ;;  %v7923_v2 = vcombine.high %v192_v62, %v196_v46  ;;  %v7065_v62 = vld [vmem:[#allocation5 + $0x66c] ss:$16 sps:$4 sm:$0xff]   ;;  %v8696_v46 = vld [vmem:[#allocation28_spill] sm:$0xff] }
 0x1df   :  { %8690 = vst [vmem:[#allocation18_spill] sm:$0xff] %v7923_v2 }
 0x1e3   :  { %3523 = vmatmul.mubr.bf16.gmra.mrb[116].mxu1 %v8688_v44  ;;  %v8693_v44 = vld [vmem:[#allocation25_spill] sm:$0xff] }
 0x1e4   :  { %3137 = vmatmul.mubr.bf16.gmra.mrb[52].mxu0 %v7913_v35  ;;  %3532 = vmatprep.mubr.bf16.mxu1 %v8689_v3  ;;  %v8694_v3 = vld [vmem:[#allocation26_spill] sm:$0xff] }
 0x1e5   :  { %3146 = vmatprep.mubr.bf16.mxu0 %v7915_v30  ;;  %v8695_v30 = vld [vmem:[#allocation27_spill] sm:$0xff] }
 0x1eb   :  { %3533 = vmatmul.mubr.bf16.gmra.mrb[120].mxu1 %v8691_v20  ;;  %v7057_v20 = vld [vmem:[#allocation5 + $0x628] ss:$16 sps:$4 sm:$0xff]  }
 0x1ec   :  { %3147 = vmatmul.mubr.bf16.gmra.mrb[56].mxu0 %v7921_v41  ;;  %3542 = vmatprep.mubr.bf16.mxu1 %v8692_v0  ;;  %v7060_v0 = vld [vmem:[#allocation5 + $0x648] ss:$16 sps:$4 sm:$0xff]  }
 0x1ed   :  { %3156 = vmatprep.mubr.bf16.mxu0 %v7923_v2  ;;  %v7062_v2 = vld [vmem:[#allocation5 + $0x64c] ss:$16 sps:$4 sm:$0xff]  }
 0x1f3   :  { %3543 = vmatmul.mubr.bf16.gmra.mrb[124].mxu1 %v8693_v44  ;;  %v7063_v44 = vld [vmem:[#allocation5 + $0x668] ss:$16 sps:$4 sm:$0xff]  }
 0x1f4   :  { %3157 = vmatmul.mubr.bf16.gmra.mrb[60].mxu0 %v7929_v47  ;;  %3585 = vmatprep.mubr.bf16.mxu1 %v8694_v3  ;;  %v7071_v3 = vld [vmem:[#allocation5 + $0x68c] ss:$16 sps:$4 sm:$0xff]  }
 0x1fb   :  { %3586 = vmatmul.mubr.bf16.vlgmr.msra.gmra.mrb[64].mxu1 %v8695_v30  ;;  %v7069_v30 = vld [vmem:[#allocation5 + $0x688] ss:$16 sps:$4 sm:$0xff]  }
 0x1fc   :  { %3747 = vmatpush1.bf16.msra.mxu1 %v7054_v28  ;;  %3595 = vmatprep.mubr.bf16.mxu1 %v7555_v34  ;;  %v7080_v28 = vld [vmem:[#allocation5 + $0x6ac] ss:$16 sps:$4 sm:$0xff]   ;;  %v7078_v34 = vld [vmem:[#allocation5 + $0x6a8] ss:$16 sps:$4 sm:$0xff]  }
 0x1fd   :  { %3748 = vmatprep.subr.bf16.mxu1 %v7059_v23  ;;  %v7098_v23 = vld [vmem:[#allocation5 + $0x6ec] ss:$16 sps:$4 sm:$0xff]  }
 0x200   :  { %3749 = vmatpush1.bf16.msra.mxu1 %v7057_v20  ;;  %v7096_v20 = vld [vmem:[#allocation5 + $0x6e8] ss:$16 sps:$4 sm:$0xff]  }
 0x201   :  { %3750 = vmatprep.subr.bf16.mxu1 %v7062_v2  ;;  %v7089_v2 = vld [vmem:[#allocation5 + $0x6cc] ss:$16 sps:$4 sm:$0xff]  }
 0x203   :  { %3596 = vmatmul.mubr.bf16.gmra.mrb[68].mxu1 %v7561_v10  ;;  %v7087_v10 = vld [vmem:[#allocation5 + $0x6c8] ss:$16 sps:$4 sm:$0xff]  }
 0x204   :  { %3605 = vmatprep.mubr.bf16.mxu1 %v8696_v46  ;;  %3751 = vmatpush1.bf16.msra.mxu1 %v7060_v0  ;;  %v7107_v0 = vld [vmem:[#allocation5 + $0x70c] ss:$16 sps:$4 sm:$0xff]  }
 0x205   :  { %3752 = vmatprep.subr.bf16.mxu1 %v7065_v62  ;;  %v7114_v62 = vld [vmem:[#allocation5 + $0x728] ss:$16 sps:$4 sm:$0xff]   ;;  %v7125_v46 = vld [vmem:[#allocation5 + $0x74c] ss:$16 sps:$4 sm:$0xff]  }
 0x208   :  { %3753 = vmatpush1.bf16.msra.mxu1 %v7063_v44  ;;  %v7132_v44 = vld [vmem:[#allocation5 + $0x768] ss:$16 sps:$4 sm:$0xff]  }
 0x209   :  { %3754 = vmatprep.subr.bf16.mxu1 %v7071_v3  ;;  %v7140_v3 = vld [vmem:[#allocation5 + $0x78c] ss:$16 sps:$4 sm:$0xff]  }
 0x20b   :  { %3606 = vmatmul.mubr.bf16.gmra.mrb[72].mxu1 %v7569_v55  ;;  %v7105_v55 = vld [vmem:[#allocation5 + $0x708] ss:$16 sps:$4 sm:$0xff]  }
 0x20c   :  { %3615 = vmatprep.mubr.bf16.mxu1 %v7571_v32  ;;  %3755 = vmatpush1.bf16.msra.mxu1 %v7069_v30  ;;  %v7116_v32 = vld [vmem:[#allocation5 + $0x72c] ss:$16 sps:$4 sm:$0xff]   ;;  %v7141_v30 = vld [vmem:[#allocation5 + $0x7a8] ss:$16 sps:$4 sm:$0xff]  }
 0x20d   :  { %3756 = vmatprep.subr.bf16.mxu1 %v7080_v28  ;;  %v7146_v28 = vld [vmem:[#allocation5 + $0x7cc] ss:$16 sps:$4 sm:$0xff]  }
 0x210   :  { %3757 = vmatpush1.bf16.msra.mxu1 %v7078_v34  ;;  %v7147_v34 = vld [vmem:[#allocation5 + $0x7e8] ss:$16 sps:$4 sm:$0xff]  }
 0x211   :  { %3758 = vmatprep.subr.bf16.mxu1 %v7089_v2 }
 0x213   :  { %3616 = vmatmul.mubr.bf16.gmra.mrb[76].mxu1 %v7577_v12  ;;  %v7123_v12 = vld [vmem:[#allocation5 + $0x748] ss:$16 sps:$4 sm:$0xff]  }
 0x214   :  { %3625 = vmatprep.mubr.bf16.mxu1 %v7579_v8  ;;  %3759 = vmatpush1.bf16.msra.mxu1 %v7087_v10  ;;  %v7134_v8 = vld [vmem:[#allocation5 + $0x76c] ss:$16 sps:$4 sm:$0xff]  }
 0x215   :  { %3760 = vmatprep.subr.bf16.mxu1 %v7098_v23 }
 0x218   :  { %3761 = vmatpush1.bf16.msra.mxu1 %v7096_v20 }
 0x219   :  { %3762 = vmatprep.subr.bf16.mxu1 %v7107_v0 }
 0x21b   :  { %3626 = vmatmul.mubr.bf16.gmra.mrb[80].mxu1 %v7585_v53  ;;  %v7138_v53 = vld [vmem:[#allocation5 + $0x788] ss:$16 sps:$4 sm:$0xff]  }
 0x21c   :  { %3635 = vmatprep.mubr.bf16.mxu1 %v7587_v29  ;;  %3763 = vmatpush1.bf16.msra.mxu1 %v7105_v55  ;;  %v7143_v29 = vld [vmem:[#allocation5 + $0x7ac] ss:$16 sps:$4 sm:$0xff]  }
 0x21d   :  { %3764 = vmatprep.subr.bf16.mxu1 %v7116_v32 }
 0x220   :  { %3765 = vmatpush1.bf16.msra.mxu1 %v7114_v62 }
 0x221   :  { %3766 = vmatprep.subr.bf16.mxu1 %v7125_v46 }
 0x223   :  { %3636 = vmatmul.mubr.bf16.gmra.mrb[84].mxu1 %v7593_v45  ;;  %v7144_v45 = vld [vmem:[#allocation5 + $0x7c8] ss:$16 sps:$4 sm:$0xff]  }
 0x224   :  { %3645 = vmatprep.mubr.bf16.mxu1 %v7595_v22  ;;  %3767 = vmatpush1.bf16.msra.mxu1 %v7123_v12  ;;  %v7149_v22 = vld [vmem:[#allocation5 + $0x7ec] ss:$16 sps:$4 sm:$0xff]  }
 0x225   :  { %3768 = vmatprep.subr.bf16.mxu1 %v7134_v8 }
 0x228   :  { %3769 = vmatpush1.bf16.msra.mxu1 %v7132_v44 }
 0x229   :  { %3770 = vmatprep.subr.bf16.mxu1 %v7140_v3  ;;  %v7152_v3 = vld [vmem:[#allocation7 + $0x104] ss:$8 sps:$4 sm:$0xff]  }
 0x22a   :  { %4976 = vmatprep.subr.bf16.mxu0 %v7152_v3 }
 0x22b   :  { %3646 = vmatmul.mubr.bf16.gmra.mrb[88].mxu1 %v7601_v63  ;;  %v455_v63 = vlaneseq }
 0x22c   :  { %3655 = vmatprep.mubr.bf16.mxu1 %v7603_v36  ;;  %3771 = vmatpush1.bf16.msra.mxu1 %v7138_v53 }
 0x22d   :  { %3772 = vmatprep.subr.bf16.mxu1 %v7143_v29  ;;  %v7952_v36 = vshrl.u32 %v455_v63, 7 }
 0x22f   :  { %v7957_v2 = vsub.s32 0, %v7952_v36 }
 0x230   :  { %3773 = vmatpush1.bf16.msra.mxu1 %v7141_v30 }
 0x231   :  { %3774 = vmatprep.subr.bf16.mxu1 %v7146_v28 }
 0x233   :  { %3656 = vmatmul.mubr.bf16.gmra.mrb[92].mxu1 %v7609_v19  ;;  %v453_v19 = vld [vmem:[%s8538_s2] sm:$0xf] }
 0x234   :  { %3665 = vmatprep.mubr.bf16.mxu1 %v7611_v6  ;;  %3775 = vmatpush1.bf16.msra.mxu1 %v7144_v45  ;;  %v461_v6 = vsub.s32 1, %v7952_v36 }
 0x235   :  { %3776 = vmatprep.subr.bf16.mxu1 %v7149_v22 }
 0x238   :  { %3777 = vmatpush1.bf16.msra.mxu1 %v7147_v34 }
 0x23b   :  { %3666 = vmatmul.mubr.bf16.gmra.mrb[96].mxu1 %v7617_v39  ;;  %v7964_v39 = vrot.slane %v453_v19, %v7957_v2 }
 0x23c   :  { %3675 = vmatprep.mubr.bf16.mxu1 %v7619_v50  ;;  %v7968_v50 = vrot.slane %v453_v19, %v461_v6 }
 0x23d   :  { %v2434_v23 = vadd.f32 %v7647_v1, %v7964_v39 }
 0x23e   :  { %v2436_v55 = vadd.f32 %v7651_v14, %v7968_v50  ;;  %v2440_v14 = vadd.f32 %v7657_v58, %v7964_v39  ;;  %v2442_v53 = vadd.f32 %v7659_v4, %v7968_v50  ;;  %v8697_v58 = vld [vmem:[#allocation29_spill] sm:$0xff] }
 0x23f   :  { %v2446_v19 = vadd.f32 %v8697_v58, %v7968_v50 }
 0x243   :  { %3676 = vmatmul.mubr.bf16.gmra.mrb[100].mxu1 %v7625_v17  ;;  %v2430_v17 = vadd.f32 %v7641_v59, %v7964_v39 }
 0x244   :  { %3685 = vmatprep.mubr.bf16.mxu1 %v7627_v26  ;;  %v2432_v26 = vadd.f32 %v7643_v61, %v7968_v50 }
 0x24b   :  { %3686 = vmatmul.mubr.bf16.gmra.mrb[104].mxu1 %v7633_v15 }
 0x24c   :  { %3695 = vmatprep.mubr.bf16.mxu1 %v7635_v27 }
 0x24f   :  { %v3008_v10 = vpop.f32.mrb[0].mxu0 }
 0x250   :  { %v6070_v20 = vadd.f32 %v3008_v10, %v2430_v17  ;;  %v3010_v0 = vpop.f32.mrb[1].mxu0 }
 0x251   :  { %v6072_v32 = vadd.f32 %v3010_v0, %v2432_v26  ;;  %v3012_v62 = vpop.f32.mrb[2].mxu0 }
 0x252   :  { %v4067_v15 = vmul.f32 0.2, %v6070_v20  ;;  %v6074_v46 = vadd.f32 %v3012_v62, %v2434_v23  ;;  %v3014_v27 = vpop.f32.mrb[3].mxu0  ;;  %vm3939_vm0 = vcmp.gt.f32.partialorder %v6070_v20, 0.0  ;;  %v8698_v62 = vld [vmem:[#allocation30_spill] sm:$0xff] }
 0x253   :  { %v4068_v12 = vmul.f32 0.2, %v6072_v32  ;;  %v6076_v59 = vadd.f32 %v3014_v27, %v2436_v55  ;;  %vm3940_vm1 = vcmp.gt.f32.partialorder %v6072_v32, 0.0  ;;  %3696 = vmatmul.mubr.bf16.gmra.mrb[108].mxu1 %v7645_v9  ;;  %v2444_v9 = vadd.f32 %v7663_v43, %v7964_v39 }
 0x254   :  { %vm3943_vm2 = vcmp.gt.f32.partialorder %v6074_v46, 0.0  ;;  %v4071_v61 = vmul.f32 0.2, %v6074_v46  ;;  %3705 = vmatprep.mubr.bf16.mxu1 %v7649_v48  ;;  %v4195_v8 = vsel %vm3939_vm0, %v6070_v20, %v4067_v15  ;;  %v7150_v48 = vld [vmem:[#allocation7 + $0x100] ss:$8 sps:$4 sm:$0xff]   ;;  %v2450_v15 = vadd.f32 %v8698_v62, %v7964_v39 }
 0x255   :  { %vm3944_vm3 = vcmp.gt.f32.partialorder %v6076_v59, 0.0  ;;  %v4072_v1 = vmul.f32 0.2, %v6076_v59  ;;  %v4196_v28 = vsel %vm3940_vm1, %v6072_v32, %v4068_v12  ;;  %v7153_v32 = vld [vmem:[#allocation7 + $0x110] ss:$8 sps:$4 sm:$0xff]  }
 0x256   :  { %v4199_v44 = vsel %vm3943_vm2, %v6074_v46, %v4071_v61  ;;  %v7155_v12 = vld [vmem:[#allocation7 + $0x114] ss:$8 sps:$4 sm:$0xff]  }
 0x257   :  { %v4323_v29 = vpack.c.bf16 %v4199_v44, %v4195_v8  ;;  %v3018_v30 = vpop.f32.mrb[4].mxu0  ;;  %v4200_v45 = vsel %vm3944_vm3, %v6076_v59, %v4072_v1  ;;  %v8699_v59 = vld [vmem:[#allocation31_spill] sm:$0xff] }
 0x258   :  { %v6078_v22 = vadd.f32 %v3018_v30, %v2440_v14  ;;  %v3020_v34 = vpop.f32.mrb[5].mxu0  ;;  %v4324_v63 = vpack.c.bf16 %v4200_v45, %v4196_v28  ;;  %v2452_v61 = vadd.f32 %v8699_v59, %v7968_v50  ;;  %v8701_v30 = vld [vmem:[#allocation33_spill] sm:$0xff] }
 0x259   :  { %v6080_v17 = vadd.f32 %v3020_v34, %v2442_v53  ;;  %v3022_v26 = vpop.f32.mrb[6].mxu0  ;;  %v2456_v28 = vadd.f32 %v8701_v30, %v7968_v50 }
 0x25a   :  { %v4075_v10 = vmul.f32 0.2, %v6078_v22  ;;  %v6082_v23 = vadd.f32 %v3022_v26, %v2444_v9  ;;  %v3024_v4 = vpop.f32.mrb[7].mxu0  ;;  %4815 = vmatprep.mubr.bf16.mxu0 %v4324_v63  ;;  %vm3947_vm4 = vcmp.gt.f32.partialorder %v6078_v22, 0.0  ;;  %v7156_v26 = vld [vmem:[#allocation7 + $0x120] ss:$8 sps:$4 sm:$0xff]  }
 0x25b   :  { %v4076_v20 = vmul.f32 0.2, %v6080_v17  ;;  %v6084_v0 = vadd.f32 %v3024_v4, %v2446_v19  ;;  %4816 = vmatmul.mubr.bf16.vlgmr.msra.gmra.mrb[64].mxu0 %v4323_v29  ;;  %vm3948_vm5 = vcmp.gt.f32.partialorder %v6080_v17, 0.0  ;;  %3706 = vmatmul.mubr.bf16.gmra.mrb[112].mxu1 %v7661_v37  ;;  %v8700_v37 = vld [vmem:[#allocation32_spill] sm:$0xff] }
 0x25c   :  { %vm3951_vm6 = vcmp.gt.f32.partialorder %v6082_v23, 0.0  ;;  %v4079_v43 = vmul.f32 0.2, %v6082_v23  ;;  %4977 = vmatpush1.bf16.msra.mxu0 %v7150_v48  ;;  %3715 = vmatprep.mubr.bf16.mxu1 %v7665_v52  ;;  %v4203_v46 = vsel %vm3947_vm4, %v6078_v22, %v4075_v10  ;;  %v2454_v3 = vadd.f32 %v8700_v37, %v7964_v39  ;;  %v8702_v10 = vld [vmem:[#allocation34_spill] sm:$0xff] }
 0x25d   :  { %vm3952_vm7 = vcmp.gt.f32.partialorder %v6084_v0, 0.0  ;;  %v4080_v55 = vmul.f32 0.2, %v6084_v0  ;;  %v4204_v14 = vsel %vm3948_vm5, %v6080_v17, %v4076_v20  ;;  %4978 = vmatprep.subr.bf16.mxu0 %v7155_v12 }
 0x25e   :  { %v4207_v27 = vsel %vm3951_vm6, %v6082_v23, %v4079_v43  ;;  %v2460_v23 = vadd.f32 %v8702_v10, %v7964_v39  ;;  %v8703_v43 = vld [vmem:[#allocation35_spill] sm:$0xff] }
 0x25f   :  { %v3028_v1 = vpop.f32.mrb[8].mxu0  ;;  %v4208_v8 = vsel %vm3952_vm7, %v6084_v0, %v4080_v55  ;;  %v4327_v44 = vpack.c.bf16 %v4207_v27, %v4203_v46  ;;  %v7158_v0 = vld [vmem:[#allocation7 + $0x124] ss:$8 sps:$4 sm:$0xff]   ;;  %v2462_v55 = vadd.f32 %v8703_v43, %v7968_v50 }
 0x260   :  { %v6086_v53 = vadd.f32 %v3028_v1, %v2450_v15  ;;  %v3030_v29 = vpop.f32.mrb[9].mxu0  ;;  %v4328_v52 = vpack.c.bf16 %v4208_v8, %v4204_v14  ;;  %4979 = vmatpush1.bf16.msra.mxu0 %v7153_v32 }
 0x261   :  { %v6088_v45 = vadd.f32 %v3030_v29, %v2452_v61  ;;  %v3032_v9 = vpop.f32.mrb[10].mxu0  ;;  %4980 = vmatprep.subr.bf16.mxu0 %v7158_v0  ;;  %v8705_v61 = vld [vmem:[#allocation37_spill] sm:$0xff]  ;;  %v8709_v0 = vld [vmem:[#allocation43_spill] sm:$0xff] }
 0x262   :  { %v4083_v22 = vmul.f32 0.2, %v6086_v53  ;;  %v6090_v34 = vadd.f32 %v3032_v9, %v2454_v3  ;;  %v3034_v63 = vpop.f32.mrb[11].mxu0  ;;  %4825 = vmatprep.mubr.bf16.mxu0 %v4328_v52  ;;  %vm3955_vm8 = vcmp.gt.f32.partialorder %v6086_v53, 0.0  ;;  %v2466_v1 = vadd.f32 %v8705_v61, %v7968_v50 }
 0x263   :  { %v4084_v48 = vmul.f32 0.2, %v6088_v45  ;;  %v6092_v58 = vadd.f32 %v3034_v63, %v2456_v28  ;;  %4826 = vmatmul.mubr.bf16.gmra.mrb[68].mxu0 %v4327_v44  ;;  %vm3956_vm9 = vcmp.gt.f32.partialorder %v6088_v45, 0.0  ;;  %3716 = vmatmul.mubr.bf16.gmra.mrb[116].mxu1 %v7677_v51  ;;  %v8704_v51 = vld [vmem:[#allocation36_spill] sm:$0xff]  ;;  %v2476_v43 = vadd.f32 %v8709_v0, %v7968_v50 }
 0x264   :  { %vm3959_vm10 = vcmp.gt.f32.partialorder %v6090_v34, 0.0  ;;  %v4087_v19 = vmul.f32 0.2, %v6090_v34  ;;  %3725 = vmatprep.mubr.bf16.mxu1 %v7681_v7  ;;  %v4211_v4 = vsel %vm3955_vm8, %v6086_v53, %v4083_v22  ;;  %v2464_v27 = vadd.f32 %v8704_v51, %v7964_v39  ;;  %4981 = vmatpush1.bf16.msra.mxu0 %v7156_v26  ;;  %v7159_v28 = vld [vmem:[#allocation7 + $0x130] ss:$8 sps:$4 sm:$0xff]  }
 0x265   :  { %vm3960_vm11 = vcmp.gt.f32.partialorder %v6092_v58, 0.0  ;;  %v4088_v17 = vmul.f32 0.2, %v6092_v58  ;;  %v4212_v62 = vsel %vm3956_vm9, %v6088_v45, %v4084_v48  ;;  %v8706_v45 = vld [vmem:[#allocation38_spill] sm:$0xff]  ;;  %v7161_v63 = vld [vmem:[#allocation7 + $0x134] ss:$8 sps:$4 sm:$0xff]  }
 0x266   :  { %v4215_v20 = vsel %vm3959_vm10, %v6090_v34, %v4087_v19  ;;  %v2470_v9 = vadd.f32 %v8706_v45, %v7964_v39  ;;  %v8707_v48 = vld [vmem:[#allocation39_spill] sm:$0xff]  ;;  %4982 = vmatprep.subr.bf16.mxu0 %v7161_v63 }
 0x267   :  { %v3038_v32 = vpop.f32.mrb[12].mxu0  ;;  %v4216_v15 = vsel %vm3960_vm11, %v6092_v58, %v4088_v17  ;;  %v4331_v46 = vpack.c.bf16 %v4215_v20, %v4211_v4  ;;  %v2472_v58 = vadd.f32 %v8707_v48, %v7968_v50 }
 0x268   :  { %v6094_v12 = vadd.f32 %v3038_v32, %v2460_v23  ;;  %v3040_v59 = vpop.f32.mrb[13].mxu0  ;;  %v4332_v7 = vpack.c.bf16 %v4216_v15, %v4212_v62  ;;  %4983 = vmatpush1.bf16.msra.mxu0 %v7159_v28 }
 0x269   :  { %v6096_v14 = vadd.f32 %v3040_v59, %v2462_v55  ;;  %v3042_v8 = vpop.f32.mrb[14].mxu0  ;;  %v8710_v59 = vld [vmem:[#allocation40_spill] sm:$0xff] }
 0x26a   :  { %v4091_v44 = vmul.f32 0.2, %v6094_v12  ;;  %v6098_v37 = vadd.f32 %v3042_v8, %v2464_v27  ;;  %v3044_v3 = vpop.f32.mrb[15].mxu0  ;;  %4835 = vmatprep.mubr.bf16.mxu0 %v4332_v7  ;;  %vm3963_vm12 = vcmp.gt.f32.partialorder %v6094_v12, 0.0  ;;  %v7162_v7 = vld [vmem:[#allocation7 + $0x140] ss:$8 sps:$4 sm:$0xff]  }
 0x26b   :  { %v4092_v53 = vmul.f32 0.2, %v6096_v14  ;;  %v6100_v29 = vadd.f32 %v3044_v3, %v2466_v1  ;;  %4836 = vmatmul.mubr.bf16.gmra.mrb[72].mxu0 %v4331_v46  ;;  %vm3964_vm13 = vcmp.gt.f32.partialorder %v6096_v14, 0.0  ;;  %3726 = vmatmul.mubr.bf16.gmra.mrb[120].mxu1 %v7693_v33  ;;  %v8708_v33 = vld [vmem:[#allocation41_spill] sm:$0xff]  ;;  %v8711_v1 = vld [vmem:[#allocation42_spill] sm:$0xff]  ;;  %v8712_v8 = vld [vmem:[#allocation44_spill] sm:$0xff] }
 0x26c   :  { %vm3967_vm14 = vcmp.gt.f32.partialorder %v6098_v37, 0.0  ;;  %v4095_v52 = vmul.f32 0.2, %v6098_v37  ;;  %3735 = vmatprep.mubr.bf16.mxu1 %v7697_v21  ;;  %v4219_v22 = vsel %vm3963_vm12, %v6094_v12, %v4091_v44  ;;  %v2474_v23 = vadd.f32 %v8708_v33, %v7964_v39 }
 0x26d   :  { %vm3968_vm15 = vcmp.gt.f32.partialorder %v6100_v29, 0.0  ;;  %v4096_v30 = vmul.f32 0.2, %v6100_v29  ;;  %v4220_v17 = vsel %vm3964_vm13, %v6096_v14, %v4092_v53  ;;  %v7164_v14 = vld [vmem:[#allocation7 + $0x144] ss:$8 sps:$4 sm:$0xff]   ;;  %v2480_v44 = vadd.f32 %v8712_v8, %v7964_v39 }
 0x26e   :  { %v4223_v34 = vsel %vm3967_vm14, %v6098_v37, %v4095_v52  ;;  %v7167_v53 = vld [vmem:[#allocation7 + $0x154] ss:$8 sps:$4 sm:$0xff]   ;;  %4984 = vmatprep.subr.bf16.mxu0 %v7164_v14  ;;  %v8718_v8 = vld [vmem:[#allocation51_spill] sm:$0xff] }
 0x26f   :  { %v3048_v19 = vpop.f32.mrb[16].mxu0  ;;  %v4224_v26 = vsel %vm3968_vm15, %v6100_v29, %v4096_v30  ;;  %v4335_v10 = vpack.c.bf16 %v4223_v34, %v4219_v22  ;;  %v8713_v29 = vld [vmem:[#allocation45_spill] sm:$0xff]  ;;  %v8714_v22 = vld [vmem:[#allocation46_spill] sm:$0xff]  ;;  %4985 = vmatpush1.bf16.msra.mxu0 %v7162_v7 }
 0x270   :  { %v6102_v4 = vadd.f32 %v3048_v19, %v2470_v9  ;;  %v3050_v20 = vpop.f32.mrb[17].mxu0  ;;  %v4336_v21 = vpack.c.bf16 %v4224_v26, %v4220_v17  ;;  %v2482_v52 = vadd.f32 %v8713_v29, %v7968_v50  ;;  %v2484_v34 = vadd.f32 %v8714_v22, %v7964_v39  ;;  %v7165_v19 = vld [vmem:[#allocation7 + $0x150] ss:$8 sps:$4 sm:$0xff]   ;;  %4986 = vmatprep.subr.bf16.mxu0 %v7167_v53 }
 0x271   :  { %v6104_v55 = vadd.f32 %v3050_v20, %v2472_v58  ;;  %v3052_v32 = vpop.f32.mrb[18].mxu0  ;;  %v8715_v17 = vld [vmem:[#allocation48_spill] sm:$0xff] }
 0x272   :  { %v4099_v62 = vmul.f32 0.2, %v6102_v4  ;;  %v6106_v15 = vadd.f32 %v3052_v32, %v2474_v23  ;;  %v3054_v46 = vpop.f32.mrb[19].mxu0  ;;  %4845 = vmatprep.mubr.bf16.mxu0 %v4336_v21  ;;  %vm3971_vm0 = vcmp.gt.f32.partialorder %v6102_v4, 0.0  ;;  %v2486_v26 = vadd.f32 %v8715_v17, %v7968_v50  ;;  %v7170_v23 = vld [vmem:[#allocation7 + $0x164] ss:$8 sps:$4 sm:$0xff]  }
 0x273   :  { %v4100_v51 = vmul.f32 0.2, %v6104_v55  ;;  %v6108_v27 = vadd.f32 %v3054_v46, %v2476_v43  ;;  %4846 = vmatmul.mubr.bf16.gmra.mrb[76].mxu0 %v4335_v10  ;;  %vm3972_vm1 = vcmp.gt.f32.partialorder %v6104_v55, 0.0  ;;  %3736 = vmatmul.mubr.bf16.gmra.mrb[124].mxu1 %v8710_v59  ;;  %v7168_v32 = vld [vmem:[#allocation7 + $0x160] ss:$8 sps:$4 sm:$0xff]   ;;  %v8717_v59 = vld [vmem:[#allocation49_spill] sm:$0xff] }
 0x274   :  { %vm3975_vm2 = vcmp.gt.f32.partialorder %v6106_v15, 0.0  ;;  %v4103_v12 = vmul.f32 0.2, %v6106_v15  ;;  %3778 = vmatprep.mubr.bf16.mxu1 %v8711_v1  ;;  %v4227_v37 = vsel %vm3971_vm0, %v6102_v4, %v4099_v62  ;;  %4987 = vmatpush1.bf16.msra.mxu0 %v7165_v19  ;;  %v7173_v46 = vld [vmem:[#allocation7 + $0x174] ss:$8 sps:$4 sm:$0xff]   ;;  %v2492_v7 = vadd.f32 %v8717_v59, %v7968_v50  ;;  %v8720_v19 = vld [vmem:[#allocation50_spill] sm:$0xff] }
 0x275   :  { %vm3976_vm3 = vcmp.gt.f32.partialorder %v6108_v27, 0.0  ;;  %v4104_v61 = vmul.f32 0.2, %v6108_v27  ;;  %v4228_v28 = vsel %vm3972_vm1, %v6104_v55, %v4100_v51  ;;  %4988 = vmatprep.subr.bf16.mxu0 %v7170_v23  ;;  %v2490_v51 = vadd.f32 %v7737_v5, %v7964_v39  ;;  %v7171_v29 = vld [vmem:[#allocation7 + $0x170] ss:$8 sps:$4 sm:$0xff]  }
 0x276   :  { %v4231_v3 = vsel %vm3975_vm2, %v6106_v15, %v4103_v12  ;;  %v8716_v15 = vld [vmem:[#allocation47_spill] sm:$0xff]  ;;  %v8719_v5 = vld [vmem:[#allocation52_spill] sm:$0xff] }
 0x277   :  { %v3058_v30 = vpop.f32.mrb[20].mxu0  ;;  %v4232_v45 = vsel %vm3976_vm3, %v6108_v27, %v4104_v61  ;;  %v4339_v9 = vpack.c.bf16 %v4231_v3, %v4227_v37  ;;  %v7174_v17 = vld [vmem:[#allocation7 + $0x180] ss:$8 sps:$4 sm:$0xff]  }
 0x278   :  { %v6110_v63 = vadd.f32 %v3058_v30, %v2480_v44  ;;  %v3060_v48 = vpop.f32.mrb[21].mxu0  ;;  %v4340_v58 = vpack.c.bf16 %v4232_v45, %v4228_v28  ;;  %v2494_v44 = vadd.f32 %v8718_v8, %v7964_v39  ;;  %4989 = vmatpush1.bf16.msra.mxu0 %v7168_v32  ;;  %v7176_v45 = vld [vmem:[#allocation7 + $0x184] ss:$8 sps:$4 sm:$0xff]  }
 0x279   :  { %v6112_v10 = vadd.f32 %v3060_v48, %v2482_v52  ;;  %v3062_v33 = vpop.f32.mrb[22].mxu0  ;;  %v2496_v52 = vadd.f32 %v8719_v5, %v7968_v50  ;;  %4990 = vmatprep.subr.bf16.mxu0 %v7173_v46  ;;  %v8725_v5 = vld [vmem:[#allocation56_spill] sm:$0xff] }
 0x27a   :  { %v4107_v4 = vmul.f32 0.2, %v6110_v63  ;;  %v6114_v20 = vadd.f32 %v3062_v33, %v2484_v34  ;;  %v3064_v21 = vpop.f32.mrb[23].mxu0  ;;  %4855 = vmatprep.mubr.bf16.mxu0 %v4340_v58  ;;  %vm3979_vm4 = vcmp.gt.f32.partialorder %v6110_v63, 0.0  ;;  %v2500_v33 = vadd.f32 %v7753_v56, %v7964_v39  ;;  %v8723_v56 = vld [vmem:[#allocation57_spill] sm:$0xff] }
 0x27b   :  { %v4108_v0 = vmul.f32 0.2, %v6112_v10  ;;  %v6116_v43 = vadd.f32 %v3064_v21, %v2486_v26  ;;  %4856 = vmatmul.mubr.bf16.gmra.mrb[80].mxu0 %v4339_v9  ;;  %vm3980_vm5 = vcmp.gt.f32.partialorder %v6112_v10, 0.0  ;;  %3779 = vmatmul.mubr.bf16.vlgmr.msra.gmra.mrb[64].mxu1 %v7725_v11 }
 0x27c   :  { %vm3983_vm6 = vcmp.gt.f32.partialorder %v6114_v20, 0.0  ;;  %v4111_v55 = vmul.f32 0.2, %v6114_v20  ;;  %3788 = vmatprep.mubr.bf16.mxu1 %v8716_v15  ;;  %v4235_v27 = vsel %vm3979_vm4, %v6110_v63, %v4107_v4  ;;  %4991 = vmatpush1.bf16.msra.mxu0 %v7171_v29 }
 0x27d   :  { %vm3984_vm7 = vcmp.gt.f32.partialorder %v6116_v43, 0.0  ;;  %v4112_v62 = vmul.f32 0.2, %v6116_v43  ;;  %v4236_v11 = vsel %vm3980_vm5, %v6112_v10, %v4108_v0  ;;  %4992 = vmatprep.subr.bf16.mxu0 %v7176_v45  ;;  %v7179_v10 = vld [vmem:[#allocation7 + $0x194] ss:$8 sps:$4 sm:$0xff]  }
 0x27e   :  { %v4239_v12 = vsel %vm3983_vm6, %v6114_v20, %v4111_v55  ;;  %v8721_v20 = vld [vmem:[#allocation53_spill] sm:$0xff] }
 0x27f   :  { %v3068_v61 = vpop.f32.mrb[24].mxu0  ;;  %v4240_v1 = vsel %vm3984_vm7, %v6116_v43, %v4112_v62  ;;  %v4343_v14 = vpack.c.bf16 %v4239_v12, %v4235_v27  ;;  %v2502_v21 = vadd.f32 %v8721_v20, %v7968_v50  ;;  %v8722_v62 = vld [vmem:[#allocation55_spill] sm:$0xff]  ;;  %v7177_v27 = vld [vmem:[#allocation7 + $0x190] ss:$8 sps:$4 sm:$0xff]   ;;  %v2506_v12 = vadd.f32 %v8723_v56, %v7968_v50 }
 0x280   :  { %v6118_v37 = vadd.f32 %v3068_v61, %v2490_v51  ;;  %v3070_v3 = vpop.f32.mrb[25].mxu0  ;;  %v4344_v53 = vpack.c.bf16 %v4240_v1, %v4236_v11  ;;  %v2504_v15 = vadd.f32 %v8722_v62, %v7964_v39  ;;  %4993 = vmatpush1.bf16.msra.mxu0 %v7174_v17  ;;  %v7182_v61 = vld [vmem:[#allocation7 + $0x1a4] ss:$8 sps:$4 sm:$0xff]   ;;  %v8730_v56 = vld [vmem:[#allocation61_spill] sm:$0xff] }
 0x281   :  { %v6120_v30 = vadd.f32 %v3070_v3, %v2492_v7  ;;  %v3072_v28 = vpop.f32.mrb[26].mxu0  ;;  %4994 = vmatprep.subr.bf16.mxu0 %v7179_v10  ;;  %v8724_v3 = vld [vmem:[#allocation54_spill] sm:$0xff] }
 0x282   :  { %v4115_v9 = vmul.f32 0.2, %v6118_v37  ;;  %v6122_v22 = vadd.f32 %v3072_v28, %v2494_v44  ;;  %v3074_v34 = vpop.f32.mrb[27].mxu0  ;;  %4865 = vmatprep.mubr.bf16.mxu0 %v4344_v53  ;;  %vm3987_vm8 = vcmp.gt.f32.partialorder %v6118_v37, 0.0  ;;  %v7180_v53 = vld [vmem:[#allocation7 + $0x1a0] ss:$8 sps:$4 sm:$0xff]  }
 0x283   :  { %v4116_v63 = vmul.f32 0.2, %v6120_v30  ;;  %v6124_v48 = vadd.f32 %v3074_v34, %v2496_v52  ;;  %4866 = vmatmul.mubr.bf16.gmra.mrb[84].mxu0 %v4343_v14  ;;  %vm3988_vm9 = vcmp.gt.f32.partialorder %v6120_v30, 0.0  ;;  %3789 = vmatmul.mubr.bf16.gmra.mrb[68].mxu1 %v8720_v19  ;;  %v7185_v52 = vld [vmem:[#allocation7 + $0x1b4] ss:$8 sps:$4 sm:$0xff]  }
 0x284   :  { %vm3991_vm10 = vcmp.gt.f32.partialorder %v6122_v22, 0.0  ;;  %v4119_v58 = vmul.f32 0.2, %v6122_v22  ;;  %3798 = vmatprep.mubr.bf16.mxu1 %v7745_v13  ;;  %v4243_v23 = vsel %vm3987_vm8, %v6118_v37, %v4115_v9  ;;  %4995 = vmatpush1.bf16.msra.mxu0 %v7177_v27  ;;  %v8726_v9 = vld [vmem:[#allocation58_spill] sm:$0xff]  ;;  %v8727_v19 = vld [vmem:[#allocation60_spill] sm:$0xff] }
 0x285   :  { %vm3992_vm11 = vcmp.gt.f32.partialorder %v6124_v48, 0.0  ;;  %v4120_v26 = vmul.f32 0.2, %v6124_v48  ;;  %v4244_v43 = vsel %vm3988_vm9, %v6120_v30, %v4116_v63  ;;  %4996 = vmatprep.subr.bf16.mxu0 %v7182_v61  ;;  %v2510_v30 = vadd.f32 %v7769_v25, %v7964_v39  ;;  %v8728_v25 = vld [vmem:[#allocation62_spill] sm:$0xff] }
 0x286   :  { %v4247_v4 = vsel %vm3991_vm10, %v6122_v22, %v4119_v58  ;;  %v2512_v22 = vadd.f32 %v8726_v9, %v7968_v50  ;;  %v2514_v17 = vadd.f32 %v8727_v19, %v7964_v39 }
 0x287   :  { %v3078_v0 = vpop.f32.mrb[28].mxu0  ;;  %v4248_v55 = vsel %vm3992_vm11, %v6124_v48, %v4120_v26  ;;  %v4347_v32 = vpack.c.bf16 %v4247_v4, %v4243_v23  ;;  %v7183_v23 = vld [vmem:[#allocation7 + $0x1b0] ss:$8 sps:$4 sm:$0xff]   ;;  %v2516_v4 = vadd.f32 %v8728_v25, %v7968_v50 }
 0x288   :  { %v6126_v13 = vadd.f32 %v3078_v0, %v2500_v33  ;;  %v3080_v46 = vpop.f32.mrb[29].mxu0  ;;  %v4348_v51 = vpack.c.bf16 %v4248_v55, %v4244_v43  ;;  %4997 = vmatpush1.bf16.msra.mxu0 %v7180_v53  ;;  %v7188_v0 = vld [vmem:[#allocation7 + $0x1c4] ss:$8 sps:$4 sm:$0xff]   ;;  %v8736_v25 = vld [vmem:[#allocation68_spill] sm:$0xff] }
 0x289   :  { %v6128_v59 = vadd.f32 %v3080_v46, %v2502_v21  ;;  %v3082_v7 = vpop.f32.mrb[30].mxu0  ;;  %4998 = vmatprep.subr.bf16.mxu0 %v7185_v52  ;;  %v8729_v46 = vld [vmem:[#allocation59_spill] sm:$0xff] }
 0x28a   :  { %v4123_v11 = vmul.f32 0.2, %v6126_v13  ;;  %v6130_v1 = vadd.f32 %v3082_v7, %v2504_v15  ;;  %v3084_v14 = vpop.f32.mrb[31].mxu0  ;;  %4875 = vmatprep.mubr.bf16.mxu0 %v4348_v51  ;;  %vm3995_vm12 = vcmp.gt.f32.partialorder %v6126_v13, 0.0  ;;  %v7186_v51 = vld [vmem:[#allocation7 + $0x1c0] ss:$8 sps:$4 sm:$0xff]  }
 0x28b   :  { %v4124_v8 = vmul.f32 0.2, %v6128_v59  ;;  %v6132_v44 = vadd.f32 %v3084_v14, %v2506_v12  ;;  %4876 = vmatmul.mubr.bf16.gmra.mrb[88].mxu0 %v4347_v32  ;;  %vm3996_vm13 = vcmp.gt.f32.partialorder %v6128_v59, 0.0  ;;  %3799 = vmatmul.mubr.bf16.gmra.mrb[72].mxu1 %v8724_v3  ;;  %v7191_v12 = vld [vmem:[#allocation7 + $0x1d4] ss:$8 sps:$4 sm:$0xff]  }
 0x28c   :  { %vm3999_vm14 = vcmp.gt.f32.partialorder %v6130_v1, 0.0  ;;  %v4127_v37 = vmul.f32 0.2, %v6130_v1  ;;  %3808 = vmatprep.mubr.bf16.mxu1 %v8725_v5  ;;  %v4251_v28 = vsel %vm3995_vm12, %v6126_v13, %v4123_v11  ;;  %4999 = vmatpush1.bf16.msra.mxu0 %v7183_v23  ;;  %v8731_v11 = vld [vmem:[#allocation63_spill] sm:$0xff]  ;;  %v8732_v3 = vld [vmem:[#allocation65_spill] sm:$0xff]  ;;  %v8735_v23 = vld [vmem:[#allocation66_spill] sm:$0xff] }
 0x28d   :  { %vm4000_vm15 = vcmp.gt.f32.partialorder %v6132_v44, 0.0  ;;  %v4128_v29 = vmul.f32 0.2, %v6132_v44  ;;  %v4252_v63 = vsel %vm3996_vm13, %v6128_v59, %v4124_v8  ;;  %5000 = vmatprep.subr.bf16.mxu0 %v7188_v0  ;;  %v2520_v59 = vadd.f32 %v7785_v42, %v7964_v39  ;;  %v8733_v42 = vld [vmem:[#allocation67_spill] sm:$0xff] }
 0x28e   :  { %v4255_v45 = vsel %vm3999_vm14, %v6130_v1, %v4127_v37  ;;  %v2522_v1 = vadd.f32 %v8731_v11, %v7968_v50  ;;  %v2524_v53 = vadd.f32 %v8732_v3, %v7964_v39  ;;  %v2532_v0 = vadd.f32 %v7803_v16, %v7968_v50 }
 0x28f   :  { %v3088_v34 = vpop.f32.mrb[32].mxu0  ;;  %v4256_v48 = vsel %vm4000_vm15, %v6132_v44, %v4128_v29  ;;  %v4351_v58 = vpack.c.bf16 %v4255_v45, %v4251_v28  ;;  %v2526_v28 = vadd.f32 %v8733_v42, %v7968_v50 }
 0x290   :  { %v6134_v26 = vadd.f32 %v3088_v34, %v2510_v30  ;;  %v3090_v10 = vpop.f32.mrb[33].mxu0  ;;  %v4352_v33 = vpack.c.bf16 %v4256_v48, %v4252_v63  ;;  %5001 = vmatpush1.bf16.msra.mxu0 %v7186_v51  ;;  %v7189_v30 = vld [vmem:[#allocation7 + $0x1d0] ss:$8 sps:$4 sm:$0xff]  }
 0x291   :  { %v6136_v20 = vadd.f32 %v3090_v10, %v2512_v22  ;;  %v3092_v21 = vpop.f32.mrb[34].mxu0  ;;  %5002 = vmatprep.subr.bf16.mxu0 %v7191_v12  ;;  %v7194_v22 = vld [vmem:[#allocation7 + $0x1e4] ss:$8 sps:$4 sm:$0xff]   ;;  %v7192_v10 = vld [vmem:[#allocation7 + $0x1e0] ss:$8 sps:$4 sm:$0xff]  }
 0x292   :  { %v4131_v43 = vmul.f32 0.2, %v6134_v26  ;;  %v6138_v55 = vadd.f32 %v3092_v21, %v2514_v17  ;;  %v3094_v32 = vpop.f32.mrb[35].mxu0  ;;  %4885 = vmatprep.mubr.bf16.mxu0 %v4352_v33  ;;  %vm4003_vm0 = vcmp.gt.f32.partialorder %v6134_v26, 0.0 }
 0x293   :  { %v4132_v62 = vmul.f32 0.2, %v6136_v20  ;;  %v6140_v15 = vadd.f32 %v3094_v32, %v2516_v4  ;;  %4886 = vmatmul.mubr.bf16.gmra.mrb[92].mxu0 %v4351_v58  ;;  %vm4004_vm1 = vcmp.gt.f32.partialorder %v6136_v20, 0.0  ;;  %3809 = vmatmul.mubr.bf16.gmra.mrb[76].mxu1 %v8729_v46  ;;  %v2530_v4 = vadd.f32 %v8736_v25, %v7964_v39 }
 0x294   :  { %vm4007_vm2 = vcmp.gt.f32.partialorder %v6138_v55, 0.0  ;;  %v4135_v13 = vmul.f32 0.2, %v6138_v55  ;;  %3818 = vmatprep.mubr.bf16.mxu1 %v8730_v56  ;;  %v4259_v7 = vsel %vm4003_vm0, %v6134_v26, %v4131_v43  ;;  %v8734_v26 = vld [vmem:[#allocation64_spill] sm:$0xff]  ;;  %5003 = vmatpush1.bf16.msra.mxu0 %v7189_v30 }
 0x295   :  { %vm4008_vm3 = vcmp.gt.f32.partialorder %v6140_v15, 0.0  ;;  %v4136_v27 = vmul.f32 0.2, %v6140_v15  ;;  %v4260_v8 = vsel %vm4004_vm1, %v6136_v20, %v4132_v62  ;;  %5004 = vmatprep.subr.bf16.mxu0 %v7194_v22 }
 0x296   :  { %v4263_v61 = vsel %vm4007_vm2, %v6138_v55, %v4135_v13 }
 0x297   :  { %v3098_v14 = vpop.f32.mrb[36].mxu0  ;;  %v4264_v44 = vsel %vm4008_vm3, %v6140_v15, %v4136_v27  ;;  %v4355_v37 = vpack.c.bf16 %v4263_v61, %v4259_v7  ;;  %v2534_v15 = vadd.f32 %v7807_v18, %v7964_v39  ;;  %v8737_v27 = vld [vmem:[#allocation71_spill] sm:$0xff] }
 0x298   :  { %v6142_v29 = vadd.f32 %v3098_v14, %v2520_v59  ;;  %v3100_v5 = vpop.f32.mrb[37].mxu0  ;;  %v4356_v52 = vpack.c.bf16 %v4264_v44, %v4260_v8  ;;  %5005 = vmatpush1.bf16.msra.mxu0 %v7192_v10  ;;  %v2536_v56 = vadd.f32 %v8737_v27, %v7968_v50  ;;  %v8738_v14 = vld [vmem:[#allocation69_spill] sm:$0xff]  ;;  %v8739_v44 = vld [vmem:[#allocation70_spill] sm:$0xff] }
 0x299   :  { %v6144_v45 = vadd.f32 %v3100_v5, %v2522_v1  ;;  %v3102_v9 = vpop.f32.mrb[38].mxu0  ;;  %v2542_v5 = vadd.f32 %v7819_v31, %v7968_v50 }
 0x29a   :  { %v4139_v34 = vmul.f32 0.2, %v6142_v29  ;;  %v6146_v63 = vadd.f32 %v3102_v9, %v2524_v53  ;;  %v3104_v48 = vpop.f32.mrb[39].mxu0  ;;  %4895 = vmatprep.mubr.bf16.mxu0 %v4356_v52  ;;  %vm4011_vm4 = vcmp.gt.f32.partialorder %v6142_v29, 0.0 }
 0x29b   :  { %v4140_v58 = vmul.f32 0.2, %v6144_v45  ;;  %v6148_v19 = vadd.f32 %v3104_v48, %v2526_v28  ;;  %4896 = vmatmul.mubr.bf16.gmra.mrb[96].mxu0 %v4355_v37  ;;  %vm4012_vm5 = vcmp.gt.f32.partialorder %v6144_v45, 0.0  ;;  %3819 = vmatmul.mubr.bf16.gmra.mrb[80].mxu1 %v8734_v26  ;;  %v8740_v37 = vld [vmem:[#allocation72_spill] sm:$0xff] }
 0x29c   :  { %vm4015_vm6 = vcmp.gt.f32.partialorder %v6146_v63, 0.0  ;;  %v4143_v17 = vmul.f32 0.2, %v6146_v63  ;;  %3828 = vmatprep.mubr.bf16.mxu1 %v8735_v23  ;;  %v4267_v20 = vsel %vm4011_vm4, %v6142_v29, %v4139_v34  ;;  %v2540_v3 = vadd.f32 %v8740_v37, %v7964_v39 }
 0x29d   :  { %vm4016_vm7 = vcmp.gt.f32.partialorder %v6148_v19, 0.0  ;;  %v4144_v33 = vmul.f32 0.2, %v6148_v19  ;;  %v4268_v55 = vsel %vm4012_vm5, %v6144_v45, %v4140_v58  ;;  %v2544_v45 = vadd.f32 %v7823_v54, %v7964_v39  ;;  %v8742_v54 = vld [vmem:[#allocation73_spill] sm:$0xff] }
 0x29e   :  { %v4271_v21 = vsel %vm4015_vm6, %v6146_v63, %v4143_v17  ;;  %v8741_v63 = vld [vmem:[#allocation75_spill] sm:$0xff] }
 0x29f   :  { %v3108_v43 = vpop.f32.mrb[40].mxu0  ;;  %v4272_v32 = vsel %vm4016_vm7, %v6148_v19, %v4144_v33  ;;  %v4359_v62 = vpack.c.bf16 %v4271_v21, %v4267_v20  ;;  %v2546_v48 = vadd.f32 %v8741_v63, %v7968_v50  ;;  %v8744_v20 = vld [vmem:[#allocation76_spill] sm:$0xff] }
 0x2a0   :  { %v6150_v13 = vadd.f32 %v3108_v43, %v2530_v4  ;;  %v3110_v46 = vpop.f32.mrb[41].mxu0  ;;  %v4360_v51 = vpack.c.bf16 %v4272_v32, %v4268_v55  ;;  %v8743_v4 = vld [vmem:[#allocation74_spill] sm:$0xff]  ;;  %v2550_v21 = vadd.f32 %v8744_v20, %v7964_v39  ;;  %v2552_v55 = vadd.f32 %v7835_v38, %v7968_v50 }
 0x2a1   :  { %v6152_v12 = vadd.f32 %v3110_v46, %v2532_v0  ;;  %v3112_v59 = vpop.f32.mrb[42].mxu0  ;;  %v8745_v46 = vld [vmem:[#allocation78_spill] sm:$0xff] }
 0x2a2   :  { %v4147_v7 = vmul.f32 0.2, %v6150_v13  ;;  %v6154_v61 = vadd.f32 %v3112_v59, %v2534_v15  ;;  %v3114_v11 = vpop.f32.mrb[43].mxu0  ;;  %4905 = vmatprep.mubr.bf16.mxu0 %v4360_v51  ;;  %vm4019_vm8 = vcmp.gt.f32.partialorder %v6150_v13, 0.0  ;;  %v2554_v51 = vadd.f32 %v8745_v46, %v7964_v39  ;;  %v8746_v59 = vld [vmem:[#allocation80_spill] sm:$0xff] }
 0x2a3   :  { %v4148_v16 = vmul.f32 0.2, %v6152_v12  ;;  %v6156_v1 = vadd.f32 %v3114_v11, %v2536_v56  ;;  %4906 = vmatmul.mubr.bf16.gmra.mrb[100].mxu0 %v4359_v62  ;;  %vm4020_vm9 = vcmp.gt.f32.partialorder %v6152_v12, 0.0  ;;  %3829 = vmatmul.mubr.bf16.gmra.mrb[84].mxu1 %v8738_v14  ;;  %v8754_v46 = vld [vmem:[#allocation84_spill] sm:$0xff] }
 0x2a4   :  { %vm4023_vm10 = vcmp.gt.f32.partialorder %v6154_v61, 0.0  ;;  %v4151_v18 = vmul.f32 0.2, %v6154_v61  ;;  %3838 = vmatprep.mubr.bf16.mxu1 %v8739_v44  ;;  %v4275_v53 = vsel %vm4019_vm8, %v6150_v13, %v4147_v7  ;;  %v2556_v7 = vadd.f32 %v8746_v59, %v7968_v50  ;;  %v8747_v44 = vld [vmem:[#allocation77_spill] sm:$0xff] }
 0x2a5   :  { %vm4024_vm11 = vcmp.gt.f32.partialorder %v6156_v1, 0.0  ;;  %v4152_v8 = vmul.f32 0.2, %v6156_v1  ;;  %v4276_v30 = vsel %vm4020_vm9, %v6152_v12, %v4148_v16 }
 0x2a6   :  { %v4279_v29 = vsel %vm4023_vm10, %v6154_v61, %v4151_v18 }
 0x2a7   :  { %v3118_v52 = vpop.f32.mrb[44].mxu0  ;;  %v4280_v42 = vsel %vm4024_vm11, %v6156_v1, %v4152_v8  ;;  %v4363_v28 = vpack.c.bf16 %v4279_v29, %v4275_v53  ;;  %v2560_v53 = vadd.f32 %v7849_v49, %v7964_v39 }
 0x2a8   :  { %v6158_v9 = vadd.f32 %v3118_v52, %v2540_v3  ;;  %v3120_v22 = vpop.f32.mrb[45].mxu0  ;;  %v4364_v34 = vpack.c.bf16 %v4280_v42, %v4276_v30  ;;  %v8748_v3 = vld [vmem:[#allocation79_spill] sm:$0xff]  ;;  %v8749_v52 = vld [vmem:[#allocation10_spill] sm:$0xff] }
 0x2a9   :  { %v6160_v58 = vadd.f32 %v3120_v22, %v2542_v5  ;;  %v3122_v19 = vpop.f32.mrb[46].mxu0  ;;  %v2562_v30 = vadd.f32 %v8749_v52, %v7968_v50  ;;  %v8750_v22 = vld [vmem:[#allocation81_spill] sm:$0xff]  ;;  %v8759_v52 = vld [vmem:[#allocation14_spill] sm:$0xff] }
 0x2aa   :  { %v4155_v17 = vmul.f32 0.2, %v6158_v9  ;;  %v6162_v26 = vadd.f32 %v3122_v19, %v2544_v45  ;;  %v3124_v10 = vpop.f32.mrb[47].mxu0  ;;  %4915 = vmatprep.mubr.bf16.mxu0 %v4364_v34  ;;  %vm4027_vm12 = vcmp.gt.f32.partialorder %v6158_v9, 0.0  ;;  %v2564_v34 = vadd.f32 %v8750_v22, %v7964_v39  ;;  %v8760_v22 = vld [vmem:[#allocation88_spill] sm:$0xff] }
 0x2ab   :  { %v4156_v31 = vmul.f32 0.2, %v6160_v58  ;;  %v6164_v33 = vadd.f32 %v3124_v10, %v2546_v48  ;;  %4916 = vmatmul.mubr.bf16.gmra.mrb[104].mxu0 %v4363_v28  ;;  %vm4028_vm13 = vcmp.gt.f32.partialorder %v6160_v58, 0.0  ;;  %3839 = vmatmul.mubr.bf16.gmra.mrb[88].mxu1 %v8742_v54  ;;  %v2566_v19 = vadd.f32 %v7859_v40, %v7968_v50  ;;  %v8752_v40 = vld [vmem:[#allocation11_spill] sm:$0xff] }
 0x2ac   :  { %vm4031_vm14 = vcmp.gt.f32.partialorder %v6162_v26, 0.0  ;;  %v4159_v23 = vmul.f32 0.2, %v6162_v26  ;;  %3848 = vmatprep.mubr.bf16.mxu1 %v8743_v4  ;;  %v4283_v0 = vsel %vm4027_vm12, %v6158_v9, %v4155_v17  ;;  %v8751_v4 = vld [vmem:[#allocation82_spill] sm:$0xff]  ;;  %v2570_v20 = vadd.f32 %v8752_v40, %v7964_v39  ;;  %v8763_v40 = vld [vmem:[#allocation89_spill] sm:$0xff] }
 0x2ad   :  { %vm4032_vm15 = vcmp.gt.f32.partialorder %v6164_v33, 0.0  ;;  %v4160_v25 = vmul.f32 0.2, %v6164_v33  ;;  %v4284_v62 = vsel %vm4028_vm13, %v6160_v58, %v4156_v31 }
 0x2ae   :  { %v4287_v43 = vsel %vm4031_vm14, %v6162_v26, %v4159_v23 }
 0x2af   :  { %v3128_v32 = vpop.f32.mrb[48].mxu0  ;;  %v4288_v15 = vsel %vm4032_vm15, %v6164_v33, %v4160_v25  ;;  %v4367_v13 = vpack.c.bf16 %v4287_v43, %v4283_v0  ;;  %v8753_v43 = vld [vmem:[#allocation12_spill] sm:$0xff] }
 0x2b0   :  { %v6166_v27 = vadd.f32 %v3128_v32, %v2550_v21  ;;  %v3130_v56 = vpop.f32.mrb[49].mxu0  ;;  %v4368_v12 = vpack.c.bf16 %v4288_v15, %v4284_v62 }
 0x2b1   :  { %v6168_v61 = vadd.f32 %v3130_v56, %v2552_v55  ;;  %v3132_v11 = vpop.f32.mrb[50].mxu0  ;;  %v2572_v55 = vadd.f32 %v8753_v43, %v7968_v50 }
 0x2b2   :  { %v4163_v16 = vmul.f32 0.2, %v6166_v27  ;;  %v6170_v1 = vadd.f32 %v3132_v11, %v2554_v51  ;;  %v3134_v18 = vpop.f32.mrb[51].mxu0  ;;  %4925 = vmatprep.mubr.bf16.mxu0 %v4368_v12  ;;  %vm4035_vm0 = vcmp.gt.f32.partialorder %v6166_v27, 0.0  ;;  %v2574_v51 = vadd.f32 %v8754_v46, %v7964_v39  ;;  %v8755_v12 = vld [vmem:[#allocation86_spill] sm:$0xff]  ;;  %v8766_v46 = vld [vmem:[#allocation17_spill] sm:$0xff] }
 0x2b3   :  { %v4164_v38 = vmul.f32 0.2, %v6168_v61  ;;  %v6172_v14 = vadd.f32 %v3134_v18, %v2556_v7  ;;  %4926 = vmatmul.mubr.bf16.gmra.mrb[108].mxu0 %v4367_v13  ;;  %vm4036_vm1 = vcmp.gt.f32.partialorder %v6168_v61, 0.0  ;;  %3849 = vmatmul.mubr.bf16.gmra.mrb[92].mxu1 %v8747_v44  ;;  %v2576_v59 = vadd.f32 %v8755_v12, %v7968_v50 }
 0x2b4   :  { %vm4039_vm2 = vcmp.gt.f32.partialorder %v6170_v1, 0.0  ;;  %v4167_v8 = vmul.f32 0.2, %v6170_v1  ;;  %3858 = vmatprep.mubr.bf16.mxu1 %v8748_v3  ;;  %v4291_v29 = vsel %vm4035_vm0, %v6166_v27, %v4163_v16  ;;  %v8758_v3 = vld [vmem:[#allocation13_spill] sm:$0xff] }
 0x2b5   :  { %vm4040_vm3 = vcmp.gt.f32.partialorder %v6172_v14, 0.0  ;;  %v4168_v37 = vmul.f32 0.2, %v6172_v14  ;;  %v4292_v28 = vsel %vm4036_vm1, %v6168_v61, %v4164_v38 }
 0x2b6   :  { %v4295_v5 = vsel %vm4039_vm2, %v6170_v1, %v4167_v8  ;;  %v8756_v8 = vld [vmem:[#allocation83_spill] sm:$0xff] }
 0x2b7   :  { %v3138_v42 = vpop.f32.mrb[52].mxu0  ;;  %v4296_v45 = vsel %vm4040_vm3, %v6172_v14, %v4168_v37  ;;  %v4371_v9 = vpack.c.bf16 %v4295_v5, %v4291_v29  ;;  %v8757_v37 = vld [vmem:[#allocation85_spill] sm:$0xff] }
 0x2b8   :  { %v6174_v63 = vadd.f32 %v3138_v42, %v2560_v53  ;;  %v3140_v48 = vpop.f32.mrb[53].mxu0  ;;  %v4372_v58 = vpack.c.bf16 %v4296_v45, %v4292_v28  ;;  %v2580_v53 = vadd.f32 %v8758_v3, %v7964_v39 }
 0x2b9   :  { %v6176_v17 = vadd.f32 %v3140_v48, %v2562_v30  ;;  %v3142_v49 = vpop.f32.mrb[54].mxu0  ;;  %v2582_v30 = vadd.f32 %v8759_v52, %v7968_v50 }
 0x2ba   :  { %v4171_v26 = vmul.f32 0.2, %v6174_v63  ;;  %v6178_v10 = vadd.f32 %v3142_v49, %v2564_v34  ;;  %v3144_v31 = vpop.f32.mrb[55].mxu0  ;;  %4935 = vmatprep.mubr.bf16.mxu0 %v4372_v58  ;;  %vm4043_vm4 = vcmp.gt.f32.partialorder %v6174_v63, 0.0  ;;  %v2584_v34 = vadd.f32 %v8760_v22, %v7964_v39  ;;  %v8762_v39 = vld [vmem:[#allocation87_spill] sm:$0xff] }
 0x2bb   :  { %v4172_v33 = vmul.f32 0.2, %v6176_v17  ;;  %v6180_v23 = vadd.f32 %v3144_v31, %v2566_v19  ;;  %4936 = vmatmul.mubr.bf16.gmra.mrb[112].mxu0 %v4371_v9  ;;  %vm4044_vm5 = vcmp.gt.f32.partialorder %v6176_v17, 0.0  ;;  %3859 = vmatmul.mubr.bf16.gmra.mrb[96].mxu1 %v7853_v24  ;;  %v8761_v19 = vld [vmem:[#allocation90_spill] sm:$0xff] }
 0x2bc   :  { %vm4047_vm6 = vcmp.gt.f32.partialorder %v6178_v10, 0.0  ;;  %v4175_v54 = vmul.f32 0.2, %v6178_v10  ;;  %3868 = vmatprep.mubr.bf16.mxu1 %v8751_v4  ;;  %v4299_v21 = vsel %vm4043_vm4, %v6174_v63, %v4171_v26 }
 0x2bd   :  { %vm4048_vm7 = vcmp.gt.f32.partialorder %v6180_v23, 0.0  ;;  %v4176_v25 = vmul.f32 0.2, %v6180_v23  ;;  %v4300_v62 = vsel %vm4044_vm5, %v6176_v17, %v4172_v33  ;;  %v2586_v17 = vadd.f32 %v8761_v19, %v7968_v50 }
 0x2be   :  { %v4303_v0 = vsel %vm4047_vm6, %v6178_v10, %v4175_v54 }
 0x2bf   :  { %v3148_v32 = vpop.f32.mrb[56].mxu0  ;;  %v4304_v15 = vsel %vm4048_vm7, %v6180_v23, %v4176_v25  ;;  %v4375_v13 = vpack.c.bf16 %v4303_v0, %v4299_v21 }
 0x2c0   :  { %v6182_v24 = vadd.f32 %v3148_v32, %v2570_v20  ;;  %v3150_v27 = vpop.f32.mrb[57].mxu0  ;;  %v4376_v56 = vpack.c.bf16 %v4304_v15, %v4300_v62  ;;  %v8764_v32 = vld [vmem:[#allocation15_spill] sm:$0xff]  ;;  %v7197_v62 = vld [vmem:[#allocation7 + $0x1f4] ss:$8 sps:$4 sm:$0xff]   ;;  %v7195_v15 = vld [vmem:[#allocation7 + $0x1f0] ss:$8 sps:$4 sm:$0xff]  }
 0x2c1   :  { %v6184_v7 = vadd.f32 %v3150_v27, %v2572_v55  ;;  %v3152_v61 = vpop.f32.mrb[58].mxu0  ;;  %5006 = vmatprep.subr.bf16.mxu0 %v7197_v62 }
 0x2c2   :  { %v4179_v11 = vmul.f32 0.2, %v6182_v24  ;;  %v6186_v16 = vadd.f32 %v3152_v61, %v2574_v51  ;;  %v3154_v1 = vpop.f32.mrb[59].mxu0  ;;  %4945 = vmatprep.mubr.bf16.mxu0 %v4376_v56  ;;  %vm4051_vm8 = vcmp.gt.f32.partialorder %v6182_v24, 0.0  ;;  %5007 = vmatpush1.bf16.msra.mxu0 %v7195_v15  ;;  %v8767_v51 = vld [vmem:[#allocation18_spill] sm:$0xff] }
 0x2c3   :  { %v4180_v18 = vmul.f32 0.2, %v6184_v7  ;;  %v6188_v38 = vadd.f32 %v3154_v1, %v2576_v59  ;;  %4946 = vmatmul.mubr.bf16.gmra.mrb[116].mxu0 %v4375_v13  ;;  %vm4052_vm9 = vcmp.gt.f32.partialorder %v6184_v7, 0.0  ;;  %3869 = vmatmul.mubr.bf16.gmra.mrb[100].mxu1 %v8756_v8  ;;  %v8765_v13 = vld [vmem:[#allocation16_spill] sm:$0xff] }
 0x2c4   :  { %vm4055_vm10 = vcmp.gt.f32.partialorder %v6186_v16, 0.0  ;;  %v4183_v14 = vmul.f32 0.2, %v6186_v16  ;;  %3878 = vmatprep.mubr.bf16.mxu1 %v8757_v37  ;;  %v4307_v29 = vsel %vm4051_vm8, %v6182_v24, %v4179_v11  ;;  %v469_v24 = vsub.s32 3, %v7952_v36 }
 0x2c5   :  { %vm4056_vm11 = vcmp.gt.f32.partialorder %v6188_v38, 0.0  ;;  %v4184_v44 = vmul.f32 0.2, %v6188_v38  ;;  %v4308_v28 = vsel %vm4052_vm9, %v6184_v7, %v4180_v18 }
 0x2c6   :  { %v4311_v5 = vsel %vm4055_vm10, %v6186_v16, %v4183_v14 }
 0x2c7   :  { %v3158_v42 = vpop.f32.mrb[60].mxu0  ;;  %v4312_v45 = vsel %vm4056_vm11, %v6188_v38, %v4184_v44  ;;  %v4379_v9 = vpack.c.bf16 %v4311_v5, %v4307_v29 }
 0x2c8   :  { %v6190_v63 = vadd.f32 %v3158_v42, %v2580_v53  ;;  %v3160_v48 = vpop.f32.mrb[61].mxu0  ;;  %v4380_v58 = vpack.c.bf16 %v4312_v45, %v4308_v28 }
 0x2c9   :  { %v6192_v49 = vadd.f32 %v3160_v48, %v2582_v30  ;;  %v3162_v26 = vpop.f32.mrb[62].mxu0 }
 0x2ca   :  { %v4187_v10 = vmul.f32 0.2, %v6190_v63  ;;  %v6194_v31 = vadd.f32 %v3162_v26, %v2584_v34  ;;  %v3164_v33 = vpop.f32.mrb[63].mxu0  ;;  %4955 = vmatprep.mubr.bf16.mxu0 %v4380_v58  ;;  %vm4059_vm12 = vcmp.gt.f32.partialorder %v6190_v63, 0.0 }
 0x2cb   :  { %v4188_v23 = vmul.f32 0.2, %v6192_v49  ;;  %v6196_v54 = vadd.f32 %v3164_v33, %v2586_v17  ;;  %4956 = vmatmul.mubr.bf16.gmra.mrb[120].mxu0 %v4379_v9  ;;  %vm4060_vm13 = vcmp.gt.f32.partialorder %v6192_v49, 0.0  ;;  %3879 = vmatmul.mubr.bf16.gmra.mrb[104].mxu1 %v8762_v39 }
 0x2cc   :  { %vm4063_vm14 = vcmp.gt.f32.partialorder %v6194_v31, 0.0  ;;  %v4191_v25 = vmul.f32 0.2, %v6194_v31  ;;  %3888 = vmatprep.mubr.bf16.mxu1 %v8763_v40  ;;  %v4315_v50 = vsel %vm4059_vm12, %v6190_v63, %v4187_v10 }
 0x2cd   :  { %vm4064_vm15 = vcmp.gt.f32.partialorder %v6196_v54, 0.0  ;;  %v4192_v4 = vmul.f32 0.2, %v6196_v54  ;;  %v4316_v21 = vsel %vm4060_vm13, %v6192_v49, %v4188_v23 }
 0x2ce   :  { %v4319_v20 = vsel %vm4063_vm14, %v6194_v31, %v4191_v25 }
 0x2cf   :  { %v4320_v0 = vsel %vm4064_vm15, %v6196_v54, %v4192_v4  ;;  %v4383_v43 = vpack.c.bf16 %v4319_v20, %v4315_v50 }
 0x2d0   :  { %v4384_v55 = vpack.c.bf16 %v4320_v0, %v4316_v21 }
 0x2d2   :  { %4965 = vmatprep.mubr.bf16.mxu0 %v4384_v55 }
 0x2d3   :  { %4966 = vmatmul.mubr.bf16.gmra.mrb[124].mxu0 %v4383_v43  ;;  %3889 = vmatmul.mubr.bf16.gmra.mrb[108].mxu1 %v7897_v60  ;;  %v465_v60 = vsub.s32 2, %v7952_v36 }
 0x2d4   :  { %3898 = vmatprep.mubr.bf16.mxu1 %v8764_v32 }
 0x2db   :  { %3899 = vmatmul.mubr.bf16.gmra.mrb[112].mxu1 %v7905_v57  ;;  %v7198_v57 = vld [vmem:[%s8538_s2] sm:$0xf] }
 0x2dc   :  { %3908 = vmatprep.mubr.bf16.mxu1 %v8765_v13  ;;  %v8156_v27 = vrot.slane %v7198_v57, %v465_v60 }
 0x2e3   :  { %3909 = vmatmul.mubr.bf16.gmra.mrb[116].mxu1 %v7913_v35  ;;  %v8158_v35 = vrot.slane %v7198_v57, %v469_v24 }
 0x2e4   :  { %3918 = vmatprep.mubr.bf16.mxu1 %v8766_v46 }
 0x2eb   :  { %3919 = vmatmul.mubr.bf16.gmra.mrb[120].mxu1 %v7921_v41 }
 0x2ec   :  { %3928 = vmatprep.mubr.bf16.mxu1 %v8767_v51 }
 0x2f3   :  { %3929 = vmatmul.mubr.bf16.gmra.mrb[124].mxu1 %v7929_v47 }
 0x34e   :  { %v3780_v56 = vpop.f32.mrb[64].mxu1 }
 0x34f   :  { %v6197_v41 = vadd.f32 %v3780_v56, %v8156_v27  ;;  %v3782_v12 = vpop.f32.mrb[65].mxu1 }
 0x350   :  { %v6198_v47 = vadd.f32 %v3782_v12, %v8158_v35  ;;  %v3784_v59 = vpop.f32.mrb[66].mxu1 }
 0x351   :  { %v4069_v7 = vmul.f32 0.2, %v6197_v41  ;;  %v6199_v61 = vadd.f32 %v3784_v59, %v8156_v27  ;;  %v3786_v11 = vpop.f32.mrb[67].mxu1  ;;  %vm3941_vm0 = vcmp.gt.f32.partialorder %v6197_v41, 0.0 }
 0x352   :  { %v4070_v16 = vmul.f32 0.2, %v6198_v47  ;;  %v6200_v1 = vadd.f32 %v3786_v11, %v8158_v35  ;;  %vm3942_vm1 = vcmp.gt.f32.partialorder %v6198_v47, 0.0 }
 0x353   :  { %vm3945_vm2 = vcmp.gt.f32.partialorder %v6199_v61, 0.0  ;;  %v4073_v18 = vmul.f32 0.2, %v6199_v61  ;;  %v4197_v14 = vsel %vm3941_vm0, %v6197_v41, %v4069_v7 }
 0x354   :  { %vm3946_vm3 = vcmp.gt.f32.partialorder %v6200_v1, 0.0  ;;  %v4074_v38 = vmul.f32 0.2, %v6200_v1  ;;  %v4198_v3 = vsel %vm3942_vm1, %v6198_v47, %v4070_v16 }
 0x355   :  { %v4201_v8 = vsel %vm3945_vm2, %v6199_v61, %v4073_v18 }
 0x356   :  { %v4325_v44 = vpack.c.bf16 %v4201_v8, %v4197_v14  ;;  %v3790_v37 = vpop.f32.mrb[68].mxu1  ;;  %v4202_v53 = vsel %vm3946_vm3, %v6200_v1, %v4074_v38 }
 0x357   :  { %v6201_v29 = vadd.f32 %v3790_v37, %v8156_v27  ;;  %v3792_v5 = vpop.f32.mrb[69].mxu1  ;;  %v4326_v52 = vpack.c.bf16 %v4202_v53, %v4198_v3 }
 0x358   :  { %v6202_v30 = vadd.f32 %v3792_v5, %v8158_v35  ;;  %v3794_v42 = vpop.f32.mrb[70].mxu1 }
 0x359   :  { %v4077_v28 = vmul.f32 0.2, %v6201_v29  ;;  %v6203_v45 = vadd.f32 %v3794_v42, %v8156_v27  ;;  %v3796_v9 = vpop.f32.mrb[71].mxu1  ;;  %5008 = vmatprep.mubr.bf16.mxu0 %v4326_v52  ;;  %vm3949_vm4 = vcmp.gt.f32.partialorder %v6201_v29, 0.0 }
 0x35a   :  { %v4078_v22 = vmul.f32 0.2, %v6202_v30  ;;  %v6204_v34 = vadd.f32 %v3796_v9, %v8158_v35  ;;  %5009 = vmatmul.mubr.bf16.vlgmr.msra.gmra.mrb[64].mxu0 %v4325_v44  ;;  %vm3950_vm5 = vcmp.gt.f32.partialorder %v6202_v30, 0.0 }
 0x35b   :  { %vm3953_vm6 = vcmp.gt.f32.partialorder %v6203_v45, 0.0  ;;  %v4081_v63 = vmul.f32 0.2, %v6203_v45  ;;  %v4205_v58 = vsel %vm3949_vm4, %v6201_v29, %v4077_v28 }
 0x35c   :  { %vm3954_vm7 = vcmp.gt.f32.partialorder %v6204_v34, 0.0  ;;  %v4082_v48 = vmul.f32 0.2, %v6204_v34  ;;  %v4206_v49 = vsel %vm3950_vm5, %v6202_v30, %v4078_v22 }
 0x35d   :  { %v4209_v19 = vsel %vm3953_vm6, %v6203_v45, %v4081_v63 }
 0x35e   :  { %v3800_v17 = vpop.f32.mrb[72].mxu1  ;;  %v4210_v26 = vsel %vm3954_vm7, %v6204_v34, %v4082_v48  ;;  %v4329_v10 = vpack.c.bf16 %v4209_v19, %v4205_v58 }
 0x35f   :  { %v6205_v31 = vadd.f32 %v3800_v17, %v8156_v27  ;;  %v3802_v33 = vpop.f32.mrb[73].mxu1  ;;  %v4330_v23 = vpack.c.bf16 %v4210_v26, %v4206_v49 }
 0x360   :  { %v6206_v54 = vadd.f32 %v3802_v33, %v8158_v35  ;;  %v3804_v25 = vpop.f32.mrb[74].mxu1 }
 0x361   :  { %v4085_v39 = vmul.f32 0.2, %v6205_v31  ;;  %v6207_v4 = vadd.f32 %v3804_v25, %v8156_v27  ;;  %v3806_v40 = vpop.f32.mrb[75].mxu1  ;;  %5018 = vmatprep.mubr.bf16.mxu0 %v4330_v23  ;;  %vm3957_vm8 = vcmp.gt.f32.partialorder %v6205_v31, 0.0 }
 0x362   :  { %v4086_v50 = vmul.f32 0.2, %v6206_v54  ;;  %v6208_v20 = vadd.f32 %v3806_v40, %v8158_v35  ;;  %5019 = vmatmul.mubr.bf16.gmra.mrb[68].mxu0 %v4329_v10  ;;  %vm3958_vm9 = vcmp.gt.f32.partialorder %v6206_v54, 0.0 }
 0x363   :  { %vm3961_vm10 = vcmp.gt.f32.partialorder %v6207_v4, 0.0  ;;  %v4089_v21 = vmul.f32 0.2, %v6207_v4  ;;  %v4213_v43 = vsel %vm3957_vm8, %v6205_v31, %v4085_v39 }
 0x364   :  { %vm3962_vm11 = vcmp.gt.f32.partialorder %v6208_v20, 0.0  ;;  %v4090_v0 = vmul.f32 0.2, %v6208_v20  ;;  %v4214_v62 = vsel %vm3958_vm9, %v6206_v54, %v4086_v50 }
 0x365   :  { %v4217_v55 = vsel %vm3961_vm10, %v6207_v4, %v4089_v21 }
 0x366   :  { %v3810_v32 = vpop.f32.mrb[76].mxu1  ;;  %v4218_v15 = vsel %vm3962_vm11, %v6208_v20, %v4090_v0  ;;  %v4333_v13 = vpack.c.bf16 %v4217_v55, %v4213_v43 }
 0x367   :  { %v6209_v46 = vadd.f32 %v3810_v32, %v8156_v27  ;;  %v3812_v51 = vpop.f32.mrb[77].mxu1  ;;  %v4334_v24 = vpack.c.bf16 %v4218_v15, %v4214_v62 }
 0x368   :  { %v6210_v57 = vadd.f32 %v3812_v51, %v8158_v35  ;;  %v3814_v56 = vpop.f32.mrb[78].mxu1 }
 0x369   :  { %v4093_v41 = vmul.f32 0.2, %v6209_v46  ;;  %v6211_v12 = vadd.f32 %v3814_v56, %v8156_v27  ;;  %v3816_v47 = vpop.f32.mrb[79].mxu1  ;;  %5028 = vmatprep.mubr.bf16.mxu0 %v4334_v24  ;;  %vm3965_vm12 = vcmp.gt.f32.partialorder %v6209_v46, 0.0 }
 0x36a   :  { %v4094_v59 = vmul.f32 0.2, %v6210_v57  ;;  %v6212_v7 = vadd.f32 %v3816_v47, %v8158_v35  ;;  %5029 = vmatmul.mubr.bf16.gmra.mrb[72].mxu0 %v4333_v13  ;;  %vm3966_vm13 = vcmp.gt.f32.partialorder %v6210_v57, 0.0 }
 0x36b   :  { %vm3969_vm14 = vcmp.gt.f32.partialorder %v6211_v12, 0.0  ;;  %v4097_v61 = vmul.f32 0.2, %v6211_v12  ;;  %v4221_v16 = vsel %vm3965_vm12, %v6209_v46, %v4093_v41 }
 0x36c   :  { %vm3970_vm15 = vcmp.gt.f32.partialorder %v6212_v7, 0.0  ;;  %v4098_v11 = vmul.f32 0.2, %v6212_v7  ;;  %v4222_v38 = vsel %vm3966_vm13, %v6210_v57, %v4094_v59 }
 0x36d   :  { %v4225_v1 = vsel %vm3969_vm14, %v6211_v12, %v4097_v61 }
 0x36e   :  { %v3820_v18 = vpop.f32.mrb[80].mxu1  ;;  %v4226_v14 = vsel %vm3970_vm15, %v6212_v7, %v4098_v11  ;;  %v4337_v8 = vpack.c.bf16 %v4225_v1, %v4221_v16 }
 0x36f   :  { %v6213_v44 = vadd.f32 %v3820_v18, %v8156_v27  ;;  %v3822_v37 = vpop.f32.mrb[81].mxu1  ;;  %v4338_v3 = vpack.c.bf16 %v4226_v14, %v4222_v38 }
 0x370   :  { %v6214_v53 = vadd.f32 %v3822_v37, %v8158_v35  ;;  %v3824_v29 = vpop.f32.mrb[82].mxu1 }
 0x371   :  { %v4101_v5 = vmul.f32 0.2, %v6213_v44  ;;  %v6215_v52 = vadd.f32 %v3824_v29, %v8156_v27  ;;  %v3826_v30 = vpop.f32.mrb[83].mxu1  ;;  %5038 = vmatprep.mubr.bf16.mxu0 %v4338_v3  ;;  %vm3973_vm0 = vcmp.gt.f32.partialorder %v6213_v44, 0.0 }
 0x372   :  { %v4102_v42 = vmul.f32 0.2, %v6214_v53  ;;  %v6216_v28 = vadd.f32 %v3826_v30, %v8158_v35  ;;  %5039 = vmatmul.mubr.bf16.gmra.mrb[76].mxu0 %v4337_v8  ;;  %vm3974_vm1 = vcmp.gt.f32.partialorder %v6214_v53, 0.0 }
 0x373   :  { %vm3977_vm2 = vcmp.gt.f32.partialorder %v6215_v52, 0.0  ;;  %v4105_v45 = vmul.f32 0.2, %v6215_v52  ;;  %v4229_v22 = vsel %vm3973_vm0, %v6213_v44, %v4101_v5 }
 0x374   :  { %vm3978_vm3 = vcmp.gt.f32.partialorder %v6216_v28, 0.0  ;;  %v4106_v9 = vmul.f32 0.2, %v6216_v28  ;;  %v4230_v48 = vsel %vm3974_vm1, %v6214_v53, %v4102_v42 }
 0x375   :  { %v4233_v34 = vsel %vm3977_vm2, %v6215_v52, %v4105_v45 }
 0x376   :  { %v3830_v63 = vpop.f32.mrb[84].mxu1  ;;  %v4234_v58 = vsel %vm3978_vm3, %v6216_v28, %v4106_v9  ;;  %v4341_v19 = vpack.c.bf16 %v4233_v34, %v4229_v22 }
 0x377   :  { %v6217_v17 = vadd.f32 %v3830_v63, %v8156_v27  ;;  %v3832_v49 = vpop.f32.mrb[85].mxu1  ;;  %v4342_v26 = vpack.c.bf16 %v4234_v58, %v4230_v48 }
 0x378   :  { %v6218_v10 = vadd.f32 %v3832_v49, %v8158_v35  ;;  %v3834_v31 = vpop.f32.mrb[86].mxu1 }
 0x379   :  { %v4109_v33 = vmul.f32 0.2, %v6217_v17  ;;  %v6219_v23 = vadd.f32 %v3834_v31, %v8156_v27  ;;  %v3836_v54 = vpop.f32.mrb[87].mxu1  ;;  %5048 = vmatprep.mubr.bf16.mxu0 %v4342_v26  ;;  %vm3981_vm4 = vcmp.gt.f32.partialorder %v6217_v17, 0.0 }
 0x37a   :  { %v4110_v25 = vmul.f32 0.2, %v6218_v10  ;;  %v6220_v39 = vadd.f32 %v3836_v54, %v8158_v35  ;;  %5049 = vmatmul.mubr.bf16.gmra.mrb[80].mxu0 %v4341_v19  ;;  %vm3982_vm5 = vcmp.gt.f32.partialorder %v6218_v10, 0.0 }
 0x37b   :  { %vm3985_vm6 = vcmp.gt.f32.partialorder %v6219_v23, 0.0  ;;  %v4113_v4 = vmul.f32 0.2, %v6219_v23  ;;  %v4237_v50 = vsel %vm3981_vm4, %v6217_v17, %v4109_v33 }
 0x37c   :  { %vm3986_vm7 = vcmp.gt.f32.partialorder %v6220_v39, 0.0  ;;  %v4114_v40 = vmul.f32 0.2, %v6220_v39  ;;  %v4238_v0 = vsel %vm3982_vm5, %v6218_v10, %v4110_v25 }
 0x37d   :  { %v4241_v20 = vsel %vm3985_vm6, %v6219_v23, %v4113_v4 }
 0x37e   :  { %v3840_v21 = vpop.f32.mrb[88].mxu1  ;;  %v4242_v43 = vsel %vm3986_vm7, %v6220_v39, %v4114_v40  ;;  %v4345_v55 = vpack.c.bf16 %v4241_v20, %v4237_v50 }
 0x37f   :  { %v6221_v32 = vadd.f32 %v3840_v21, %v8156_v27  ;;  %v3842_v62 = vpop.f32.mrb[89].mxu1  ;;  %v4346_v15 = vpack.c.bf16 %v4242_v43, %v4238_v0 }
 0x380   :  { %v6222_v13 = vadd.f32 %v3842_v62, %v8158_v35  ;;  %v3844_v46 = vpop.f32.mrb[90].mxu1 }
 0x381   :  { %v4117_v51 = vmul.f32 0.2, %v6221_v32  ;;  %v6223_v24 = vadd.f32 %v3844_v46, %v8156_v27  ;;  %v3846_v57 = vpop.f32.mrb[91].mxu1  ;;  %5058 = vmatprep.mubr.bf16.mxu0 %v4346_v15  ;;  %vm3989_vm8 = vcmp.gt.f32.partialorder %v6221_v32, 0.0 }
 0x382   :  { %v4118_v56 = vmul.f32 0.2, %v6222_v13  ;;  %v6224_v41 = vadd.f32 %v3846_v57, %v8158_v35  ;;  %5059 = vmatmul.mubr.bf16.gmra.mrb[84].mxu0 %v4345_v55  ;;  %vm3990_vm9 = vcmp.gt.f32.partialorder %v6222_v13, 0.0 }
 0x383   :  { %vm3993_vm10 = vcmp.gt.f32.partialorder %v6223_v24, 0.0  ;;  %v4121_v12 = vmul.f32 0.2, %v6223_v24  ;;  %v4245_v59 = vsel %vm3989_vm8, %v6221_v32, %v4117_v51 }
 0x384   :  { %vm3994_vm11 = vcmp.gt.f32.partialorder %v6224_v41, 0.0  ;;  %v4122_v47 = vmul.f32 0.2, %v6224_v41  ;;  %v4246_v11 = vsel %vm3990_vm9, %v6222_v13, %v4118_v56 }
 0x385   :  { %v4249_v7 = vsel %vm3993_vm10, %v6223_v24, %v4121_v12 }
 0x386   :  { %v3850_v61 = vpop.f32.mrb[92].mxu1  ;;  %v4250_v16 = vsel %vm3994_vm11, %v6224_v41, %v4122_v47  ;;  %v4349_v1 = vpack.c.bf16 %v4249_v7, %v4245_v59 }
 0x387   :  { %v6225_v18 = vadd.f32 %v3850_v61, %v8156_v27  ;;  %v3852_v38 = vpop.f32.mrb[93].mxu1  ;;  %v4350_v14 = vpack.c.bf16 %v4250_v16, %v4246_v11 }
 0x388   :  { %v6226_v8 = vadd.f32 %v3852_v38, %v8158_v35  ;;  %v3854_v44 = vpop.f32.mrb[94].mxu1 }
 0x389   :  { %v4125_v37 = vmul.f32 0.2, %v6225_v18  ;;  %v6227_v3 = vadd.f32 %v3854_v44, %v8156_v27  ;;  %v3856_v53 = vpop.f32.mrb[95].mxu1  ;;  %5068 = vmatprep.mubr.bf16.mxu0 %v4350_v14  ;;  %vm3997_vm12 = vcmp.gt.f32.partialorder %v6225_v18, 0.0 }
 0x38a   :  { %v4126_v29 = vmul.f32 0.2, %v6226_v8  ;;  %v6228_v5 = vadd.f32 %v3856_v53, %v8158_v35  ;;  %5069 = vmatmul.mubr.bf16.gmra.mrb[88].mxu0 %v4349_v1  ;;  %vm3998_vm13 = vcmp.gt.f32.partialorder %v6226_v8, 0.0 }
 0x38b   :  { %vm4001_vm14 = vcmp.gt.f32.partialorder %v6227_v3, 0.0  ;;  %v4129_v52 = vmul.f32 0.2, %v6227_v3  ;;  %v4253_v42 = vsel %vm3997_vm12, %v6225_v18, %v4125_v37 }
 0x38c   :  { %vm4002_vm15 = vcmp.gt.f32.partialorder %v6228_v5, 0.0  ;;  %v4130_v30 = vmul.f32 0.2, %v6228_v5  ;;  %v4254_v9 = vsel %vm3998_vm13, %v6226_v8, %v4126_v29 }
 0x38d   :  { %v4257_v28 = vsel %vm4001_vm14, %v6227_v3, %v4129_v52 }
 0x38e   :  { %v3860_v45 = vpop.f32.mrb[96].mxu1  ;;  %v4258_v22 = vsel %vm4002_vm15, %v6228_v5, %v4130_v30  ;;  %v4353_v34 = vpack.c.bf16 %v4257_v28, %v4253_v42 }
 0x38f   :  { %v6229_v63 = vadd.f32 %v3860_v45, %v8156_v27  ;;  %v3862_v48 = vpop.f32.mrb[97].mxu1  ;;  %v4354_v58 = vpack.c.bf16 %v4258_v22, %v4254_v9 }
 0x390   :  { %v6230_v19 = vadd.f32 %v3862_v48, %v8158_v35  ;;  %v3864_v17 = vpop.f32.mrb[98].mxu1 }
 0x391   :  { %v4133_v49 = vmul.f32 0.2, %v6229_v63  ;;  %v6231_v26 = vadd.f32 %v3864_v17, %v8156_v27  ;;  %v3866_v10 = vpop.f32.mrb[99].mxu1  ;;  %5078 = vmatprep.mubr.bf16.mxu0 %v4354_v58  ;;  %vm4005_vm0 = vcmp.gt.f32.partialorder %v6229_v63, 0.0 }
 0x392   :  { %v4134_v31 = vmul.f32 0.2, %v6230_v19  ;;  %v6232_v33 = vadd.f32 %v3866_v10, %v8158_v35  ;;  %5079 = vmatmul.mubr.bf16.gmra.mrb[92].mxu0 %v4353_v34  ;;  %vm4006_vm1 = vcmp.gt.f32.partialorder %v6230_v19, 0.0 }
 0x393   :  { %vm4009_vm2 = vcmp.gt.f32.partialorder %v6231_v26, 0.0  ;;  %v4137_v23 = vmul.f32 0.2, %v6231_v26  ;;  %v4261_v25 = vsel %vm4005_vm0, %v6229_v63, %v4133_v49 }
 0x394   :  { %vm4010_vm3 = vcmp.gt.f32.partialorder %v6232_v33, 0.0  ;;  %v4138_v54 = vmul.f32 0.2, %v6232_v33  ;;  %v4262_v40 = vsel %vm4006_vm1, %v6230_v19, %v4134_v31 }
 0x395   :  { %v4265_v39 = vsel %vm4009_vm2, %v6231_v26, %v4137_v23 }
 0x396   :  { %v3870_v4 = vpop.f32.mrb[100].mxu1  ;;  %v4266_v50 = vsel %vm4010_vm3, %v6232_v33, %v4138_v54  ;;  %v4357_v20 = vpack.c.bf16 %v4265_v39, %v4261_v25 }
 0x397   :  { %v6233_v21 = vadd.f32 %v3870_v4, %v8156_v27  ;;  %v3872_v0 = vpop.f32.mrb[101].mxu1  ;;  %v4358_v43 = vpack.c.bf16 %v4266_v50, %v4262_v40 }
 0x398   :  { %v6234_v55 = vadd.f32 %v3872_v0, %v8158_v35  ;;  %v3874_v32 = vpop.f32.mrb[102].mxu1 }
 0x399   :  { %v4141_v62 = vmul.f32 0.2, %v6233_v21  ;;  %v6235_v15 = vadd.f32 %v3874_v32, %v8156_v27  ;;  %v3876_v13 = vpop.f32.mrb[103].mxu1  ;;  %5088 = vmatprep.mubr.bf16.mxu0 %v4358_v43  ;;  %vm4013_vm4 = vcmp.gt.f32.partialorder %v6233_v21, 0.0 }
 0x39a   :  { %v4142_v46 = vmul.f32 0.2, %v6234_v55  ;;  %v6236_v51 = vadd.f32 %v3876_v13, %v8158_v35  ;;  %5089 = vmatmul.mubr.bf16.gmra.mrb[96].mxu0 %v4357_v20  ;;  %vm4014_vm5 = vcmp.gt.f32.partialorder %v6234_v55, 0.0 }
 0x39b   :  { %vm4017_vm6 = vcmp.gt.f32.partialorder %v6235_v15, 0.0  ;;  %v4145_v24 = vmul.f32 0.2, %v6235_v15  ;;  %v4269_v56 = vsel %vm4013_vm4, %v6233_v21, %v4141_v62 }
 0x39c   :  { %vm4018_vm7 = vcmp.gt.f32.partialorder %v6236_v51, 0.0  ;;  %v4146_v57 = vmul.f32 0.2, %v6236_v51  ;;  %v4270_v47 = vsel %vm4014_vm5, %v6234_v55, %v4142_v46 }
 0x39d   :  { %v4273_v41 = vsel %vm4017_vm6, %v6235_v15, %v4145_v24 }
 0x39e   :  { %v3880_v12 = vpop.f32.mrb[104].mxu1  ;;  %v4274_v59 = vsel %vm4018_vm7, %v6236_v51, %v4146_v57  ;;  %v4361_v7 = vpack.c.bf16 %v4273_v41, %v4269_v56 }
 0x39f   :  { %v6237_v61 = vadd.f32 %v3880_v12, %v8156_v27  ;;  %v3882_v11 = vpop.f32.mrb[105].mxu1  ;;  %v4362_v16 = vpack.c.bf16 %v4274_v59, %v4270_v47 }
 0x3a0   :  { %v6238_v1 = vadd.f32 %v3882_v11, %v8158_v35  ;;  %v3884_v18 = vpop.f32.mrb[106].mxu1 }
 0x3a1   :  { %v4149_v38 = vmul.f32 0.2, %v6237_v61  ;;  %v6239_v14 = vadd.f32 %v3884_v18, %v8156_v27  ;;  %v3886_v8 = vpop.f32.mrb[107].mxu1  ;;  %5098 = vmatprep.mubr.bf16.mxu0 %v4362_v16  ;;  %vm4021_vm8 = vcmp.gt.f32.partialorder %v6237_v61, 0.0 }
 0x3a2   :  { %v4150_v44 = vmul.f32 0.2, %v6238_v1  ;;  %v6240_v37 = vadd.f32 %v3886_v8, %v8158_v35  ;;  %5099 = vmatmul.mubr.bf16.gmra.mrb[100].mxu0 %v4361_v7  ;;  %vm4022_vm9 = vcmp.gt.f32.partialorder %v6238_v1, 0.0 }
 0x3a3   :  { %vm4025_vm10 = vcmp.gt.f32.partialorder %v6239_v14, 0.0  ;;  %v4153_v3 = vmul.f32 0.2, %v6239_v14  ;;  %v4277_v29 = vsel %vm4021_vm8, %v6237_v61, %v4149_v38 }
 0x3a4   :  { %vm4026_vm11 = vcmp.gt.f32.partialorder %v6240_v37, 0.0  ;;  %v4154_v53 = vmul.f32 0.2, %v6240_v37  ;;  %v4278_v30 = vsel %vm4022_vm9, %v6238_v1, %v4150_v44 }
 0x3a5   :  { %v4281_v5 = vsel %vm4025_vm10, %v6239_v14, %v4153_v3 }
 0x3a6   :  { %v3890_v52 = vpop.f32.mrb[108].mxu1  ;;  %v4282_v42 = vsel %vm4026_vm11, %v6240_v37, %v4154_v53  ;;  %v4365_v28 = vpack.c.bf16 %v4281_v5, %v4277_v29 }
 0x3a7   :  { %v6241_v45 = vadd.f32 %v3890_v52, %v8156_v27  ;;  %v3892_v9 = vpop.f32.mrb[109].mxu1  ;;  %v4366_v22 = vpack.c.bf16 %v4282_v42, %v4278_v30 }
 0x3a8   :  { %v6242_v34 = vadd.f32 %v3892_v9, %v8158_v35  ;;  %v3894_v63 = vpop.f32.mrb[110].mxu1 }
 0x3a9   :  { %v4157_v48 = vmul.f32 0.2, %v6241_v45  ;;  %v6243_v58 = vadd.f32 %v3894_v63, %v8156_v27  ;;  %v3896_v19 = vpop.f32.mrb[111].mxu1  ;;  %5108 = vmatprep.mubr.bf16.mxu0 %v4366_v22  ;;  %vm4029_vm12 = vcmp.gt.f32.partialorder %v6241_v45, 0.0 }
 0x3aa   :  { %v4158_v17 = vmul.f32 0.2, %v6242_v34  ;;  %v6244_v49 = vadd.f32 %v3896_v19, %v8158_v35  ;;  %5109 = vmatmul.mubr.bf16.gmra.mrb[104].mxu0 %v4365_v28  ;;  %vm4030_vm13 = vcmp.gt.f32.partialorder %v6242_v34, 0.0 }
 0x3ab   :  { %vm4033_vm14 = vcmp.gt.f32.partialorder %v6243_v58, 0.0  ;;  %v4161_v26 = vmul.f32 0.2, %v6243_v58  ;;  %v4285_v31 = vsel %vm4029_vm12, %v6241_v45, %v4157_v48 }
 0x3ac   :  { %vm4034_vm15 = vcmp.gt.f32.partialorder %v6244_v49, 0.0  ;;  %v4162_v10 = vmul.f32 0.2, %v6244_v49  ;;  %v4286_v54 = vsel %vm4030_vm13, %v6242_v34, %v4158_v17 }
 0x3ad   :  { %v4289_v33 = vsel %vm4033_vm14, %v6243_v58, %v4161_v26 }
 0x3ae   :  { %v3900_v23 = vpop.f32.mrb[112].mxu1  ;;  %v4290_v25 = vsel %vm4034_vm15, %v6244_v49, %v4162_v10  ;;  %v4369_v39 = vpack.c.bf16 %v4289_v33, %v4285_v31 }
 0x3af   :  { %v6245_v4 = vadd.f32 %v3900_v23, %v8156_v27  ;;  %v3902_v40 = vpop.f32.mrb[113].mxu1  ;;  %v4370_v50 = vpack.c.bf16 %v4290_v25, %v4286_v54 }
 0x3b0   :  { %v6246_v20 = vadd.f32 %v3902_v40, %v8158_v35  ;;  %v3904_v21 = vpop.f32.mrb[114].mxu1 }
 0x3b1   :  { %v4165_v0 = vmul.f32 0.2, %v6245_v4  ;;  %v6247_v43 = vadd.f32 %v3904_v21, %v8156_v27  ;;  %v3906_v55 = vpop.f32.mrb[115].mxu1  ;;  %5118 = vmatprep.mubr.bf16.mxu0 %v4370_v50  ;;  %vm4037_vm0 = vcmp.gt.f32.partialorder %v6245_v4, 0.0 }
 0x3b2   :  { %v4166_v32 = vmul.f32 0.2, %v6246_v20  ;;  %v6248_v62 = vadd.f32 %v3906_v55, %v8158_v35  ;;  %5119 = vmatmul.mubr.bf16.gmra.mrb[108].mxu0 %v4369_v39  ;;  %vm4038_vm1 = vcmp.gt.f32.partialorder %v6246_v20, 0.0 }
 0x3b3   :  { %vm4041_vm2 = vcmp.gt.f32.partialorder %v6247_v43, 0.0  ;;  %v4169_v15 = vmul.f32 0.2, %v6247_v43  ;;  %v4293_v46 = vsel %vm4037_vm0, %v6245_v4, %v4165_v0 }
 0x3b4   :  { %vm4042_vm3 = vcmp.gt.f32.partialorder %v6248_v62, 0.0  ;;  %v4170_v13 = vmul.f32 0.2, %v6248_v62  ;;  %v4294_v57 = vsel %vm4038_vm1, %v6246_v20, %v4166_v32 }
 0x3b5   :  { %v4297_v51 = vsel %vm4041_vm2, %v6247_v43, %v4169_v15 }
 0x3b6   :  { %v3910_v24 = vpop.f32.mrb[116].mxu1  ;;  %v4298_v56 = vsel %vm4042_vm3, %v6248_v62, %v4170_v13  ;;  %v4373_v41 = vpack.c.bf16 %v4297_v51, %v4293_v46 }
 0x3b7   :  { %v6249_v12 = vadd.f32 %v3910_v24, %v8156_v27  ;;  %v3912_v47 = vpop.f32.mrb[117].mxu1  ;;  %v4374_v59 = vpack.c.bf16 %v4298_v56, %v4294_v57 }
 0x3b8   :  { %v6250_v7 = vadd.f32 %v3912_v47, %v8158_v35  ;;  %v3914_v61 = vpop.f32.mrb[118].mxu1 }
 0x3b9   :  { %v4173_v11 = vmul.f32 0.2, %v6249_v12  ;;  %v6251_v16 = vadd.f32 %v3914_v61, %v8156_v27  ;;  %v3916_v1 = vpop.f32.mrb[119].mxu1  ;;  %5128 = vmatprep.mubr.bf16.mxu0 %v4374_v59  ;;  %vm4045_vm4 = vcmp.gt.f32.partialorder %v6249_v12, 0.0 }
 0x3ba   :  { %v4174_v18 = vmul.f32 0.2, %v6250_v7  ;;  %v6252_v38 = vadd.f32 %v3916_v1, %v8158_v35  ;;  %5129 = vmatmul.mubr.bf16.gmra.mrb[112].mxu0 %v4373_v41  ;;  %vm4046_vm5 = vcmp.gt.f32.partialorder %v6250_v7, 0.0 }
 0x3bb   :  { %vm4049_vm6 = vcmp.gt.f32.partialorder %v6251_v16, 0.0  ;;  %v4177_v14 = vmul.f32 0.2, %v6251_v16  ;;  %v4301_v44 = vsel %vm4045_vm4, %v6249_v12, %v4173_v11 }
 0x3bc   :  { %vm4050_vm7 = vcmp.gt.f32.partialorder %v6252_v38, 0.0  ;;  %v4178_v8 = vmul.f32 0.2, %v6252_v38  ;;  %v4302_v53 = vsel %vm4046_vm5, %v6250_v7, %v4174_v18 }
 0x3bd   :  { %v4305_v37 = vsel %vm4049_vm6, %v6251_v16, %v4177_v14 }
 0x3be   :  { %v3920_v3 = vpop.f32.mrb[120].mxu1  ;;  %v4306_v29 = vsel %vm4050_vm7, %v6252_v38, %v4178_v8  ;;  %v4377_v5 = vpack.c.bf16 %v4305_v37, %v4301_v44 }
 0x3bf   :  { %v6253_v52 = vadd.f32 %v3920_v3, %v8156_v27  ;;  %v3922_v30 = vpop.f32.mrb[121].mxu1  ;;  %v4378_v42 = vpack.c.bf16 %v4306_v29, %v4302_v53 }
 0x3c0   :  { %v6254_v28 = vadd.f32 %v3922_v30, %v8158_v35  ;;  %v3924_v45 = vpop.f32.mrb[122].mxu1 }
 0x3c1   :  { %v4181_v9 = vmul.f32 0.2, %v6253_v52  ;;  %v6255_v22 = vadd.f32 %v3924_v45, %v8156_v27  ;;  %v3926_v34 = vpop.f32.mrb[123].mxu1  ;;  %5138 = vmatprep.mubr.bf16.mxu0 %v4378_v42  ;;  %vm4053_vm8 = vcmp.gt.f32.partialorder %v6253_v52, 0.0 }
 0x3c2   :  { %v4182_v63 = vmul.f32 0.2, %v6254_v28  ;;  %v6256_v48 = vadd.f32 %v3926_v34, %v8158_v35  ;;  %5139 = vmatmul.mubr.bf16.gmra.mrb[116].mxu0 %v4377_v5  ;;  %vm4054_vm9 = vcmp.gt.f32.partialorder %v6254_v28, 0.0 }
 0x3c3   :  { %vm4057_vm10 = vcmp.gt.f32.partialorder %v6255_v22, 0.0  ;;  %v4185_v58 = vmul.f32 0.2, %v6255_v22  ;;  %v4309_v17 = vsel %vm4053_vm8, %v6253_v52, %v4181_v9 }
 0x3c4   :  { %vm4058_vm11 = vcmp.gt.f32.partialorder %v6256_v48, 0.0  ;;  %v4186_v19 = vmul.f32 0.2, %v6256_v48  ;;  %v4310_v10 = vsel %vm4054_vm9, %v6254_v28, %v4182_v63 }
 0x3c5   :  { %v4313_v49 = vsel %vm4057_vm10, %v6255_v22, %v4185_v58 }
 0x3c6   :  { %v3930_v26 = vpop.f32.mrb[124].mxu1  ;;  %v4314_v31 = vsel %vm4058_vm11, %v6256_v48, %v4186_v19  ;;  %v4381_v33 = vpack.c.bf16 %v4313_v49, %v4309_v17 }
 0x3c7   :  { %v6257_v23 = vadd.f32 %v3930_v26, %v8156_v27  ;;  %v3932_v54 = vpop.f32.mrb[125].mxu1  ;;  %v4382_v25 = vpack.c.bf16 %v4314_v31, %v4310_v10 }
 0x3c8   :  { %v6258_v39 = vadd.f32 %v3932_v54, %v8158_v35  ;;  %v3934_v4 = vpop.f32.mrb[126].mxu1 }
 0x3c9   :  { %v4189_v40 = vmul.f32 0.2, %v6257_v23  ;;  %v6259_v50 = vadd.f32 %v3934_v4, %v8156_v27  ;;  %v3936_v20 = vpop.f32.mrb[127].mxu1  ;;  %5148 = vmatprep.mubr.bf16.mxu0 %v4382_v25  ;;  %vm4061_vm12 = vcmp.gt.f32.partialorder %v6257_v23, 0.0  ;;  %v5361_v27 = vld [vmem:[%s8541_s5] sm:$0x3] }
 0x3ca   :  { %v4190_v21 = vmul.f32 0.2, %v6258_v39  ;;  %v6260_v0 = vadd.f32 %v3936_v20, %v8158_v35  ;;  %5149 = vmatmul.mubr.bf16.gmra.mrb[120].mxu0 %v4381_v33  ;;  %vm4062_vm13 = vcmp.gt.f32.partialorder %v6258_v39, 0.0  ;;  %v4451_v35 = vld [vmem:[%s8540_s4] sm:$0x3]  ;;  %v5362_v24 = vunpack.c.l.bf16 %v5361_v27 }
 0x3cb   :  { %vm4065_vm14 = vcmp.gt.f32.partialorder %v6259_v50, 0.0  ;;  %v4193_v43 = vmul.f32 0.2, %v6259_v50  ;;  %v4317_v32 = vsel %vm4061_vm12, %v6257_v23, %v4189_v40  ;;  %v8231_v57 = vrot.slane %v4451_v35, %v7957_v2 }
 0x3cc   :  { %vm4066_vm15 = vcmp.gt.f32.partialorder %v6260_v0, 0.0  ;;  %v4194_v55 = vmul.f32 0.2, %v6260_v0  ;;  %v4318_v15 = vsel %vm4062_vm13, %v6258_v39, %v4190_v21  ;;  %v8235_v56 = vrot.slane %v4451_v35, %v461_v6 }
 0x3cd   :  { %v4321_v62 = vsel %vm4065_vm14, %v6259_v50, %v4193_v43  ;;  %v5367_v41 = vrot.slane %v5362_v24, %v7957_v2  ;;  %v5371_v12 = vrot.slane %v5362_v24, %v465_v60 }
 0x3ce   :  { %v4322_v13 = vsel %vm4066_vm15, %v6260_v0, %v4194_v55  ;;  %v4385_v46 = vpack.c.bf16 %v4321_v62, %v4317_v32 }
 0x3cf   :  { %v4386_v51 = vpack.c.bf16 %v4322_v13, %v4318_v15  ;;  %v8243_v16 = vrot.slane %v5367_v41, %v7957_v2  ;;  %v8247_v38 = vrot.slane %v5371_v12, %v7957_v2 }
 0x3d1   :  { %5158 = vmatprep.mubr.bf16.mxu0 %v4386_v51 }
 0x3d2   :  { %5159 = vmatmul.mubr.bf16.gmra.mrb[124].mxu0 %v4385_v46 }
 0x42d   :  { %v5010_v47 = vpop.f32.mrb[64].mxu0 }
 0x42e   :  { %v6261_v59 = vadd.f32 %v5010_v47, %v8231_v57  ;;  %v5012_v7 = vpop.f32.mrb[65].mxu0 }
 0x42f   :  { %v6262_v61 = vadd.f32 %v5012_v7, %v8235_v56  ;;  %v5014_v11 = vpop.f32.mrb[66].mxu0 }
 0x430   :  { %vm5169_vm0 = vcmp.gt.f32.partialorder %v6261_v59, 0.0  ;;  %v5233_v1 = vmul.f32 0.2, %v6261_v59  ;;  %v6263_v6 = vadd.f32 %v5014_v11, %v8231_v57  ;;  %v5016_v18 = vpop.f32.mrb[67].mxu0 }
 0x431   :  { %vm5170_vm1 = vcmp.gt.f32.partialorder %v6262_v61, 0.0  ;;  %v5234_v36 = vmul.f32 0.2, %v6262_v61  ;;  %v6264_v60 = vadd.f32 %v5016_v18, %v8235_v56 }
 0x432   :  { %vm5171_vm2 = vcmp.gt.f32.partialorder %v6263_v6, 0.0  ;;  %v5235_v14 = vmul.f32 0.2, %v6263_v6  ;;  %v5297_v8 = vsel %vm5169_vm0, %v6261_v59, %v5233_v1 }
 0x433   :  { %vm5172_vm3 = vcmp.gt.f32.partialorder %v6264_v60, 0.0  ;;  %v5236_v44 = vmul.f32 0.2, %v6264_v60  ;;  %v5298_v37 = vsel %vm5170_vm1, %v6262_v61, %v5234_v36  ;;  %v5382_v3 = vmul.f32 %v8243_v16, %v5297_v8 }
 0x434   :  { %v5383_v53 = vmul.f32 %v8247_v38, %v5298_v37  ;;  %v5299_v29 = vsel %vm5171_vm2, %v6263_v6, %v5235_v14 }
 0x435   :  { %v5020_v5 = vpop.f32.mrb[68].mxu0  ;;  %v5300_v52 = vsel %vm5172_vm3, %v6264_v60, %v5236_v44  ;;  %v5384_v2 = vmul.f32 %v8243_v16, %v5299_v29 }
 0x436   :  { %v6265_v30 = vadd.f32 %v5020_v5, %v8231_v57  ;;  %v5022_v42 = vpop.f32.mrb[69].mxu0  ;;  %v5446_v28 = vadd.f32 %v5383_v53, %v5382_v3  ;;  %v5385_v45 = vmul.f32 %v8247_v38, %v5300_v52 }
 0x437   :  { %v6266_v9 = vadd.f32 %v5022_v42, %v8235_v56  ;;  %v5024_v22 = vpop.f32.mrb[70].mxu0 }
 0x438   :  { %vm5173_vm4 = vcmp.gt.f32.partialorder %v6265_v30, 0.0  ;;  %v5237_v34 = vmul.f32 0.2, %v6265_v30  ;;  %v6267_v63 = vadd.f32 %v5024_v22, %v8231_v57  ;;  %v5026_v48 = vpop.f32.mrb[71].mxu0  ;;  %5447 = vadd.xlane.f32.xlu0 %v5446_v28  ;;  %v5449_v58 = vadd.f32 %v5385_v45, %v5384_v2 }
 0x439   :  { %vm5174_vm5 = vcmp.gt.f32.partialorder %v6266_v9, 0.0  ;;  %v5238_v19 = vmul.f32 0.2, %v6266_v9  ;;  %v6268_v17 = vadd.f32 %v5026_v48, %v8235_v56 }
 0x43a   :  { %vm5175_vm6 = vcmp.gt.f32.partialorder %v6267_v63, 0.0  ;;  %v5239_v49 = vmul.f32 0.2, %v6267_v63  ;;  %v5301_v26 = vsel %vm5173_vm4, %v6265_v30, %v5237_v34 }
 0x43b   :  { %vm5176_vm7 = vcmp.gt.f32.partialorder %v6268_v17, 0.0  ;;  %v5240_v10 = vmul.f32 0.2, %v6268_v17  ;;  %v5302_v31 = vsel %vm5174_vm5, %v6266_v9, %v5238_v19  ;;  %v5386_v33 = vmul.f32 %v8243_v16, %v5301_v26 }
 0x43c   :  { %5450 = vadd.xlane.f32.xlu0 %v5449_v58  ;;  %v5387_v23 = vmul.f32 %v8247_v38, %v5302_v31  ;;  %v5303_v54 = vsel %vm5175_vm6, %v6267_v63, %v5239_v49 }
 0x43d   :  { %v5030_v25 = vpop.f32.mrb[72].mxu0  ;;  %v5304_v39 = vsel %vm5176_vm7, %v6268_v17, %v5240_v10  ;;  %v5388_v4 = vmul.f32 %v8243_v16, %v5303_v54 }
 0x43e   :  { %v6269_v40 = vadd.f32 %v5030_v25, %v8231_v57  ;;  %v5032_v50 = vpop.f32.mrb[73].mxu0  ;;  %v5452_v20 = vadd.f32 %v5387_v23, %v5386_v33  ;;  %v5389_v21 = vmul.f32 %v8247_v38, %v5304_v39 }
 0x43f   :  { %v6270_v0 = vadd.f32 %v5032_v50, %v8235_v56  ;;  %v5034_v43 = vpop.f32.mrb[74].mxu0 }
 0x440   :  { %vm5177_vm8 = vcmp.gt.f32.partialorder %v6269_v40, 0.0  ;;  %v5241_v55 = vmul.f32 0.2, %v6269_v40  ;;  %v6271_v32 = vadd.f32 %v5034_v43, %v8231_v57  ;;  %v5036_v62 = vpop.f32.mrb[75].mxu0  ;;  %5453 = vadd.xlane.f32.xlu1 %v5452_v20  ;;  %v5455_v15 = vadd.f32 %v5389_v21, %v5388_v4 }
 0x441   :  { %vm5178_vm9 = vcmp.gt.f32.partialorder %v6270_v0, 0.0  ;;  %v5242_v13 = vmul.f32 0.2, %v6270_v0  ;;  %v6272_v46 = vadd.f32 %v5036_v62, %v8235_v56 }
 0x442   :  { %vm5179_vm10 = vcmp.gt.f32.partialorder %v6271_v32, 0.0  ;;  %v5243_v51 = vmul.f32 0.2, %v6271_v32  ;;  %v5305_v27 = vsel %vm5177_vm8, %v6269_v40, %v5241_v55 }
 0x443   :  { %vm5180_vm11 = vcmp.gt.f32.partialorder %v6272_v46, 0.0  ;;  %v5244_v35 = vmul.f32 0.2, %v6272_v46  ;;  %v5306_v24 = vsel %vm5178_vm9, %v6270_v0, %v5242_v13  ;;  %v5390_v41 = vmul.f32 %v8243_v16, %v5305_v27 }
 0x444   :  { %5456 = vadd.xlane.f32.xlu1 %v5455_v15  ;;  %v5391_v12 = vmul.f32 %v8247_v38, %v5306_v24  ;;  %v5307_v47 = vsel %vm5179_vm10, %v6271_v32, %v5243_v51 }
 0x445   :  { %v5040_v59 = vpop.f32.mrb[76].mxu0  ;;  %v5308_v7 = vsel %vm5180_vm11, %v6272_v46, %v5244_v35  ;;  %v5392_v61 = vmul.f32 %v8243_v16, %v5307_v47 }
 0x446   :  { %v6273_v11 = vadd.f32 %v5040_v59, %v8231_v57  ;;  %v5042_v1 = vpop.f32.mrb[77].mxu0  ;;  %v5458_v6 = vadd.f32 %v5391_v12, %v5390_v41  ;;  %v5393_v18 = vmul.f32 %v8247_v38, %v5308_v7 }
 0x447   :  { %v6274_v36 = vadd.f32 %v5042_v1, %v8235_v56  ;;  %v5044_v60 = vpop.f32.mrb[78].mxu0 }
 0x448   :  { %vm5181_vm12 = vcmp.gt.f32.partialorder %v6273_v11, 0.0  ;;  %v5245_v14 = vmul.f32 0.2, %v6273_v11  ;;  %v6275_v8 = vadd.f32 %v5044_v60, %v8231_v57  ;;  %v5046_v44 = vpop.f32.mrb[79].mxu0  ;;  %5459 = vadd.xlane.f32.xlu0 %v5458_v6  ;;  %v5461_v37 = vadd.f32 %v5393_v18, %v5392_v61 }
 0x449   :  { %vm5182_vm13 = vcmp.gt.f32.partialorder %v6274_v36, 0.0  ;;  %v5246_v3 = vmul.f32 0.2, %v6274_v36  ;;  %v6276_v53 = vadd.f32 %v5046_v44, %v8235_v56 }
 0x44a   :  { %vm5183_vm14 = vcmp.gt.f32.partialorder %v6275_v8, 0.0  ;;  %v5247_v29 = vmul.f32 0.2, %v6275_v8  ;;  %5462 = vadd.xlane.f32.xlu1 %v5461_v37  ;;  %v5309_v5 = vsel %vm5181_vm12, %v6273_v11, %v5245_v14 }
 0x44b   :  { %vm5184_vm15 = vcmp.gt.f32.partialorder %v6276_v53, 0.0  ;;  %v5248_v52 = vmul.f32 0.2, %v6276_v53  ;;  %v5310_v2 = vsel %vm5182_vm13, %v6274_v36, %v5246_v3  ;;  %v5394_v30 = vmul.f32 %v8243_v16, %v5309_v5 }
 0x44c   :  { %v5395_v42 = vmul.f32 %v8247_v38, %v5310_v2  ;;  %v5311_v28 = vsel %vm5183_vm14, %v6275_v8, %v5247_v29 }
 0x44d   :  { %v5050_v45 = vpop.f32.mrb[80].mxu0  ;;  %v5312_v9 = vsel %vm5184_vm15, %v6276_v53, %v5248_v52  ;;  %v5396_v22 = vmul.f32 %v8243_v16, %v5311_v28 }
 0x44e   :  { %v6277_v34 = vadd.f32 %v5050_v45, %v8231_v57  ;;  %v5052_v63 = vpop.f32.mrb[81].mxu0  ;;  %v5464_v48 = vadd.f32 %v5395_v42, %v5394_v30  ;;  %v5397_v58 = vmul.f32 %v8247_v38, %v5312_v9 }
 0x44f   :  { %v6278_v19 = vadd.f32 %v5052_v63, %v8235_v56  ;;  %v5054_v17 = vpop.f32.mrb[82].mxu0 }
 0x450   :  { %vm5185_vm0 = vcmp.gt.f32.partialorder %v6277_v34, 0.0  ;;  %v5249_v49 = vmul.f32 0.2, %v6277_v34  ;;  %v6279_v26 = vadd.f32 %v5054_v17, %v8231_v57  ;;  %v5056_v10 = vpop.f32.mrb[83].mxu0  ;;  %5465 = vadd.xlane.f32.xlu0 %v5464_v48  ;;  %v5467_v31 = vadd.f32 %v5397_v58, %v5396_v22 }
 0x451   :  { %vm5186_vm1 = vcmp.gt.f32.partialorder %v6278_v19, 0.0  ;;  %v5250_v33 = vmul.f32 0.2, %v6278_v19  ;;  %v6280_v23 = vadd.f32 %v5056_v10, %v8235_v56 }
 0x452   :  { %vm5187_vm2 = vcmp.gt.f32.partialorder %v6279_v26, 0.0  ;;  %v5251_v54 = vmul.f32 0.2, %v6279_v26  ;;  %5468 = vadd.xlane.f32.xlu1 %v5467_v31  ;;  %v5313_v25 = vsel %vm5185_vm0, %v6277_v34, %v5249_v49 }
 0x453   :  { %vm5188_vm3 = vcmp.gt.f32.partialorder %v6280_v23, 0.0  ;;  %v5252_v39 = vmul.f32 0.2, %v6280_v23  ;;  %v5314_v4 = vsel %vm5186_vm1, %v6278_v19, %v5250_v33  ;;  %v5398_v40 = vmul.f32 %v8243_v16, %v5313_v25 }
 0x454   :  { %v5399_v50 = vmul.f32 %v8247_v38, %v5314_v4  ;;  %v5315_v20 = vsel %vm5187_vm2, %v6279_v26, %v5251_v54 }
 0x455   :  { %v5060_v21 = vpop.f32.mrb[84].mxu0  ;;  %v5316_v0 = vsel %vm5188_vm3, %v6280_v23, %v5252_v39  ;;  %v5400_v43 = vmul.f32 %v8243_v16, %v5315_v20 }
 0x456   :  { %v6281_v55 = vadd.f32 %v5060_v21, %v8231_v57  ;;  %v5062_v32 = vpop.f32.mrb[85].mxu0  ;;  %v5470_v62 = vadd.f32 %v5399_v50, %v5398_v40  ;;  %v5401_v15 = vmul.f32 %v8247_v38, %v5316_v0 }
 0x457   :  { %v6282_v13 = vadd.f32 %v5062_v32, %v8235_v56  ;;  %v5064_v46 = vpop.f32.mrb[86].mxu0 }
 0x458   :  { %vm5189_vm4 = vcmp.gt.f32.partialorder %v6281_v55, 0.0  ;;  %v5253_v51 = vmul.f32 0.2, %v6281_v55  ;;  %v6283_v27 = vadd.f32 %v5064_v46, %v8231_v57  ;;  %v5066_v35 = vpop.f32.mrb[87].mxu0  ;;  %5471 = vadd.xlane.f32.xlu0 %v5470_v62  ;;  %v5473_v24 = vadd.f32 %v5401_v15, %v5400_v43 }
 0x459   :  { %vm5190_vm5 = vcmp.gt.f32.partialorder %v6282_v13, 0.0  ;;  %v5254_v41 = vmul.f32 0.2, %v6282_v13  ;;  %v6284_v12 = vadd.f32 %v5066_v35, %v8235_v56 }
 0x45a   :  { %vm5191_vm6 = vcmp.gt.f32.partialorder %v6283_v27, 0.0  ;;  %v5255_v47 = vmul.f32 0.2, %v6283_v27  ;;  %5474 = vadd.xlane.f32.xlu1 %v5473_v24  ;;  %v5317_v59 = vsel %vm5189_vm4, %v6281_v55, %v5253_v51 }
 0x45b   :  { %vm5192_vm7 = vcmp.gt.f32.partialorder %v6284_v12, 0.0  ;;  %v5256_v7 = vmul.f32 0.2, %v6284_v12  ;;  %v5318_v61 = vsel %vm5190_vm5, %v6282_v13, %v5254_v41  ;;  %v5402_v11 = vmul.f32 %v8243_v16, %v5317_v59 }
 0x45c   :  { %v5403_v1 = vmul.f32 %v8247_v38, %v5318_v61  ;;  %v5319_v6 = vsel %vm5191_vm6, %v6283_v27, %v5255_v47 }
 0x45d   :  { %v5070_v18 = vpop.f32.mrb[88].mxu0  ;;  %v5320_v36 = vsel %vm5192_vm7, %v6284_v12, %v5256_v7  ;;  %v5404_v60 = vmul.f32 %v8243_v16, %v5319_v6 }
 0x45e   :  { %v6285_v14 = vadd.f32 %v5070_v18, %v8231_v57  ;;  %v5072_v8 = vpop.f32.mrb[89].mxu0  ;;  %v5476_v44 = vadd.f32 %v5403_v1, %v5402_v11  ;;  %v5405_v37 = vmul.f32 %v8247_v38, %v5320_v36 }
 0x45f   :  { %v6286_v3 = vadd.f32 %v5072_v8, %v8235_v56  ;;  %v5074_v53 = vpop.f32.mrb[90].mxu0 }
 0x460   :  { %vm5193_vm8 = vcmp.gt.f32.partialorder %v6285_v14, 0.0  ;;  %v5257_v29 = vmul.f32 0.2, %v6285_v14  ;;  %v6287_v5 = vadd.f32 %v5074_v53, %v8231_v57  ;;  %v5076_v52 = vpop.f32.mrb[91].mxu0  ;;  %5477 = vadd.xlane.f32.xlu0 %v5476_v44  ;;  %v5479_v2 = vadd.f32 %v5405_v37, %v5404_v60 }
 0x461   :  { %vm5194_vm9 = vcmp.gt.f32.partialorder %v6286_v3, 0.0  ;;  %v5258_v30 = vmul.f32 0.2, %v6286_v3  ;;  %v6288_v42 = vadd.f32 %v5076_v52, %v8235_v56 }
 0x462   :  { %vm5195_vm10 = vcmp.gt.f32.partialorder %v6287_v5, 0.0  ;;  %v5259_v28 = vmul.f32 0.2, %v6287_v5  ;;  %5480 = vadd.xlane.f32.xlu1 %v5479_v2  ;;  %v5321_v45 = vsel %vm5193_vm8, %v6285_v14, %v5257_v29 }
 0x463   :  { %vm5196_vm11 = vcmp.gt.f32.partialorder %v6288_v42, 0.0  ;;  %v5260_v9 = vmul.f32 0.2, %v6288_v42  ;;  %v5322_v22 = vsel %vm5194_vm9, %v6286_v3, %v5258_v30  ;;  %v5406_v34 = vmul.f32 %v8243_v16, %v5321_v45 }
 0x464   :  { %v5407_v63 = vmul.f32 %v8247_v38, %v5322_v22  ;;  %v5323_v48 = vsel %vm5195_vm10, %v6287_v5, %v5259_v28 }
 0x465   :  { %v5080_v58 = vpop.f32.mrb[92].mxu0  ;;  %v5324_v19 = vsel %vm5196_vm11, %v6288_v42, %v5260_v9  ;;  %v5408_v17 = vmul.f32 %v8243_v16, %v5323_v48 }
 0x466   :  { %v6289_v49 = vadd.f32 %v5080_v58, %v8231_v57  ;;  %v5082_v26 = vpop.f32.mrb[93].mxu0  ;;  %v5482_v10 = vadd.f32 %v5407_v63, %v5406_v34  ;;  %v5409_v31 = vmul.f32 %v8247_v38, %v5324_v19 }
 0x467   :  { %v6290_v33 = vadd.f32 %v5082_v26, %v8235_v56  ;;  %v5084_v23 = vpop.f32.mrb[94].mxu0 }
 0x468   :  { %vm5197_vm12 = vcmp.gt.f32.partialorder %v6289_v49, 0.0  ;;  %v5261_v54 = vmul.f32 0.2, %v6289_v49  ;;  %v6291_v25 = vadd.f32 %v5084_v23, %v8231_v57  ;;  %v5086_v39 = vpop.f32.mrb[95].mxu0  ;;  %5483 = vadd.xlane.f32.xlu0 %v5482_v10  ;;  %v5485_v4 = vadd.f32 %v5409_v31, %v5408_v17 }
 0x469   :  { %vm5198_vm13 = vcmp.gt.f32.partialorder %v6290_v33, 0.0  ;;  %v5262_v40 = vmul.f32 0.2, %v6290_v33  ;;  %v6292_v50 = vadd.f32 %v5086_v39, %v8235_v56 }
 0x46a   :  { %vm5199_vm14 = vcmp.gt.f32.partialorder %v6291_v25, 0.0  ;;  %v5263_v20 = vmul.f32 0.2, %v6291_v25  ;;  %5486 = vadd.xlane.f32.xlu1 %v5485_v4  ;;  %v5325_v21 = vsel %vm5197_vm12, %v6289_v49, %v5261_v54 }
 0x46b   :  { %vm5200_vm15 = vcmp.gt.f32.partialorder %v6292_v50, 0.0  ;;  %v5264_v0 = vmul.f32 0.2, %v6292_v50  ;;  %v5326_v43 = vsel %vm5198_vm13, %v6290_v33, %v5262_v40  ;;  %v5410_v55 = vmul.f32 %v8243_v16, %v5325_v21 }
 0x46c   :  { %v5411_v32 = vmul.f32 %v8247_v38, %v5326_v43  ;;  %v5327_v62 = vsel %vm5199_vm14, %v6291_v25, %v5263_v20 }
 0x46d   :  { %v5090_v15 = vpop.f32.mrb[96].mxu0  ;;  %v5328_v13 = vsel %vm5200_vm15, %v6292_v50, %v5264_v0  ;;  %v5412_v46 = vmul.f32 %v8243_v16, %v5327_v62 }
 0x46e   :  { %v6293_v51 = vadd.f32 %v5090_v15, %v8231_v57  ;;  %v5092_v27 = vpop.f32.mrb[97].mxu0  ;;  %v5488_v35 = vadd.f32 %v5411_v32, %v5410_v55  ;;  %v5413_v24 = vmul.f32 %v8247_v38, %v5328_v13 }
 0x46f   :  { %v6294_v41 = vadd.f32 %v5092_v27, %v8235_v56  ;;  %v5094_v12 = vpop.f32.mrb[98].mxu0 }
 0x470   :  { %vm5201_vm0 = vcmp.gt.f32.partialorder %v6293_v51, 0.0  ;;  %v5265_v47 = vmul.f32 0.2, %v6293_v51  ;;  %v6295_v59 = vadd.f32 %v5094_v12, %v8231_v57  ;;  %v5096_v7 = vpop.f32.mrb[99].mxu0  ;;  %5489 = vadd.xlane.f32.xlu0 %v5488_v35  ;;  %v5491_v61 = vadd.f32 %v5413_v24, %v5412_v46 }
 0x471   :  { %vm5202_vm1 = vcmp.gt.f32.partialorder %v6294_v41, 0.0  ;;  %v5266_v11 = vmul.f32 0.2, %v6294_v41  ;;  %v6296_v1 = vadd.f32 %v5096_v7, %v8235_v56 }
 0x472   :  { %vm5203_vm2 = vcmp.gt.f32.partialorder %v6295_v59, 0.0  ;;  %v5267_v6 = vmul.f32 0.2, %v6295_v59  ;;  %5492 = vadd.xlane.f32.xlu1 %v5491_v61  ;;  %v5329_v18 = vsel %vm5201_vm0, %v6293_v51, %v5265_v47 }
 0x473   :  { %vm5204_vm3 = vcmp.gt.f32.partialorder %v6296_v1, 0.0  ;;  %v5268_v36 = vmul.f32 0.2, %v6296_v1  ;;  %v5330_v60 = vsel %vm5202_vm1, %v6294_v41, %v5266_v11  ;;  %v5414_v14 = vmul.f32 %v8243_v16, %v5329_v18 }
 0x474   :  { %v5415_v8 = vmul.f32 %v8247_v38, %v5330_v60  ;;  %v5331_v44 = vsel %vm5203_vm2, %v6295_v59, %v5267_v6 }
 0x475   :  { %v5100_v37 = vpop.f32.mrb[100].mxu0  ;;  %v5332_v3 = vsel %vm5204_vm3, %v6296_v1, %v5268_v36  ;;  %v5416_v53 = vmul.f32 %v8243_v16, %v5331_v44 }
 0x476   :  { %v6297_v29 = vadd.f32 %v5100_v37, %v8231_v57  ;;  %v5102_v5 = vpop.f32.mrb[101].mxu0  ;;  %v5494_v52 = vadd.f32 %v5415_v8, %v5414_v14  ;;  %v5417_v2 = vmul.f32 %v8247_v38, %v5332_v3 }
 0x477   :  { %v6298_v30 = vadd.f32 %v5102_v5, %v8235_v56  ;;  %v5104_v42 = vpop.f32.mrb[102].mxu0 }
 0x478   :  { %vm5205_vm4 = vcmp.gt.f32.partialorder %v6297_v29, 0.0  ;;  %v5269_v28 = vmul.f32 0.2, %v6297_v29  ;;  %v6299_v45 = vadd.f32 %v5104_v42, %v8231_v57  ;;  %v5106_v9 = vpop.f32.mrb[103].mxu0  ;;  %5495 = vadd.xlane.f32.xlu0 %v5494_v52  ;;  %v5497_v22 = vadd.f32 %v5417_v2, %v5416_v53 }
 0x479   :  { %vm5206_vm5 = vcmp.gt.f32.partialorder %v6298_v30, 0.0  ;;  %v5270_v34 = vmul.f32 0.2, %v6298_v30  ;;  %v6300_v63 = vadd.f32 %v5106_v9, %v8235_v56 }
 0x47a   :  { %vm5207_vm6 = vcmp.gt.f32.partialorder %v6299_v45, 0.0  ;;  %v5271_v48 = vmul.f32 0.2, %v6299_v45  ;;  %5498 = vadd.xlane.f32.xlu1 %v5497_v22  ;;  %v5333_v58 = vsel %vm5205_vm4, %v6297_v29, %v5269_v28 }
 0x47b   :  { %vm5208_vm7 = vcmp.gt.f32.partialorder %v6300_v63, 0.0  ;;  %v5272_v19 = vmul.f32 0.2, %v6300_v63  ;;  %v5334_v17 = vsel %vm5206_vm5, %v6298_v30, %v5270_v34  ;;  %v5418_v49 = vmul.f32 %v8243_v16, %v5333_v58 }
 0x47c   :  { %v5419_v26 = vmul.f32 %v8247_v38, %v5334_v17  ;;  %v5335_v10 = vsel %vm5207_vm6, %v6299_v45, %v5271_v48 }
 0x47d   :  { %v5110_v31 = vpop.f32.mrb[104].mxu0  ;;  %v5336_v33 = vsel %vm5208_vm7, %v6300_v63, %v5272_v19  ;;  %v5420_v23 = vmul.f32 %v8243_v16, %v5335_v10 }
 0x47e   :  { %v6301_v54 = vadd.f32 %v5110_v31, %v8231_v57  ;;  %v5112_v25 = vpop.f32.mrb[105].mxu0  ;;  %v5500_v39 = vadd.f32 %v5419_v26, %v5418_v49  ;;  %v5421_v4 = vmul.f32 %v8247_v38, %v5336_v33 }
 0x47f   :  { %v6302_v40 = vadd.f32 %v5112_v25, %v8235_v56  ;;  %v5114_v50 = vpop.f32.mrb[106].mxu0 }
 0x480   :  { %vm5209_vm8 = vcmp.gt.f32.partialorder %v6301_v54, 0.0  ;;  %v5273_v20 = vmul.f32 0.2, %v6301_v54  ;;  %v6303_v21 = vadd.f32 %v5114_v50, %v8231_v57  ;;  %v5116_v0 = vpop.f32.mrb[107].mxu0  ;;  %5501 = vadd.xlane.f32.xlu0 %v5500_v39  ;;  %v5503_v43 = vadd.f32 %v5421_v4, %v5420_v23 }
 0x481   :  { %vm5210_vm9 = vcmp.gt.f32.partialorder %v6302_v40, 0.0  ;;  %v5274_v55 = vmul.f32 0.2, %v6302_v40  ;;  %v6304_v32 = vadd.f32 %v5116_v0, %v8235_v56 }
 0x482   :  { %vm5211_vm10 = vcmp.gt.f32.partialorder %v6303_v21, 0.0  ;;  %v5275_v62 = vmul.f32 0.2, %v6303_v21  ;;  %5504 = vadd.xlane.f32.xlu1 %v5503_v43  ;;  %v5337_v15 = vsel %vm5209_vm8, %v6301_v54, %v5273_v20 }
 0x483   :  { %vm5212_vm11 = vcmp.gt.f32.partialorder %v6304_v32, 0.0  ;;  %v5276_v13 = vmul.f32 0.2, %v6304_v32  ;;  %v5338_v46 = vsel %vm5210_vm9, %v6302_v40, %v5274_v55  ;;  %v5422_v51 = vmul.f32 %v8243_v16, %v5337_v15 }
 0x484   :  { %v5423_v27 = vmul.f32 %v8247_v38, %v5338_v46  ;;  %v5339_v35 = vsel %vm5211_vm10, %v6303_v21, %v5275_v62 }
 0x485   :  { %v5120_v24 = vpop.f32.mrb[108].mxu0  ;;  %v5340_v41 = vsel %vm5212_vm11, %v6304_v32, %v5276_v13  ;;  %v5424_v12 = vmul.f32 %v8243_v16, %v5339_v35 }
 0x486   :  { %v6305_v47 = vadd.f32 %v5120_v24, %v8231_v57  ;;  %v5122_v59 = vpop.f32.mrb[109].mxu0  ;;  %v5506_v7 = vadd.f32 %v5423_v27, %v5422_v51  ;;  %v5425_v61 = vmul.f32 %v8247_v38, %v5340_v41 }
 0x487   :  { %v6306_v11 = vadd.f32 %v5122_v59, %v8235_v56  ;;  %v5124_v1 = vpop.f32.mrb[110].mxu0 }
 0x488   :  { %vm5213_vm12 = vcmp.gt.f32.partialorder %v6305_v47, 0.0  ;;  %v5277_v6 = vmul.f32 0.2, %v6305_v47  ;;  %v6307_v18 = vadd.f32 %v5124_v1, %v8231_v57  ;;  %v5126_v36 = vpop.f32.mrb[111].mxu0  ;;  %5507 = vadd.xlane.f32.xlu0 %v5506_v7  ;;  %v5509_v60 = vadd.f32 %v5425_v61, %v5424_v12 }
 0x489   :  { %vm5214_vm13 = vcmp.gt.f32.partialorder %v6306_v11, 0.0  ;;  %v5278_v14 = vmul.f32 0.2, %v6306_v11  ;;  %v6308_v8 = vadd.f32 %v5126_v36, %v8235_v56 }
 0x48a   :  { %vm5215_vm14 = vcmp.gt.f32.partialorder %v6307_v18, 0.0  ;;  %v5279_v44 = vmul.f32 0.2, %v6307_v18  ;;  %5510 = vadd.xlane.f32.xlu1 %v5509_v60  ;;  %v5341_v37 = vsel %vm5213_vm12, %v6305_v47, %v5277_v6 }
 0x48b   :  { %vm5216_vm15 = vcmp.gt.f32.partialorder %v6308_v8, 0.0  ;;  %v5280_v3 = vmul.f32 0.2, %v6308_v8  ;;  %v5342_v53 = vsel %vm5214_vm13, %v6306_v11, %v5278_v14  ;;  %v5426_v29 = vmul.f32 %v8243_v16, %v5341_v37 }
 0x48c   :  { %v5427_v5 = vmul.f32 %v8247_v38, %v5342_v53  ;;  %v5343_v52 = vsel %vm5215_vm14, %v6307_v18, %v5279_v44 }
 0x48d   :  { %v5130_v2 = vpop.f32.mrb[112].mxu0  ;;  %v5344_v30 = vsel %vm5216_vm15, %v6308_v8, %v5280_v3  ;;  %v5428_v42 = vmul.f32 %v8243_v16, %v5343_v52 }
 0x48e   :  { %v6309_v28 = vadd.f32 %v5130_v2, %v8231_v57  ;;  %v5132_v45 = vpop.f32.mrb[113].mxu0  ;;  %v5512_v9 = vadd.f32 %v5427_v5, %v5426_v29  ;;  %v5429_v22 = vmul.f32 %v8247_v38, %v5344_v30 }
 0x48f   :  { %v6310_v34 = vadd.f32 %v5132_v45, %v8235_v56  ;;  %v5134_v63 = vpop.f32.mrb[114].mxu0 }
 0x490   :  { %vm5217_vm0 = vcmp.gt.f32.partialorder %v6309_v28, 0.0  ;;  %v5281_v48 = vmul.f32 0.2, %v6309_v28  ;;  %v6311_v58 = vadd.f32 %v5134_v63, %v8231_v57  ;;  %v5136_v19 = vpop.f32.mrb[115].mxu0  ;;  %5513 = vadd.xlane.f32.xlu0 %v5512_v9  ;;  %v5515_v17 = vadd.f32 %v5429_v22, %v5428_v42 }
 0x491   :  { %vm5218_vm1 = vcmp.gt.f32.partialorder %v6310_v34, 0.0  ;;  %v5282_v49 = vmul.f32 0.2, %v6310_v34  ;;  %v6312_v26 = vadd.f32 %v5136_v19, %v8235_v56 }
 0x492   :  { %vm5219_vm2 = vcmp.gt.f32.partialorder %v6311_v58, 0.0  ;;  %v5283_v10 = vmul.f32 0.2, %v6311_v58  ;;  %5516 = vadd.xlane.f32.xlu1 %v5515_v17  ;;  %v5345_v31 = vsel %vm5217_vm0, %v6309_v28, %v5281_v48  ;;  %vm5581_vm0 = vcmask 7168  }
 0x493   :  { %vm5220_vm3 = vcmp.gt.f32.partialorder %v6312_v26, 0.0  ;;  %v5284_v33 = vmul.f32 0.2, %v6312_v26  ;;  %v5346_v23 = vsel %vm5218_vm1, %v6310_v34, %v5282_v49  ;;  %v5430_v54 = vmul.f32 %v8243_v16, %v5345_v31 }
 0x494   :  { %v5431_v25 = vmul.f32 %v8247_v38, %v5346_v23  ;;  %v5347_v39 = vsel %vm5219_vm2, %v6311_v58, %v5283_v10 }
 0x495   :  { %v5140_v4 = vpop.f32.mrb[116].mxu0  ;;  %v5348_v40 = vsel %vm5220_vm3, %v6312_v26, %v5284_v33  ;;  %v5432_v50 = vmul.f32 %v8243_v16, %v5347_v39 }
 0x496   :  { %v6313_v20 = vadd.f32 %v5140_v4, %v8231_v57  ;;  %v5142_v21 = vpop.f32.mrb[117].mxu0  ;;  %v5518_v0 = vadd.f32 %v5431_v25, %v5430_v54  ;;  %v5433_v43 = vmul.f32 %v8247_v38, %v5348_v40 }
 0x497   :  { %v6314_v55 = vadd.f32 %v5142_v21, %v8235_v56  ;;  %v5144_v32 = vpop.f32.mrb[118].mxu0 }
 0x498   :  { %vm5221_vm4 = vcmp.gt.f32.partialorder %v6313_v20, 0.0  ;;  %v5285_v62 = vmul.f32 0.2, %v6313_v20  ;;  %v6315_v15 = vadd.f32 %v5144_v32, %v8231_v57  ;;  %v5146_v13 = vpop.f32.mrb[119].mxu0  ;;  %5519 = vadd.xlane.f32.xlu0 %v5518_v0  ;;  %v5521_v46 = vadd.f32 %v5433_v43, %v5432_v50 }
 0x499   :  { %vm5222_vm5 = vcmp.gt.f32.partialorder %v6314_v55, 0.0  ;;  %v5286_v51 = vmul.f32 0.2, %v6314_v55  ;;  %v6316_v27 = vadd.f32 %v5146_v13, %v8235_v56 }
 0x49a   :  { %vm5223_vm6 = vcmp.gt.f32.partialorder %v6315_v15, 0.0  ;;  %v5287_v35 = vmul.f32 0.2, %v6315_v15  ;;  %5522 = vadd.xlane.f32.xlu1 %v5521_v46  ;;  %v5349_v24 = vsel %vm5221_vm4, %v6313_v20, %v5285_v62  ;;  %v8374_v62 = vld [vmem:[#allocation2] ss:$0 sm:$0xff] }
 0x49b   :  { %vm5224_vm7 = vcmp.gt.f32.partialorder %v6316_v27, 0.0  ;;  %v5288_v41 = vmul.f32 0.2, %v6316_v27  ;;  %v5350_v12 = vsel %vm5222_vm5, %v6314_v55, %v5286_v51  ;;  %v5434_v47 = vmul.f32 %v8243_v16, %v5349_v24 }
 0x49c   :  { %v5435_v59 = vmul.f32 %v8247_v38, %v5350_v12  ;;  %v5351_v7 = vsel %vm5223_vm6, %v6315_v15, %v5287_v35 }
 0x49d   :  { %v5150_v61 = vpop.f32.mrb[120].mxu0  ;;  %v5352_v11 = vsel %vm5224_vm7, %v6316_v27, %v5288_v41  ;;  %v5436_v1 = vmul.f32 %v8243_v16, %v5351_v7 }
 0x49e   :  { %v6317_v6 = vadd.f32 %v5150_v61, %v8231_v57  ;;  %v5152_v18 = vpop.f32.mrb[121].mxu0  ;;  %v5524_v36 = vadd.f32 %v5435_v59, %v5434_v47  ;;  %v5437_v60 = vmul.f32 %v8247_v38, %v5352_v11 }
 0x49f   :  { %v6318_v14 = vadd.f32 %v5152_v18, %v8235_v56  ;;  %v5154_v8 = vpop.f32.mrb[122].mxu0 }
 0x4a0   :  { %vm5225_vm8 = vcmp.gt.f32.partialorder %v6317_v6, 0.0  ;;  %v5289_v44 = vmul.f32 0.2, %v6317_v6  ;;  %v6319_v37 = vadd.f32 %v5154_v8, %v8231_v57  ;;  %v5156_v3 = vpop.f32.mrb[123].mxu0  ;;  %5525 = vadd.xlane.f32.xlu0 %v5524_v36  ;;  %v5527_v53 = vadd.f32 %v5437_v60, %v5436_v1 }
 0x4a1   :  { %vm5226_vm9 = vcmp.gt.f32.partialorder %v6318_v14, 0.0  ;;  %v5290_v29 = vmul.f32 0.2, %v6318_v14  ;;  %v6320_v5 = vadd.f32 %v5156_v3, %v8235_v56 }
 0x4a2   :  { %vm5227_vm10 = vcmp.gt.f32.partialorder %v6319_v37, 0.0  ;;  %v5291_v52 = vmul.f32 0.2, %v6319_v37  ;;  %5528 = vadd.xlane.f32.xlu1 %v5527_v53  ;;  %v5353_v2 = vsel %vm5225_vm8, %v6317_v6, %v5289_v44 }
 0x4a3   :  { %vm5228_vm11 = vcmp.gt.f32.partialorder %v6320_v5, 0.0  ;;  %v5292_v30 = vmul.f32 0.2, %v6320_v5  ;;  %v5354_v42 = vsel %vm5226_vm9, %v6318_v14, %v5290_v29  ;;  %v5438_v28 = vmul.f32 %v8243_v16, %v5353_v2 }
 0x4a4   :  { %v5439_v45 = vmul.f32 %v8247_v38, %v5354_v42  ;;  %v5355_v9 = vsel %vm5227_vm10, %v6319_v37, %v5291_v52 }
 0x4a5   :  { %v5160_v22 = vpop.f32.mrb[124].mxu0  ;;  %v5356_v34 = vsel %vm5228_vm11, %v6320_v5, %v5292_v30  ;;  %v5440_v63 = vmul.f32 %v8243_v16, %v5355_v9 }
 0x4a6   :  { %v6321_v48 = vadd.f32 %v5160_v22, %v8231_v57  ;;  %v5162_v58 = vpop.f32.mrb[125].mxu0  ;;  %v5530_v19 = vadd.f32 %v5439_v45, %v5438_v28  ;;  %v5441_v17 = vmul.f32 %v8247_v38, %v5356_v34 }
 0x4a7   :  { %v6322_v49 = vadd.f32 %v5162_v58, %v8235_v56  ;;  %v5164_v26 = vpop.f32.mrb[126].mxu0 }
 0x4a8   :  { %vm5229_vm12 = vcmp.gt.f32.partialorder %v6321_v48, 0.0  ;;  %v5293_v10 = vmul.f32 0.2, %v6321_v48  ;;  %v6323_v31 = vadd.f32 %v5164_v26, %v8231_v57  ;;  %v5166_v33 = vpop.f32.mrb[127].mxu0  ;;  %5531 = vadd.xlane.f32.xlu0 %v5530_v19  ;;  %v5533_v23 = vadd.f32 %v5441_v17, %v5440_v63 }
 0x4a9   :  { %vm5230_vm13 = vcmp.gt.f32.partialorder %v6322_v49, 0.0  ;;  %v5294_v54 = vmul.f32 0.2, %v6322_v49  ;;  %v6324_v25 = vadd.f32 %v5166_v33, %v8235_v56 }
 0x4aa   :  { %vm5231_vm14 = vcmp.gt.f32.partialorder %v6323_v31, 0.0  ;;  %v5295_v39 = vmul.f32 0.2, %v6323_v31  ;;  %5534 = vadd.xlane.f32.xlu1 %v5533_v23  ;;  %v5357_v4 = vsel %vm5229_vm12, %v6321_v48, %v5293_v10 }
 0x4ab   :  { %vm5232_vm15 = vcmp.gt.f32.partialorder %v6324_v25, 0.0  ;;  %v5296_v40 = vmul.f32 0.2, %v6324_v25  ;;  %v5358_v50 = vsel %vm5230_vm13, %v6322_v49, %v5294_v54  ;;  %v5442_v20 = vmul.f32 %v8243_v16, %v5357_v4 }
 0x4ac   :  { %v5443_v21 = vmul.f32 %v8247_v38, %v5358_v50  ;;  %v5359_v0 = vsel %vm5231_vm14, %v6323_v31, %v5295_v39 }
 0x4ad   :  { %v5360_v57 = vsel %vm5232_vm15, %v6324_v25, %v5296_v40  ;;  %v5444_v43 = vmul.f32 %v8243_v16, %v5359_v0 }
 0x4ae   :  { %v5536_v55 = vadd.f32 %v5443_v21, %v5442_v20  ;;  %v5445_v32 = vmul.f32 %v8247_v38, %v5360_v57 }
 0x4b0   :  { %5537 = vadd.xlane.f32.xlu0 %v5536_v55  ;;  %v5539_v56 = vadd.f32 %v5445_v32, %v5444_v43 }
 0x4b2   :  { %5540 = vadd.xlane.f32.xlu1 %v5539_v56 }
 0x4c5   :  { %v5448_v15 = vpop.xlane.xlu0 %5447 }
 0x4c6   :  { %v5549_v13 = vadd.f32 %v8374_v62, %v5448_v15 }
 0x4c8   :  { %5582 = vst.msk [vmem:[%s8543_s7] sm:$0xff] %vm5581_vm0, %v5549_v13 }
 0x4c9   :  { %v5451_v46 = vpop.xlane.xlu0 %5450 }
 0x4ca   :  { %v5550_v16 = vadd.f32 %v8374_v62, %v5451_v46 }
 0x4cc   :  { %5583 = vst.msk [vmem:[%s8543_s7 + $0x8] sm:$0xff] %vm5581_vm0, %v5550_v16 }
 0x4cd   :  { %v5454_v38 = vpop.xlane.xlu1 %5453 }
 0x4ce   :  { %v5551_v51 = vadd.f32 %v8374_v62, %v5454_v38 }
 0x4d0   :  { %5584 = vst.msk [vmem:[%s8543_s7 + $0x10] sm:$0xff] %vm5581_vm0, %v5551_v51 }
 0x4d1   :  { %v5457_v27 = vpop.xlane.xlu1 %5456 }
 0x4d2   :  { %v5552_v35 = vadd.f32 %v8374_v62, %v5457_v27 }
 0x4d4   :  { %5585 = vst.msk [vmem:[%s8543_s7 + $0x18] sm:$0xff] %vm5581_vm0, %v5552_v35 }
 0x4d5   :  { %v5460_v24 = vpop.xlane.xlu0 %5459 }
 0x4d6   :  { %v5553_v41 = vadd.f32 %v8374_v62, %v5460_v24 }
 0x4d7   :  { %v5463_v12 = vpop.xlane.xlu1 %5462 }
 0x4d8   :  { %5586 = vst.msk [vmem:[%s8543_s7 + $0x20] sm:$0xff] %vm5581_vm0, %v5553_v41  ;;  %v5554_v47 = vadd.f32 %v8374_v62, %v5463_v12 }
 0x4da   :  { %5587 = vst.msk [vmem:[%s8543_s7 + $0x28] sm:$0xff] %vm5581_vm0, %v5554_v47 }
 0x4dd   :  { %v5466_v59 = vpop.xlane.xlu0 %5465 }
 0x4de   :  { %v5555_v7 = vadd.f32 %v8374_v62, %v5466_v59 }
 0x4df   :  { %v5469_v61 = vpop.xlane.xlu1 %5468 }
 0x4e0   :  { %5588 = vst.msk [vmem:[%s8543_s7 + $0x30] sm:$0xff] %vm5581_vm0, %v5555_v7  ;;  %v5556_v11 = vadd.f32 %v8374_v62, %v5469_v61 }
 0x4e2   :  { %5589 = vst.msk [vmem:[%s8543_s7 + $0x38] sm:$0xff] %vm5581_vm0, %v5556_v11 }
 0x4e5   :  { %v5472_v1 = vpop.xlane.xlu0 %5471 }
 0x4e6   :  { %v5557_v6 = vadd.f32 %v8374_v62, %v5472_v1 }
 0x4e7   :  { %v5475_v18 = vpop.xlane.xlu1 %5474 }
 0x4e8   :  { %5590 = vst.msk [vmem:[%s8543_s7 + $0x40] sm:$0xff] %vm5581_vm0, %v5557_v6  ;;  %v5558_v36 = vadd.f32 %v8374_v62, %v5475_v18 }
 0x4ea   :  { %5591 = vst.msk [vmem:[%s8543_s7 + $0x48] sm:$0xff] %vm5581_vm0, %v5558_v36 }
 0x4ed   :  { %v5478_v60 = vpop.xlane.xlu0 %5477 }
 0x4ee   :  { %v5559_v14 = vadd.f32 %v8374_v62, %v5478_v60 }
 0x4ef   :  { %v5481_v8 = vpop.xlane.xlu1 %5480 }
 0x4f0   :  { %5592 = vst.msk [vmem:[%s8543_s7 + $0x50] sm:$0xff] %vm5581_vm0, %v5559_v14  ;;  %v5560_v44 = vadd.f32 %v8374_v62, %v5481_v8 }
 0x4f2   :  { %5593 = vst.msk [vmem:[%s8543_s7 + $0x58] sm:$0xff] %vm5581_vm0, %v5560_v44 }
 0x4f5   :  { %v5484_v37 = vpop.xlane.xlu0 %5483 }
 0x4f6   :  { %v5561_v3 = vadd.f32 %v8374_v62, %v5484_v37 }
 0x4f7   :  { %v5487_v53 = vpop.xlane.xlu1 %5486 }
 0x4f8   :  { %5594 = vst.msk [vmem:[%s8543_s7 + $0x60] sm:$0xff] %vm5581_vm0, %v5561_v3  ;;  %v5562_v29 = vadd.f32 %v8374_v62, %v5487_v53 }
 0x4fa   :  { %5595 = vst.msk [vmem:[%s8543_s7 + $0x68] sm:$0xff] %vm5581_vm0, %v5562_v29 }
 0x4fd   :  { %v5490_v5 = vpop.xlane.xlu0 %5489 }
 0x4fe   :  { %v5563_v52 = vadd.f32 %v8374_v62, %v5490_v5 }
 0x4ff   :  { %v5493_v2 = vpop.xlane.xlu1 %5492 }
 0x500   :  { %5596 = vst.msk [vmem:[%s8543_s7 + $0x70] sm:$0xff] %vm5581_vm0, %v5563_v52  ;;  %v5564_v30 = vadd.f32 %v8374_v62, %v5493_v2 }
 0x502   :  { %5597 = vst.msk [vmem:[%s8543_s7 + $0x78] sm:$0xff] %vm5581_vm0, %v5564_v30 }
 0x505   :  { %v5496_v42 = vpop.xlane.xlu0 %5495 }
 0x506   :  { %v5565_v28 = vadd.f32 %v8374_v62, %v5496_v42 }
 0x507   :  { %v5499_v45 = vpop.xlane.xlu1 %5498 }
 0x508   :  { %5598 = vst.msk [vmem:[%s8543_s7 + $0x80] sm:$0xff] %vm5581_vm0, %v5565_v28  ;;  %v5566_v9 = vadd.f32 %v8374_v62, %v5499_v45 }
 0x50a   :  { %5599 = vst.msk [vmem:[%s8543_s7 + $0x88] sm:$0xff] %vm5581_vm0, %v5566_v9 }
 0x50d   :  { %v5502_v22 = vpop.xlane.xlu0 %5501 }
 0x50e   :  { %v5567_v34 = vadd.f32 %v8374_v62, %v5502_v22 }
 0x50f   :  { %v5505_v63 = vpop.xlane.xlu1 %5504 }
 0x510   :  { %5600 = vst.msk [vmem:[%s8543_s7 + $0x90] sm:$0xff] %vm5581_vm0, %v5567_v34  ;;  %v5568_v48 = vadd.f32 %v8374_v62, %v5505_v63 }
 0x512   :  { %5601 = vst.msk [vmem:[%s8543_s7 + $0x98] sm:$0xff] %vm5581_vm0, %v5568_v48 }
 0x515   :  { %v5508_v58 = vpop.xlane.xlu0 %5507 }
 0x516   :  { %v5569_v19 = vadd.f32 %v8374_v62, %v5508_v58 }
 0x517   :  { %v5511_v17 = vpop.xlane.xlu1 %5510 }
 0x518   :  { %5602 = vst.msk [vmem:[%s8543_s7 + $0xa0] sm:$0xff] %vm5581_vm0, %v5569_v19  ;;  %v5570_v49 = vadd.f32 %v8374_v62, %v5511_v17 }
 0x51a   :  { %5603 = vst.msk [vmem:[%s8543_s7 + $0xa8] sm:$0xff] %vm5581_vm0, %v5570_v49 }
 0x51d   :  { %v5514_v26 = vpop.xlane.xlu0 %5513 }
 0x51e   :  { %v5571_v10 = vadd.f32 %v8374_v62, %v5514_v26 }
 0x51f   :  { %v5517_v31 = vpop.xlane.xlu1 %5516 }
 0x520   :  { %5604 = vst.msk [vmem:[%s8543_s7 + $0xb0] sm:$0xff] %vm5581_vm0, %v5571_v10  ;;  %v5572_v33 = vadd.f32 %v8374_v62, %v5517_v31 }
 0x522   :  { %5605 = vst.msk [vmem:[%s8543_s7 + $0xb8] sm:$0xff] %vm5581_vm0, %v5572_v33 }
 0x525   :  { %v5520_v23 = vpop.xlane.xlu0 %5519 }
 0x526   :  { %v5573_v54 = vadd.f32 %v8374_v62, %v5520_v23 }
 0x527   :  { %v5523_v25 = vpop.xlane.xlu1 %5522 }
 0x528   :  { %5606 = vst.msk [vmem:[%s8543_s7 + $0xc0] sm:$0xff] %vm5581_vm0, %v5573_v54  ;;  %v5574_v39 = vadd.f32 %v8374_v62, %v5523_v25 }
 0x52a   :  { %5607 = vst.msk [vmem:[%s8543_s7 + $0xc8] sm:$0xff] %vm5581_vm0, %v5574_v39 }
 0x52d   :  { %v5526_v4 = vpop.xlane.xlu0 %5525 }
 0x52e   :  { %v5575_v40 = vadd.f32 %v8374_v62, %v5526_v4 }
 0x52f   :  { %v5529_v50 = vpop.xlane.xlu1 %5528 }
 0x530   :  { %5608 = vst.msk [vmem:[%s8543_s7 + $0xd0] sm:$0xff] %vm5581_vm0, %v5575_v40  ;;  %v5576_v20 = vadd.f32 %v8374_v62, %v5529_v50 }
 0x532   :  { %5609 = vst.msk [vmem:[%s8543_s7 + $0xd8] sm:$0xff] %vm5581_vm0, %v5576_v20 }
 0x535   :  { %v5532_v21 = vpop.xlane.xlu0 %5531 }
 0x536   :  { %v5577_v0 = vadd.f32 %v8374_v62, %v5532_v21 }
 0x537   :  { %v5535_v57 = vpop.xlane.xlu1 %5534 }
 0x538   :  { %5610 = vst.msk [vmem:[%s8543_s7 + $0xe0] sm:$0xff] %vm5581_vm0, %v5577_v0  ;;  %v5578_v43 = vadd.f32 %v8374_v62, %v5535_v57 }
 0x53a   :  { %5611 = vst.msk [vmem:[%s8543_s7 + $0xe8] sm:$0xff] %vm5581_vm0, %v5578_v43 }
 0x53d   :  { %v5538_v55 = vpop.xlane.xlu0 %5537 }
 0x53e   :  { %v5579_v32 = vadd.f32 %v8374_v62, %v5538_v55 }
 0x53f   :  { %v5541_v56 = vpop.xlane.xlu1 %5540 }
 0x540   :  { %5612 = vst.msk [vmem:[%s8543_s7 + $0xf0] sm:$0xff] %vm5581_vm0, %v5579_v32  ;;  %v5580_v15 = vadd.f32 %v8374_v62, %v5541_v56 }
 0x542   :  { %5613 = vst.msk [vmem:[%s8543_s7 + $0xf8] sm:$0xff] %vm5581_vm0, %v5580_v15 }
 0x543   :  { %5618 = vsyncpa [#allocation4], 1 }
 0x544   :  { %5619 = vsyncpa [#allocation6], 1 }

</bundles_post_ra>
